<compile_context>
chip_gen: v7x
topology: tpu7x:2x2x1
jax: 0.10.0
libtpu: 0.0.40
codegen_flags: <defaults>
</compile_context>

<pallas_src>
import functools

import jax
import jax.numpy as jnp
from jax import lax
from jax.experimental import pallas as pl
from jax.experimental.pallas import tpu as pltpu

EPS = 1e-5


# ----------------------------- in-kernel helpers -----------------------------

def _layernorm(x, g, b):
    mu = jnp.mean(x, axis=-1, keepdims=True)
    xc = x - mu
    var = jnp.mean(xc * xc, axis=-1, keepdims=True)
    return xc * lax.rsqrt(var + EPS) * g + b


def _quick_gelu(x):
    # CLIP's QuickGELU: x * sigmoid(1.702 * x)
    return x * jax.nn.sigmoid(1.702 * x)


# --------------------------- fused encoder kernel -----------------------------

def encoder_kernel(num_heads, n_layers,
                   patches_ref, pw_ref, cls_ref, pos_ref, lnpp_ref,
                   wqkv_ref, wo_ref, w1_ref, w2_ref,
                   small_ref, bqkv_ref, bfc1_ref, proj_ref,
                   o_ref, tok_ref):
    """Grid = (num_chunks,). One grid step processes Bc batch elements through
    patch-embed -> ln_pre -> L residual blocks -> ln_post -> proj, with all
    layer weights VMEM-resident (constant index maps)."""
    Bc = patches_ref.shape[0]
    T, D = tok_ref.shape[1], tok_ref.shape[2]
    hd = D // num_heads
    scale = 1.0 / float(hd) ** 0.5
    bf16 = jnp.bfloat16
    f32 = jnp.float32

    ln_pre_g, ln_pre_b = lnpp_ref[0:1, :], lnpp_ref[1:2, :]
    ln_post_g, ln_post_b = lnpp_ref[2:3, :], lnpp_ref[3:4, :]

    for b in range(Bc):  # static, small per-chunk batch
        # ---- prologue: fused patch-embed matmul + [CLS] + pos_emb + ln_pre ----
        emb = jnp.dot(patches_ref[b], pw_ref[...],
                      preferred_element_type=f32)                      # [N, D]
        tok_ref[b, 0:1, :] = cls_ref[...] + pos_ref[0:1, :]            # CLS row
        tok_ref[b, 1:, :] = emb + pos_ref[1:, :]                       # patches
        tok_ref[b] = _layernorm(tok_ref[b], ln_pre_g, ln_pre_b)

        # ---- L residual attention blocks (pre-LN) over VMEM-resident weights ----
        def layer_body(l, carry):
            x = tok_ref[b]                                             # [T, D] f32
            small = small_ref[l]                                       # [6, D] f32
            ln1_g, ln1_b = small[0:1], small[1:2]
            ln2_g, ln2_b = small[2:3], small[3:4]
            b_o, b_fc2 = small[4:5], small[5:6]

            h = _layernorm(x, ln1_g, ln1_b)
            qkv = jnp.dot(h.astype(bf16), wqkv_ref[l],
                          preferred_element_type=f32) + bqkv_ref[l]    # [T, 3D]

            # per-head attention via static 128-lane slices (no relayouts)
            ctx_heads = []
            for hh in range(num_heads):
                q = qkv[:, 0 * D + hh * hd: 0 * D + (hh + 1) * hd].astype(bf16)
                k = qkv[:, 1 * D + hh * hd: 1 * D + (hh + 1) * hd].astype(bf16)
                v = qkv[:, 2 * D + hh * hd: 2 * D + (hh + 1) * hd].astype(bf16)
                s = lax.dot_general(q, k, (((1,), (1,)), ((), ())),
                                    preferred_element_type=f32) * scale  # [T, T]
                s = s - jnp.max(s, axis=-1, keepdims=True)
                p = jnp.exp(s)
                p = p * pl.reciprocal(jnp.sum(p, axis=-1, keepdims=True),
                                      approx=True)
                ctx_heads.append(jnp.dot(p.astype(bf16), v,
                                         preferred_element_type=f32))   # [T, hd]
            ctx = jnp.concatenate(ctx_heads, axis=-1)                   # [T, D]

            attn = jnp.dot(ctx.astype(bf16), wo_ref[l],
                           preferred_element_type=f32) + b_o
            x = x + attn

            h2 = _layernorm(x, ln2_g, ln2_b)
            m = jnp.dot(h2.astype(bf16), w1_ref[l],
                        preferred_element_type=f32) + bfc1_ref[l]
            m = _quick_gelu(m)
            m = jnp.dot(m.astype(bf16), w2_ref[l],
                        preferred_element_type=f32) + b_fc2
            tok_ref[b] = x + m
            return carry

        lax.fori_loop(0, n_layers, layer_body, 0)

        # ---- epilogue: ln_post + projection on patch tokens only (CLS dropped) ----
        y = _layernorm(tok_ref[b, 1:, :], ln_post_g, ln_post_b)         # [N, D]
        o_ref[b] = jnp.dot(y.astype(bf16), proj_ref[...],
                           preferred_element_type=f32).astype(o_ref.dtype)


def run_encoder(patches, params, *, num_heads):
    B, N, CPP = patches.shape
    D = params["patch_w"].shape[1]
    T = N + 1
    L = params["w_qkv"].shape[0]
    Dout = params["proj"].shape[-1]

    # 2 parallel chunks so both v7x TensorCores are used; no-op on v5e/v6e.
    num_chunks = 2 if (B % 2 == 0 and B >= 2) else 1
    Bc = B // num_chunks

    def const_spec(a):
        # full-extent block, constant index -> DMA'd exactly once per core.
        zeros = (0,) * a.ndim
        return pl.BlockSpec(a.shape, lambda c, z=zeros: z)

    in_specs = [
        pl.BlockSpec((Bc, N, CPP), lambda c: (c, 0, 0)),   # im2col patches
        const_spec(params["patch_w"]),
        const_spec(params["cls_emb"]),
        const_spec(params["pos_emb"]),
        const_spec(params["ln_pre_post"]),
        # TODO(synk): for large towers (weights >> VMEM, e.g. 12x768) switch these
        # four to per-layer-blocked BlockSpecs over an (chunks, L) grid instead
        # of full residency.
        const_spec(params["w_qkv"]),
        const_spec(params["w_o"]),
        const_spec(params["w_fc1"]),
        const_spec(params["w_fc2"]),
        const_spec(params["small"]),
        const_spec(params["b_qkv"]),
        const_spec(params["b_fc1"]),
        const_spec(params["proj"]),
    ]
    out_specs = pl.BlockSpec((Bc, N, Dout), lambda c: (c, 0, 0))

    return pl.pallas_call(
        functools.partial(encoder_kernel, num_heads, L),
        grid=(num_chunks,),
        in_specs=in_specs,
        out_specs=out_specs,
        out_shape=jax.ShapeDtypeStruct((B, N, Dout), jnp.float32),
        scratch_shapes=[pltpu.VMEM((Bc, T, D), jnp.float32)],
        compiler_params=pltpu.CompilerParams(
            dimension_semantics=("parallel",)),
    )(patches, params["patch_w"], params["cls_emb"], params["pos_emb"],
      params["ln_pre_post"], params["w_qkv"], params["w_o"],
      params["w_fc1"], params["w_fc2"], params["small"],
      params["b_qkv"], params["b_fc1"], params["proj"])


# ----------------------------- parameters & model -----------------------------

def init_params(key, *, in_channels, patch, n_tokens, width, layers,
                mlp_dim, embed_dim):
    scale = 0.02
    ks = iter(jax.random.split(key, 16))
    bf16 = jnp.bfloat16

    def rnd(shape, dtype=jnp.float32):
        return (scale * jax.random.normal(next(ks), shape)).astype(dtype)

    # Matmul weights pre-transposed to [in, out] and stored bf16 (frozen tower);
    # LN params / biases / embeddings in f32.  The 6 width-shaped per-layer
    # params are packed into one [L, 6, W] slab (rows: ln1_g, ln1_b, ln2_g,
    # ln2_b, b_o, b_fc2); ln_pre/ln_post are packed into one [4, W] slab.
    small = jnp.concatenate([
        jnp.ones((layers, 1, width), jnp.float32),   # ln1_g
        jnp.zeros((layers, 1, width), jnp.float32),  # ln1_b
        jnp.ones((layers, 1, width), jnp.float32),   # ln2_g
        jnp.zeros((layers, 1, width), jnp.float32),  # ln2_b
        rnd((layers, 1, width)),                     # b_o
        rnd((layers, 1, width)),                     # b_fc2
    ], axis=1)

    ln_pre_post = jnp.concatenate([
        jnp.ones((1, width), jnp.float32),   # ln_pre_g
        jnp.zeros((1, width), jnp.float32),  # ln_pre_b
        jnp.ones((1, width), jnp.float32),   # ln_post_g
        jnp.zeros((1, width), jnp.float32),  # ln_post_b
    ], axis=0)

    return {
        "patch_w": rnd((in_channels * patch * patch, width), bf16),
        "cls_emb": rnd((1, width)),
        "pos_emb": rnd((n_tokens, width)),
        "ln_pre_post": ln_pre_post,
        "proj": rnd((width, embed_dim), bf16),
        # per-layer weights stacked on a leading [L, ...] axis
        "w_qkv": rnd((layers, width, 3 * width), bf16),
        "b_qkv": rnd((layers, 1, 3 * width)),
        "w_o": rnd((layers, width, width), bf16),
        "w_fc1": rnd((layers, width, mlp_dim), bf16),
        "b_fc1": rnd((layers, 1, mlp_dim)),
        "w_fc2": rnd((layers, mlp_dim, width), bf16),
        "small": small,
    }


def solarclip_remove_cls_forward(x, params, *, patch, num_heads):
    """encode_clip(x) followed by Remove_class_token()."""
    B, C, H, W = x.shape
    gh, gw = H // patch, W // patch
    N = gh * gw
    # Conv patch-embed as im2col (pure layout glue in XLA); the matmul itself
    # is fused into the kernel prologue.
    p = x.reshape(B, C, gh, patch, gw, patch)
    p = p.transpose(0, 2, 4, 1, 3, 5).reshape(B, N, C * patch * patch)
    p = p.astype(jnp.bfloat16)
    # Fused: patch-embed, +CLS, +pos_emb, ln_pre, L blocks, ln_post, proj, drop CLS.
    return run_encoder(p, params, num_heads=num_heads)        # [B, N, Dout]


# ------------------------------------ main ------------------------------------

if __name__ == "__main__":
    # Small-but-lane-dense ViT consistent with SolarCLIP's 1-channel (HMI) tower.
    B, C, H, W = 2, 1, 64, 64
    PATCH = 16
    WIDTH = 256          # hidden dim on the lane axis (multiple of 128)
    LAYERS = 2
    HEADS = 2            # head_dim = 128 -> head split is exact lane tiles
    MLP = 4 * WIDTH
    EMBED = 128          # lane-dense projection output
    N_PATCH = (H // PATCH) * (W // PATCH)     # 16 patch tokens
    N_TOKENS = N_PATCH + 1                    # +1 for CLS

    key = jax.random.PRNGKey(0)
    k_x, k_p = jax.random.split(key)
    x = jax.random.normal(k_x, (B, C, H, W), jnp.float32)

    params = init_params(k_p, in_channels=C, patch=PATCH, n_tokens=N_TOKENS,
                         width=WIDTH, layers=LAYERS, mlp_dim=MLP,
                         embed_dim=EMBED)

    fwd = jax.jit(functools.partial(solarclip_remove_cls_forward,
                                    patch=PATCH, num_heads=HEADS))
    out = jax.block_until_ready(fwd(x, params))
    assert out.shape == (B, N_PATCH, EMBED), out.shape
    assert bool(jnp.all(jnp.isfinite(out)))
    print("KERNEL_OK")
</pallas_src>

<mosaic_0001>
module attributes {stable_mosaic.version = 11 : i64} {
  func.func @encoder_kernel(%arg0: i32, %arg1: memref<1x16x256xbf16, #tpu.memory_space<vmem>>, %arg2: memref<256x256xbf16, #tpu.memory_space<vmem>>, %arg3: memref<1x256xf32, #tpu.memory_space<vmem>>, %arg4: memref<17x256xf32, #tpu.memory_space<vmem>>, %arg5: memref<4x256xf32, #tpu.memory_space<vmem>>, %arg6: memref<2x256x768xbf16, #tpu.memory_space<vmem>>, %arg7: memref<2x256x256xbf16, #tpu.memory_space<vmem>>, %arg8: memref<2x256x1024xbf16, #tpu.memory_space<vmem>>, %arg9: memref<2x1024x256xbf16, #tpu.memory_space<vmem>>, %arg10: memref<2x6x256xf32, #tpu.memory_space<vmem>>, %arg11: memref<2x1x768xf32, #tpu.memory_space<vmem>>, %arg12: memref<2x1x1024xf32, #tpu.memory_space<vmem>>, %arg13: memref<256x128xbf16, #tpu.memory_space<vmem>>, %arg14: memref<1x16x128xf32, #tpu.memory_space<vmem>>, %arg15: memref<1x17x256xf32, #tpu.memory_space<vmem>>) attributes {dimension_semantics = [#tpu.dimension_semantics<parallel>], iteration_bounds = array<i64: 2>, scalar_prefetch = 0 : i64, scratch_operands = 1 : i64, tpu.core_type = #tpu.core_type<tc>, window_params = [{transform_indices = @transform_0, window_bounds = array<i64: 1, 16, 256>}, {pipeline_mode = #tpu.pipeline_mode<synchronous>, transform_indices = @transform_1, window_bounds = array<i64: 256, 256>}, {pipeline_mode = #tpu.pipeline_mode<synchronous>, transform_indices = @transform_2, window_bounds = array<i64: 1, 256>}, {pipeline_mode = #tpu.pipeline_mode<synchronous>, transform_indices = @transform_3, window_bounds = array<i64: 17, 256>}, {pipeline_mode = #tpu.pipeline_mode<synchronous>, transform_indices = @transform_4, window_bounds = array<i64: 4, 256>}, {pipeline_mode = #tpu.pipeline_mode<synchronous>, transform_indices = @transform_5, window_bounds = array<i64: 2, 256, 768>}, {pipeline_mode = #tpu.pipeline_mode<synchronous>, transform_indices = @transform_6, window_bounds = array<i64: 2, 256, 256>}, {pipeline_mode = #tpu.pipeline_mode<synchronous>, transform_indices = @transform_7, window_bounds = array<i64: 2, 256, 1024>}, {pipeline_mode = #tpu.pipeline_mode<synchronous>, transform_indices = @transform_8, window_bounds = array<i64: 2, 1024, 256>}, {pipeline_mode = #tpu.pipeline_mode<synchronous>, transform_indices = @transform_9, window_bounds = array<i64: 2, 6, 256>}, {pipeline_mode = #tpu.pipeline_mode<synchronous>, transform_indices = @transform_10, window_bounds = array<i64: 2, 1, 768>}, {pipeline_mode = #tpu.pipeline_mode<synchronous>, transform_indices = @transform_11, window_bounds = array<i64: 2, 1, 1024>}, {pipeline_mode = #tpu.pipeline_mode<synchronous>, transform_indices = @transform_12, window_bounds = array<i64: 256, 128>}, {transform_indices = @transform_13, window_bounds = array<i64: 1, 16, 128>}]} {
    %c0 = arith.constant 0 : index
    %c0_0 = arith.constant 0 : index
    %0 = vector.load %arg5[%c0, %c0_0] : memref<4x256xf32, #tpu.memory_space<vmem>>, vector<1x256xf32>
    %c1 = arith.constant 1 : index
    %c0_1 = arith.constant 0 : index
    %1 = vector.load %arg5[%c1, %c0_1] : memref<4x256xf32, #tpu.memory_space<vmem>>, vector<1x256xf32>
    %c2 = arith.constant 2 : index
    %c0_2 = arith.constant 0 : index
    %2 = vector.load %arg5[%c2, %c0_2] : memref<4x256xf32, #tpu.memory_space<vmem>>, vector<1x256xf32>
    %c3 = arith.constant 3 : index
    %c0_3 = arith.constant 0 : index
    %3 = vector.load %arg5[%c3, %c0_3] : memref<4x256xf32, #tpu.memory_space<vmem>>, vector<1x256xf32>
    %c0_4 = arith.constant 0 : index
    %c0_5 = arith.constant 0 : index
    %c0_6 = arith.constant 0 : index
    %4 = vector.load %arg1[%c0_4, %c0_5, %c0_6] : memref<1x16x256xbf16, #tpu.memory_space<vmem>>, vector<1x16x256xbf16>
    %5 = vector.shape_cast %4 : vector<1x16x256xbf16> to vector<16x256xbf16>
    %c0_7 = arith.constant 0 : index
    %c0_8 = arith.constant 0 : index
    %6 = vector.load %arg2[%c0_7, %c0_8] : memref<256x256xbf16, #tpu.memory_space<vmem>>, vector<256x256xbf16>
    %cst = arith.constant dense<0.000000e+00> : vector<16x256xf32>
    %7 = tpu.matmul %5, %6, %cst {dimension_numbers = #tpu.dot_dimension_numbers<[1], [0], [0], [1], [0, 0, 1, 1], [], []>} : vector<16x256xbf16>, vector<256x256xbf16>, vector<16x256xf32> -> vector<16x256xf32>
    %c0_9 = arith.constant 0 : index
    %c0_10 = arith.constant 0 : index
    %8 = vector.load %arg3[%c0_9, %c0_10] : memref<1x256xf32, #tpu.memory_space<vmem>>, vector<1x256xf32>
    %c0_11 = arith.constant 0 : index
    %c0_12 = arith.constant 0 : index
    %9 = vector.load %arg4[%c0_11, %c0_12] : memref<17x256xf32, #tpu.memory_space<vmem>>, vector<1x256xf32>
    %10 = arith.addf %8, %9 : vector<1x256xf32>
    %c0_13 = arith.constant 0 : index
    %c0_14 = arith.constant 0 : index
    %c0_15 = arith.constant 0 : index
    %11 = vector.load %arg15[%c0_13, %c0_14, %c0_15] : memref<1x17x256xf32, #tpu.memory_space<vmem>>, vector<1x1x256xf32>
    %12 = vector.shape_cast %11 : vector<1x1x256xf32> to vector<1x256xf32>
    %13 = vector.shape_cast %10 : vector<1x256xf32> to vector<1x1x256xf32>
    tpu.vector_store %arg15[%c0_13, %c0_14, %c0_15], %13 {strides = array<i32>} : memref<1x17x256xf32, #tpu.memory_space<vmem>>, vector<1x1x256xf32>,
    %c1_16 = arith.constant 1 : index
    %c0_17 = arith.constant 0 : index
    %14 = vector.load %arg4[%c1_16, %c0_17] : memref<17x256xf32, #tpu.memory_space<vmem>>, vector<16x256xf32>
    %15 = arith.addf %7, %14 : vector<16x256xf32>
    %c0_18 = arith.constant 0 : index
    %c1_19 = arith.constant 1 : index
    %c0_20 = arith.constant 0 : index
    %16 = vector.load %arg15[%c0_18, %c1_19, %c0_20] : memref<1x17x256xf32, #tpu.memory_space<vmem>>, vector<1x16x256xf32>
    %17 = vector.shape_cast %16 : vector<1x16x256xf32> to vector<16x256xf32>
    %18 = vector.shape_cast %15 : vector<16x256xf32> to vector<1x16x256xf32>
    tpu.vector_store %arg15[%c0_18, %c1_19, %c0_20], %18 {strides = array<i32>} : memref<1x17x256xf32, #tpu.memory_space<vmem>>, vector<1x16x256xf32>,
    %c0_21 = arith.constant 0 : index
    %c0_22 = arith.constant 0 : index
    %c0_23 = arith.constant 0 : index
    %19 = vector.load %arg15[%c0_21, %c0_22, %c0_23] : memref<1x17x256xf32, #tpu.memory_space<vmem>>, vector<1x17x256xf32>
    %20 = vector.shape_cast %19 : vector<1x17x256xf32> to vector<17x256xf32>
    %cst_24 = arith.constant dense<0.000000e+00> : vector<17xf32>
    %21 = vector.multi_reduction <add>, %20, %cst_24 [1] : vector<17x256xf32> to vector<17xf32>
    %22 = vector.shape_cast %21 : vector<17xf32> to vector<17x1xf32>
    %cst_25 = arith.constant 2.560000e+02 : f32
    %23 = vector.broadcast %cst_25 : f32 to vector<17x1xf32>
    %24 = arith.divf %22, %23 : vector<17x1xf32>
    %25 = vector.broadcast %24 : vector<17x1xf32> to vector<17x256xf32>
    %26 = arith.subf %20, %25 : vector<17x256xf32>
    %27 = arith.mulf %26, %26 : vector<17x256xf32>
    %cst_26 = arith.constant dense<0.000000e+00> : vector<17xf32>
    %28 = vector.multi_reduction <add>, %27, %cst_26 [1] : vector<17x256xf32> to vector<17xf32>
    %29 = vector.shape_cast %28 : vector<17xf32> to vector<17x1xf32>
    %cst_27 = arith.constant 2.560000e+02 : f32
    %30 = vector.broadcast %cst_27 : f32 to vector<17x1xf32>
    %31 = arith.divf %29, %30 : vector<17x1xf32>
    %cst_28 = arith.constant 9.99999974E-6 : f32
    %32 = vector.broadcast %cst_28 : f32 to vector<17x1xf32>
    %33 = arith.addf %31, %32 : vector<17x1xf32>
    %34 = math.rsqrt %33 : vector<17x1xf32>
    %35 = vector.broadcast %34 : vector<17x1xf32> to vector<17x256xf32>
    %36 = arith.mulf %26, %35 : vector<17x256xf32>
    %37 = vector.broadcast %0 : vector<1x256xf32> to vector<17x256xf32>
    %38 = arith.mulf %36, %37 : vector<17x256xf32>
    %39 = vector.broadcast %1 : vector<1x256xf32> to vector<17x256xf32>
    %40 = arith.addf %38, %39 : vector<17x256xf32>
    %c0_29 = arith.constant 0 : index
    %c0_30 = arith.constant 0 : index
    %c0_31 = arith.constant 0 : index
    %41 = vector.load %arg15[%c0_29, %c0_30, %c0_31] : memref<1x17x256xf32, #tpu.memory_space<vmem>>, vector<1x17x256xf32>
    %42 = vector.shape_cast %41 : vector<1x17x256xf32> to vector<17x256xf32>
    %43 = vector.shape_cast %40 : vector<17x256xf32> to vector<1x17x256xf32>
    tpu.vector_store %arg15[%c0_29, %c0_30, %c0_31], %43 {strides = array<i32>} : memref<1x17x256xf32, #tpu.memory_space<vmem>>, vector<1x17x256xf32>,
    %c0_i32 = arith.constant 0 : i32
    %c2_i32 = arith.constant 2 : i32
    %44 = arith.addi %c0_i32, %c2_i32 : i32
    %c1_i32 = arith.constant 1 : i32
    scf.for %arg16 = %c0_i32 to %44 step %c1_i32  : i32 {
      %c0_47 = arith.constant 0 : index
      %c0_48 = arith.constant 0 : index
      %c0_49 = arith.constant 0 : index
      %73 = vector.load %arg15[%c0_47, %c0_48, %c0_49] : memref<1x17x256xf32, #tpu.memory_space<vmem>>, vector<1x17x256xf32>
      %74 = vector.shape_cast %73 : vector<1x17x256xf32> to vector<17x256xf32>
      %75 = arith.index_cast %arg16 : i32 to index
      %c0_50 = arith.constant 0 : index
      %c0_51 = arith.constant 0 : index
      %76 = vector.load %arg10[%75, %c0_50, %c0_51] : memref<2x6x256xf32, #tpu.memory_space<vmem>>, vector<1x6x256xf32>
      %77 = vector.shape_cast %76 : vector<1x6x256xf32> to vector<6x256xf32>
      %78 = vector.extract_strided_slice %77 {offsets = [0, 0], sizes = [1, 256], strides = [1, 1]} : vector<6x256xf32> to vector<1x256xf32>
      %79 = vector.extract_strided_slice %77 {offsets = [1, 0], sizes = [1, 256], strides = [1, 1]} : vector<6x256xf32> to vector<1x256xf32>
      %80 = vector.extract_strided_slice %77 {offsets = [2, 0], sizes = [1, 256], strides = [1, 1]} : vector<6x256xf32> to vector<1x256xf32>
      %81 = vector.extract_strided_slice %77 {offsets = [3, 0], sizes = [1, 256], strides = [1, 1]} : vector<6x256xf32> to vector<1x256xf32>
      %82 = vector.extract_strided_slice %77 {offsets = [4, 0], sizes = [1, 256], strides = [1, 1]} : vector<6x256xf32> to vector<1x256xf32>
      %83 = vector.extract_strided_slice %77 {offsets = [5, 0], sizes = [1, 256], strides = [1, 1]} : vector<6x256xf32> to vector<1x256xf32>
      %cst_52 = arith.constant dense<0.000000e+00> : vector<17xf32>
      %84 = vector.multi_reduction <add>, %74, %cst_52 [1] : vector<17x256xf32> to vector<17xf32>
      %85 = vector.shape_cast %84 : vector<17xf32> to vector<17x1xf32>
      %cst_53 = arith.constant 2.560000e+02 : f32
      %86 = vector.broadcast %cst_53 : f32 to vector<17x1xf32>
      %87 = arith.divf %85, %86 : vector<17x1xf32>
      %88 = vector.broadcast %87 : vector<17x1xf32> to vector<17x256xf32>
      %89 = arith.subf %74, %88 : vector<17x256xf32>
      %90 = arith.mulf %89, %89 : vector<17x256xf32>
      %cst_54 = arith.constant dense<0.000000e+00> : vector<17xf32>
      %91 = vector.multi_reduction <add>, %90, %cst_54 [1] : vector<17x256xf32> to vector<17xf32>
      %92 = vector.shape_cast %91 : vector<17xf32> to vector<17x1xf32>
      %cst_55 = arith.constant 2.560000e+02 : f32
      %93 = vector.broadcast %cst_55 : f32 to vector<17x1xf32>
      %94 = arith.divf %92, %93 : vector<17x1xf32>
      %cst_56 = arith.constant 9.99999974E-6 : f32
      %95 = vector.broadcast %cst_56 : f32 to vector<17x1xf32>
      %96 = arith.addf %94, %95 : vector<17x1xf32>
      %97 = math.rsqrt %96 : vector<17x1xf32>
      %98 = vector.broadcast %97 : vector<17x1xf32> to vector<17x256xf32>
      %99 = arith.mulf %89, %98 : vector<17x256xf32>
      %100 = vector.broadcast %78 : vector<1x256xf32> to vector<17x256xf32>
      %101 = arith.mulf %99, %100 : vector<17x256xf32>
      %102 = vector.broadcast %79 : vector<1x256xf32> to vector<17x256xf32>
      %103 = arith.addf %101, %102 : vector<17x256xf32>
      %104 = arith.truncf %103 : vector<17x256xf32> to vector<17x256xbf16>
      %105 = arith.index_cast %arg16 : i32 to index
      %c0_57 = arith.constant 0 : index
      %c0_58 = arith.constant 0 : index
      %106 = vector.load %arg6[%105, %c0_57, %c0_58] : memref<2x256x768xbf16, #tpu.memory_space<vmem>>, vector<1x256x768xbf16>
      %107 = vector.shape_cast %106 : vector<1x256x768xbf16> to vector<256x768xbf16>
      %cst_59 = arith.constant dense<0.000000e+00> : vector<17x768xf32>
      %108 = tpu.matmul %104, %107, %cst_59 {dimension_numbers = #tpu.dot_dimension_numbers<[1], [0], [0], [1], [0, 0, 1, 1], [], []>} : vector<17x256xbf16>, vector<256x768xbf16>, vector<17x768xf32> -> vector<17x768xf32>
      %109 = arith.index_cast %arg16 : i32 to index
      %c0_60 = arith.constant 0 : index
      %c0_61 = arith.constant 0 : index
      %110 = vector.load %arg11[%109, %c0_60, %c0_61] : memref<2x1x768xf32, #tpu.memory_space<vmem>>, vector<1x1x768xf32>
      %111 = vector.shape_cast %110 : vector<1x1x768xf32> to vector<1x768xf32>
      %112 = vector.broadcast %111 : vector<1x768xf32> to vector<17x768xf32>
      %113 = arith.addf %108, %112 : vector<17x768xf32>
      %114 = vector.extract_strided_slice %113 {offsets = [0, 0], sizes = [17, 128], strides = [1, 1]} : vector<17x768xf32> to vector<17x128xf32>
      %115 = arith.truncf %114 : vector<17x128xf32> to vector<17x128xbf16>
      %116 = vector.extract_strided_slice %113 {offsets = [0, 256], sizes = [17, 128], strides = [1, 1]} : vector<17x768xf32> to vector<17x128xf32>
      %117 = arith.truncf %116 : vector<17x128xf32> to vector<17x128xbf16>
      %118 = vector.extract_strided_slice %113 {offsets = [0, 512], sizes = [17, 128], strides = [1, 1]} : vector<17x768xf32> to vector<17x128xf32>
      %119 = arith.truncf %118 : vector<17x128xf32> to vector<17x128xbf16>
      %cst_62 = arith.constant dense<0.000000e+00> : vector<17x17xf32>
      %120 = tpu.matmul %115, %117, %cst_62 {dimension_numbers = #tpu.dot_dimension_numbers<[1], [1], [0], [0], [0, 0, 1, 0], [], []>} : vector<17x128xbf16>, vector<17x128xbf16>, vector<17x17xf32> -> vector<17x17xf32>
      %cst_63 = arith.constant 0.0883883461 : f32
      %121 = vector.broadcast %cst_63 : f32 to vector<17x17xf32>
      %122 = arith.mulf %120, %121 : vector<17x17xf32>
      %cst_64 = arith.constant dense<0xFF800000> : vector<17xf32>
      %123 = vector.multi_reduction <maximumf>, %122, %cst_64 [1] : vector<17x17xf32> to vector<17xf32>
      %124 = vector.shape_cast %123 : vector<17xf32> to vector<17x1xf32>
      %125 = vector.broadcast %124 : vector<17x1xf32> to vector<17x17xf32>
      %126 = arith.subf %122, %125 : vector<17x17xf32>
      %127 = math.exp %126 : vector<17x17xf32>
      %cst_65 = arith.constant dense<0.000000e+00> : vector<17xf32>
      %128 = vector.multi_reduction <add>, %127, %cst_65 [1] : vector<17x17xf32> to vector<17xf32>
      %129 = vector.shape_cast %128 : vector<17xf32> to vector<17x1xf32>
      %130 = tpu.reciprocal %129 {approx = true} : vector<17x1xf32> -> vector<17x1xf32>
      %131 = vector.broadcast %130 : vector<17x1xf32> to vector<17x17xf32>
      %132 = arith.mulf %127, %131 : vector<17x17xf32>
      %133 = arith.truncf %132 : vector<17x17xf32> to vector<17x17xbf16>
      %cst_66 = arith.constant dense<0.000000e+00> : vector<17x128xf32>
      %134 = tpu.matmul %133, %119, %cst_66 {dimension_numbers = #tpu.dot_dimension_numbers<[1], [0], [0], [1], [0, 0, 1, 1], [], []>} : vector<17x17xbf16>, vector<17x128xbf16>, vector<17x128xf32> -> vector<17x128xf32>
      %135 = vector.extract_strided_slice %113 {offsets = [0, 128], sizes = [17, 128], strides = [1, 1]} : vector<17x768xf32> to vector<17x128xf32>
      %136 = arith.truncf %135 : vector<17x128xf32> to vector<17x128xbf16>
      %137 = vector.extract_strided_slice %113 {offsets = [0, 384], sizes = [17, 128], strides = [1, 1]} : vector<17x768xf32> to vector<17x128xf32>
      %138 = arith.truncf %137 : vector<17x128xf32> to vector<17x128xbf16>
      %139 = vector.extract_strided_slice %113 {offsets = [0, 640], sizes = [17, 128], strides = [1, 1]} : vector<17x768xf32> to vector<17x128xf32>
      %140 = arith.truncf %139 : vector<17x128xf32> to vector<17x128xbf16>
      %cst_67 = arith.constant dense<0.000000e+00> : vector<17x17xf32>
      %141 = tpu.matmul %136, %138, %cst_67 {dimension_numbers = #tpu.dot_dimension_numbers<[1], [1], [0], [0], [0, 0, 1, 0], [], []>} : vector<17x128xbf16>, vector<17x128xbf16>, vector<17x17xf32> -> vector<17x17xf32>
      %cst_68 = arith.constant 0.0883883461 : f32
      %142 = vector.broadcast %cst_68 : f32 to vector<17x17xf32>
      %143 = arith.mulf %141, %142 : vector<17x17xf32>
      %cst_69 = arith.constant dense<0xFF800000> : vector<17xf32>
      %144 = vector.multi_reduction <maximumf>, %143, %cst_69 [1] : vector<17x17xf32> to vector<17xf32>
      %145 = vector.shape_cast %144 : vector<17xf32> to vector<17x1xf32>
      %146 = vector.broadcast %145 : vector<17x1xf32> to vector<17x17xf32>
      %147 = arith.subf %143, %146 : vector<17x17xf32>
      %148 = math.exp %147 : vector<17x17xf32>
      %cst_70 = arith.constant dense<0.000000e+00> : vector<17xf32>
      %149 = vector.multi_reduction <add>, %148, %cst_70 [1] : vector<17x17xf32> to vector<17xf32>
      %150 = vector.shape_cast %149 : vector<17xf32> to vector<17x1xf32>
      %151 = tpu.reciprocal %150 {approx = true} : vector<17x1xf32> -> vector<17x1xf32>
      %152 = vector.broadcast %151 : vector<17x1xf32> to vector<17x17xf32>
      %153 = arith.mulf %148, %152 : vector<17x17xf32>
      %154 = arith.truncf %153 : vector<17x17xf32> to vector<17x17xbf16>
      %cst_71 = arith.constant dense<0.000000e+00> : vector<17x128xf32>
      %155 = tpu.matmul %154, %140, %cst_71 {dimension_numbers = #tpu.dot_dimension_numbers<[1], [0], [0], [1], [0, 0, 1, 1], [], []>} : vector<17x17xbf16>, vector<17x128xbf16>, vector<17x128xf32> -> vector<17x128xf32>
      %156 = tpu.concatenate %134, %155 in 1 : vector<17x128xf32>, vector<17x128xf32> -> vector<17x256xf32>
      %157 = arith.truncf %156 : vector<17x256xf32> to vector<17x256xbf16>
      %158 = arith.index_cast %arg16 : i32 to index
      %c0_72 = arith.constant 0 : index
      %c0_73 = arith.constant 0 : index
      %159 = vector.load %arg7[%158, %c0_72, %c0_73] : memref<2x256x256xbf16, #tpu.memory_space<vmem>>, vector<1x256x256xbf16>
      %160 = vector.shape_cast %159 : vector<1x256x256xbf16> to vector<256x256xbf16>
      %cst_74 = arith.constant dense<0.000000e+00> : vector<17x256xf32>
      %161 = tpu.matmul %157, %160, %cst_74 {dimension_numbers = #tpu.dot_dimension_numbers<[1], [0], [0], [1], [0, 0, 1, 1], [], []>} : vector<17x256xbf16>, vector<256x256xbf16>, vector<17x256xf32> -> vector<17x256xf32>
      %162 = vector.broadcast %82 : vector<1x256xf32> to vector<17x256xf32>
      %163 = arith.addf %161, %162 : vector<17x256xf32>
      %164 = arith.addf %74, %163 : vector<17x256xf32>
      %cst_75 = arith.constant dense<0.000000e+00> : vector<17xf32>
      %165 = vector.multi_reduction <add>, %164, %cst_75 [1] : vector<17x256xf32> to vector<17xf32>
      %166 = vector.shape_cast %165 : vector<17xf32> to vector<17x1xf32>
      %cst_76 = arith.constant 2.560000e+02 : f32
      %167 = vector.broadcast %cst_76 : f32 to vector<17x1xf32>
      %168 = arith.divf %166, %167 : vector<17x1xf32>
      %169 = vector.broadcast %168 : vector<17x1xf32> to vector<17x256xf32>
      %170 = arith.subf %164, %169 : vector<17x256xf32>
      %171 = arith.mulf %170, %170 : vector<17x256xf32>
      %cst_77 = arith.constant dense<0.000000e+00> : vector<17xf32>
      %172 = vector.multi_reduction <add>, %171, %cst_77 [1] : vector<17x256xf32> to vector<17xf32>
      %173 = vector.shape_cast %172 : vector<17xf32> to vector<17x1xf32>
      %cst_78 = arith.constant 2.560000e+02 : f32
      %174 = vector.broadcast %cst_78 : f32 to vector<17x1xf32>
      %175 = arith.divf %173, %174 : vector<17x1xf32>
      %cst_79 = arith.constant 9.99999974E-6 : f32
      %176 = vector.broadcast %cst_79 : f32 to vector<17x1xf32>
      %177 = arith.addf %175, %176 : vector<17x1xf32>
      %178 = math.rsqrt %177 : vector<17x1xf32>
      %179 = vector.broadcast %178 : vector<17x1xf32> to vector<17x256xf32>
      %180 = arith.mulf %170, %179 : vector<17x256xf32>
      %181 = vector.broadcast %80 : vector<1x256xf32> to vector<17x256xf32>
      %182 = arith.mulf %180, %181 : vector<17x256xf32>
      %183 = vector.broadcast %81 : vector<1x256xf32> to vector<17x256xf32>
      %184 = arith.addf %182, %183 : vector<17x256xf32>
      %185 = arith.truncf %184 : vector<17x256xf32> to vector<17x256xbf16>
      %186 = arith.index_cast %arg16 : i32 to index
      %c0_80 = arith.constant 0 : index
      %c0_81 = arith.constant 0 : index
      %187 = vector.load %arg8[%186, %c0_80, %c0_81] : memref<2x256x1024xbf16, #tpu.memory_space<vmem>>, vector<1x256x1024xbf16>
      %188 = vector.shape_cast %187 : vector<1x256x1024xbf16> to vector<256x1024xbf16>
      %cst_82 = arith.constant dense<0.000000e+00> : vector<17x1024xf32>
      %189 = tpu.matmul %185, %188, %cst_82 {dimension_numbers = #tpu.dot_dimension_numbers<[1], [0], [0], [1], [0, 0, 1, 1], [], []>} : vector<17x256xbf16>, vector<256x1024xbf16>, vector<17x1024xf32> -> vector<17x1024xf32>
      %190 = arith.index_cast %arg16 : i32 to index
      %c0_83 = arith.constant 0 : index
      %c0_84 = arith.constant 0 : index
      %191 = vector.load %arg12[%190, %c0_83, %c0_84] : memref<2x1x1024xf32, #tpu.memory_space<vmem>>, vector<1x1x1024xf32>
      %192 = vector.shape_cast %191 : vector<1x1x1024xf32> to vector<1x1024xf32>
      %193 = vector.broadcast %192 : vector<1x1024xf32> to vector<17x1024xf32>
      %194 = arith.addf %189, %193 : vector<17x1024xf32>
      %cst_85 = arith.constant 1.702000e+00 : f32
      %195 = vector.broadcast %cst_85 : f32 to vector<17x1024xf32>
      %196 = arith.mulf %195, %194 : vector<17x1024xf32>
      %197 = arith.negf %196 : vector<17x1024xf32>
      %198 = math.exp %197 : vector<17x1024xf32>
      %cst_86 = arith.constant 1.000000e+00 : f32
      %199 = vector.broadcast %cst_86 : f32 to vector<17x1024xf32>
      %200 = arith.addf %199, %198 : vector<17x1024xf32>
      %201 = arith.divf %199, %200 : vector<17x1024xf32>
      %202 = arith.mulf %194, %201 : vector<17x1024xf32>
      %203 = arith.truncf %202 : vector<17x1024xf32> to vector<17x1024xbf16>
      %204 = arith.index_cast %arg16 : i32 to index
      %c0_87 = arith.constant 0 : index
      %c0_88 = arith.constant 0 : index
      %205 = vector.load %arg9[%204, %c0_87, %c0_88] : memref<2x1024x256xbf16, #tpu.memory_space<vmem>>, vector<1x1024x256xbf16>
      %206 = vector.shape_cast %205 : vector<1x1024x256xbf16> to vector<1024x256xbf16>
      %cst_89 = arith.constant dense<0.000000e+00> : vector<17x256xf32>
      %207 = tpu.matmul %203, %206, %cst_89 {dimension_numbers = #tpu.dot_dimension_numbers<[1], [0], [0], [1], [0, 0, 1, 1], [], []>} : vector<17x1024xbf16>, vector<1024x256xbf16>, vector<17x256xf32> -> vector<17x256xf32>
      %208 = vector.broadcast %83 : vector<1x256xf32> to vector<17x256xf32>
      %209 = arith.addf %207, %208 : vector<17x256xf32>
      %210 = arith.addf %164, %209 : vector<17x256xf32>
      %c0_90 = arith.constant 0 : index
      %c0_91 = arith.constant 0 : index
      %c0_92 = arith.constant 0 : index
      %211 = vector.load %arg15[%c0_90, %c0_91, %c0_92] : memref<1x17x256xf32, #tpu.memory_space<vmem>>, vector<1x17x256xf32>
      %212 = vector.shape_cast %211 : vector<1x17x256xf32> to vector<17x256xf32>
      %213 = vector.shape_cast %210 : vector<17x256xf32> to vector<1x17x256xf32>
      tpu.vector_store %arg15[%c0_90, %c0_91, %c0_92], %213 {strides = array<i32>} : memref<1x17x256xf32, #tpu.memory_space<vmem>>, vector<1x17x256xf32>,
    }
    %c2_i32_32 = arith.constant 2 : i32
    %c0_33 = arith.constant 0 : index
    %c1_34 = arith.constant 1 : index
    %c0_35 = arith.constant 0 : index
    %45 = vector.load %arg15[%c0_33, %c1_34, %c0_35] : memref<1x17x256xf32, #tpu.memory_space<vmem>>, vector<1x16x256xf32>
    %46 = vector.shape_cast %45 : vector<1x16x256xf32> to vector<16x256xf32>
    %cst_36 = arith.constant dense<0.000000e+00> : vector<16xf32>
    %47 = vector.multi_reduction <add>, %46, %cst_36 [1] : vector<16x256xf32> to vector<16xf32>
    %48 = vector.shape_cast %47 : vector<16xf32> to vector<16x1xf32>
    %cst_37 = arith.constant 2.560000e+02 : f32
    %49 = vector.broadcast %cst_37 : f32 to vector<16x1xf32>
    %50 = arith.divf %48, %49 : vector<16x1xf32>
    %51 = vector.broadcast %50 : vector<16x1xf32> to vector<16x256xf32>
    %52 = arith.subf %46, %51 : vector<16x256xf32>
    %53 = arith.mulf %52, %52 : vector<16x256xf32>
    %cst_38 = arith.constant dense<0.000000e+00> : vector<16xf32>
    %54 = vector.multi_reduction <add>, %53, %cst_38 [1] : vector<16x256xf32> to vector<16xf32>
    %55 = vector.shape_cast %54 : vector<16xf32> to vector<16x1xf32>
    %cst_39 = arith.constant 2.560000e+02 : f32
    %56 = vector.broadcast %cst_39 : f32 to vector<16x1xf32>
    %57 = arith.divf %55, %56 : vector<16x1xf32>
    %cst_40 = arith.constant 9.99999974E-6 : f32
    %58 = vector.broadcast %cst_40 : f32 to vector<16x1xf32>
    %59 = arith.addf %57, %58 : vector<16x1xf32>
    %60 = math.rsqrt %59 : vector<16x1xf32>
    %61 = vector.broadcast %60 : vector<16x1xf32> to vector<16x256xf32>
    %62 = arith.mulf %52, %61 : vector<16x256xf32>
    %63 = vector.broadcast %2 : vector<1x256xf32> to vector<16x256xf32>
    %64 = arith.mulf %62, %63 : vector<16x256xf32>
    %65 = vector.broadcast %3 : vector<1x256xf32> to vector<16x256xf32>
    %66 = arith.addf %64, %65 : vector<16x256xf32>
    %67 = arith.truncf %66 : vector<16x256xf32> to vector<16x256xbf16>
    %c0_41 = arith.constant 0 : index
    %c0_42 = arith.constant 0 : index
    %68 = vector.load %arg13[%c0_41, %c0_42] : memref<256x128xbf16, #tpu.memory_space<vmem>>, vector<256x128xbf16>
    %cst_43 = arith.constant dense<0.000000e+00> : vector<16x128xf32>
    %69 = tpu.matmul %67, %68, %cst_43 {dimension_numbers = #tpu.dot_dimension_numbers<[1], [0], [0], [1], [0, 0, 1, 1], [], []>} : vector<16x256xbf16>, vector<256x128xbf16>, vector<16x128xf32> -> vector<16x128xf32>
    %c0_44 = arith.constant 0 : index
    %c0_45 = arith.constant 0 : index
    %c0_46 = arith.constant 0 : index
    %70 = vector.load %arg14[%c0_44, %c0_45, %c0_46] : memref<1x16x128xf32, #tpu.memory_space<vmem>>, vector<1x16x128xf32>
    %71 = vector.shape_cast %70 : vector<1x16x128xf32> to vector<16x128xf32>
    %72 = vector.shape_cast %69 : vector<16x128xf32> to vector<1x16x128xf32>
    tpu.vector_store %arg14[%c0_44, %c0_45, %c0_46], %72 {strides = array<i32>} : memref<1x16x128xf32, #tpu.memory_space<vmem>>, vector<1x16x128xf32>,
    return
  }
  func.func @transform_0(%arg0: i32) -> (i32, i32, i32) {
    %c0_i32 = arith.constant 0 : i32
    %c0_i32_0 = arith.constant 0 : i32
    %c0_i32_1 = arith.constant 0 : i32
    return %arg0, %c0_i32, %c0_i32_0 : i32, i32, i32
  }
  func.func @transform_1(%arg0: i32) -> (i32, i32) {
    %c0_i32 = arith.constant 0 : i32
    %c0_i32_0 = arith.constant 0 : i32
    %c0_i32_1 = arith.constant 0 : i32
    return %c0_i32, %c0_i32_0 : i32, i32
  }
  func.func @transform_2(%arg0: i32) -> (i32, i32) {
    %c0_i32 = arith.constant 0 : i32
    %c0_i32_0 = arith.constant 0 : i32
    %c0_i32_1 = arith.constant 0 : i32
    return %c0_i32, %c0_i32_0 : i32, i32
  }
  func.func @transform_3(%arg0: i32) -> (i32, i32) {
    %c0_i32 = arith.constant 0 : i32
    %c0_i32_0 = arith.constant 0 : i32
    %c0_i32_1 = arith.constant 0 : i32
    return %c0_i32, %c0_i32_0 : i32, i32
  }
  func.func @transform_4(%arg0: i32) -> (i32, i32) {
    %c0_i32 = arith.constant 0 : i32
    %c0_i32_0 = arith.constant 0 : i32
    %c0_i32_1 = arith.constant 0 : i32
    return %c0_i32, %c0_i32_0 : i32, i32
  }
  func.func @transform_5(%arg0: i32) -> (i32, i32, i32) {
    %c0_i32 = arith.constant 0 : i32
    %c0_i32_0 = arith.constant 0 : i32
    %c0_i32_1 = arith.constant 0 : i32
    %c0_i32_2 = arith.constant 0 : i32
    return %c0_i32, %c0_i32_0, %c0_i32_1 : i32, i32, i32
  }
  func.func @transform_6(%arg0: i32) -> (i32, i32, i32) {
    %c0_i32 = arith.constant 0 : i32
    %c0_i32_0 = arith.constant 0 : i32
    %c0_i32_1 = arith.constant 0 : i32
    %c0_i32_2 = arith.constant 0 : i32
    return %c0_i32, %c0_i32_0, %c0_i32_1 : i32, i32, i32
  }
  func.func @transform_7(%arg0: i32) -> (i32, i32, i32) {
    %c0_i32 = arith.constant 0 : i32
    %c0_i32_0 = arith.constant 0 : i32
    %c0_i32_1 = arith.constant 0 : i32
    %c0_i32_2 = arith.constant 0 : i32
    return %c0_i32, %c0_i32_0, %c0_i32_1 : i32, i32, i32
  }
  func.func @transform_8(%arg0: i32) -> (i32, i32, i32) {
    %c0_i32 = arith.constant 0 : i32
    %c0_i32_0 = arith.constant 0 : i32
    %c0_i32_1 = arith.constant 0 : i32
    %c0_i32_2 = arith.constant 0 : i32
    return %c0_i32, %c0_i32_0, %c0_i32_1 : i32, i32, i32
  }
  func.func @transform_9(%arg0: i32) -> (i32, i32, i32) {
    %c0_i32 = arith.constant 0 : i32
    %c0_i32_0 = arith.constant 0 : i32
    %c0_i32_1 = arith.constant 0 : i32
    %c0_i32_2 = arith.constant 0 : i32
    return %c0_i32, %c0_i32_0, %c0_i32_1 : i32, i32, i32
  }
  func.func @transform_10(%arg0: i32) -> (i32, i32, i32) {
    %c0_i32 = arith.constant 0 : i32
    %c0_i32_0 = arith.constant 0 : i32
    %c0_i32_1 = arith.constant 0 : i32
    %c0_i32_2 = arith.constant 0 : i32
    return %c0_i32, %c0_i32_0, %c0_i32_1 : i32, i32, i32
  }
  func.func @transform_11(%arg0: i32) -> (i32, i32, i32) {
    %c0_i32 = arith.constant 0 : i32
    %c0_i32_0 = arith.constant 0 : i32
    %c0_i32_1 = arith.constant 0 : i32
    %c0_i32_2 = arith.constant 0 : i32
    return %c0_i32, %c0_i32_0, %c0_i32_1 : i32, i32, i32
  }
  func.func @transform_12(%arg0: i32) -> (i32, i32) {
    %c0_i32 = arith.constant 0 : i32
    %c0_i32_0 = arith.constant 0 : i32
    %c0_i32_1 = arith.constant 0 : i32
    return %c0_i32, %c0_i32_0 : i32, i32
  }
  func.func @transform_13(%arg0: i32) -> (i32, i32, i32) {
    %c0_i32 = arith.constant 0 : i32
    %c0_i32_0 = arith.constant 0 : i32
    %c0_i32_1 = arith.constant 0 : i32
    return %arg0, %c0_i32, %c0_i32_0 : i32, i32, i32
  }
}

</mosaic_0001>

<bundles_post_ra>
// kernel: solarclip_remove_cls_forward.1
= control target key start
LH: loop header
LB: loop body
LE: loop exit
PB: predicated region body
PF: predicated region fallthrough
CT: control target
= control target key end

     0   :  { %s7889_s0 = inlined_call_operand.vmem [shape: bf16[2,16,256], index: 0, kind: input, shape index: {}]   ;;  %s7890_s1 = inlined_call_operand.vmem [shape: bf16[256,256], index: 1, kind: input, shape index: {}]   ;;  %s7891_s2 = inlined_call_operand.vmem [shape: f32[1,256], index: 2, kind: input, shape index: {}]   ;;  %s7892_s3 = inlined_call_operand.vmem [shape: f32[17,256], index: 3, kind: input, shape index: {}]   ;;  %s7893_s4 = inlined_call_operand.vmem [shape: f32[4,256], index: 4, kind: input, shape index: {}]   ;;  %s7894_s5 = inlined_call_operand.hbm [shape: bf16[2,256,768], index: 5, kind: input, shape index: {}]   ;;  %s7895_s6 = inlined_call_operand.vmem [shape: bf16[2,256,256], index: 6, kind: input, shape index: {}]   ;;  %s7896_s7 = inlined_call_operand.hbm [shape: bf16[2,256,1024], index: 7, kind: input, shape index: {}]   ;;  %s7897_s8 = inlined_call_operand.hbm [shape: bf16[2,1024,256], index: 8, kind: input, shape index: {}]   ;;  %s7898_s9 = inlined_call_operand.vmem [shape: f32[2,6,256], index: 9, kind: input, shape index: {}]   ;;  %s7899_s10 = inlined_call_operand.vmem [shape: f32[2,1,768], index: 10, kind: input, shape index: {}]   ;;  %s7900_s11 = inlined_call_operand.vmem [shape: f32[2,1,1024], index: 11, kind: input, shape index: {}]   ;;  %s7901_s12 = inlined_call_operand.vmem [shape: bf16[256,128], index: 12, kind: input, shape index: {}]   ;;  %s7902_s13 = inlined_call_operand.hbm [shape: f32[2,16,128], index: 13, kind: output, shape index: {}]  }
   0x1   :  { %7915 = sst [smem:[#allocation20_spill]] %s7896_s7 }
   0x2   :  { %7916 = sst [smem:[#allocation21_spill]] %s7902_s13 }
   0x3   :  { %18 = vsyncpa [#allocation4], 0 }
   0x4   :  { %19 = vsyncpa [#allocation7], 0 }
   0x5   :  { %20 = vsyncpa [#allocation5], 0 }
   0x6   :  { %22 = vsyncpa [#allocation5 + $0x1], 0  ;;  %s6583_s25 = smov 0   ;;  %s6585_s26 = smov 0  }
   0x7   :  { %s6587_s27 = smov 0   ;;  %s6589_s28 = smov 0  }
   0x8 LB: > { %7917 = sst [smem:[#allocation13_spill]] %s6482_s25  ;;  %s6604_s29 = sadd.s32 4294967295, %s6494_s28   ;;  %s6494_s28 = sphi %s6589_s28, %s7942_s28   ;;  %s6490_s27 = sphi %s6587_s27, %s7944_s27   ;;  %s6486_s26 = sphi %s6585_s26, %s7946_s26   ;;  %s6482_s25 = sphi %s6583_s25, %s7945_s25  }
   0x9   : > { %7918 = sst [smem:[#allocation14_spill]] %s6490_s27  ;;  %s5059_s30 = sadd.s32 4294967294, %s6494_s28  }
   0xa   : > { %7919 = sst [smem:[#allocation15_spill]] %s6494_s28  ;;  %s6608_s14 = sadd.s32 1, %s6494_s28  }
   0xb   : > { %7920 = sst [smem:[#allocation16_spill]] %s6608_s14  ;;  %s313_s15 = sadd.s32 1, %s6490_s27 }
   0xc   : > { %s310_s16 = ssub.s32 %s6494_s28, %s6608_s14  ;;  %p323_p0 = scmp.ne.s32.totalorder %s6490_s27, %s6486_s26 }
   0xd   : > { %p311_p1 = scmp.eq.s32.totalorder %s310_s16, 0  ;;  %p324_p2 = scmp.eq.s32.totalorder %s6604_s29, 1 }
   0xe   : > { %p329_p3 = scmp.ne.s32.totalorder %s6486_s26, %s6482_s25  ;;  %p330_p4 = scmp.eq.s32.totalorder %s5059_s30, 1 }
   0xf   : > { %s6619_s17 = scalar_select %p311_p1, %s6490_s27, %s313_s15  }
  0x10   : > { %p6621_p5 = por %p324_p2, %p323_p0  ;;  %p6625_p6 = por %p330_p4, %p329_p3 }
  0x11   : > { %7921 = sst [smem:[#allocation17_spill]] %s6619_s17  ;;  %p5060_p7 = scmp.ge.s32.totalorder %s6494_s28, 1 }
  0x12   : > { %s7922_s18 = scalar_select %p6621_p5, 1, 0 }
  0x13   : > { %s7924_s19 = scalar_select %p6625_p6, 1, 0 }
  0x14   : > { %7923 = sst [smem:[#allocation18_spill]] %s7922_s18  ;;  %p337_p8 = scmp.lt.s32.totalorder %s6494_s28, 3 }
  0x15   : > { %7925 = sst [smem:[#allocation19_spill]] %s7924_s19  ;;  %p7907_p9 = scmp.eq.s32.totalorder %s6604_s29, 0 }
  0x16   : > { %p6632_p10 = pnand %p5060_p7, %p337_p8  ;;  %s6500_s21 = smov [#allocation6]  }
  0x17   : > { %s377_s22 = sshll.u32 %s6500_s21, 4  ;;  %s6501_s24 = smov [#allocation3]   ;;  %s378_s22 = int_to_ptr.vmem [resolvable:$true] %s377_s22 }
  0x18   : > { %s7926_s20 = scalar_select %p6632_p10, 1, 0 }
  0x19   : > { %p5658_p11 = pneg %p6632_p10  ;;  %s361_s30 = sshll.u32 %s6501_s24, 4  ;;  %s6644_s30 = int_to_ptr.vmem [resolvable:$true] %s361_s30 }
  0x1a   : > { %s7928_s7 = sld [smem:[#allocation20_spill]] }
  0x1b   : > { %p6640_p12 = pnand %p7907_p9, %p5658_p11 }
  0x1d   : > { %p6654_p0 = pneg %p6640_p12 }
  0x20   : > { %s6336_s17 = scalar_lea.hbm %s7928_s7, 32768 }
  0x21   : > { %p6337_p13 = scmp.ne.s32.totalorder %s7928_s7, %s6336_s17  ;;  %p6343_p3 = scmp.lt.u32.totalorder %s6336_s17, %s7928_s7 }
  0x23   : > { %p6339_p1 = pnand %p6654_p0, %p6337_p13 }
  0x25   : > { %p6340_p2 = pneg %p6339_p1 }
  0x27   : > { %p6345_p4 = pnand %p6343_p3, %p6340_p2 }
  0x29   : > { %6348 = shalt.err (!%p6345_p4)
}
  0x2a   : > { %s6349_s15 = scalar_lea.vmem %s378_s22, 32768  ;;  %p6357_p9 = scmp.lt.s32.totalorder %s378_s22, %s378_s22 }
  0x2b   : > { %p6350_p7 = scmp.ne.s32.totalorder %s378_s22, %s6349_s15  ;;  %p6358_p6 = scmp.lt.s32.totalorder %s6349_s15, %s6349_s15 }
  0x2d   : > { %p6352_p8 = pnand %p6350_p7, %p6654_p0  ;;  %p6359_p5 = por %p6358_p6, %p6357_p9 }
  0x2f   : > { %p6353_p11 = pneg %p6352_p8 }
  0x31   : > { %p6360_p10 = pnand %p6359_p5, %p6353_p11 }
  0x33   : > { %6363 = shalt.err (!%p6360_p10)
}
  0x34   : > { %s6502_s27 = smov 512   ;;  %s6503_s14 = smov 32  }
  0x35   : > { %5664 = dma.hbm_to_vmem [thread:$0]  (!%p6640_p12), %s7928_s7, 32768, %s378_s22, [#allocation7], %s6502_s27, %s6502_s27, %s6503_s14  }
  0x36   : > { %s6364_s25 = scalar_lea.hbm %s7894_s5, 24576 }
  0x37   : > { %p6365_p13 = scmp.ne.s32.totalorder %s7894_s5, %s6364_s25  ;;  %p6371_p9 = scmp.lt.u32.totalorder %s6364_s25, %s7894_s5 }
  0x39   : > { %p6367_p5 = pnand %p6365_p13, %p6654_p0 }
  0x3b   : > { %p6368_p6 = pneg %p6367_p5 }
  0x3d   : > { %p6373_p10 = pnand %p6371_p9, %p6368_p6 }
  0x3f   : > { %6376 = shalt.err (!%p6373_p10)
}
  0x40   : > { %s6377_s22 = scalar_lea.vmem %s6644_s30, 24576  ;;  %p6385_p4 = scmp.lt.s32.totalorder %s6644_s30, %s6644_s30 }
  0x41   : > { %p6378_p1 = scmp.ne.s32.totalorder %s6644_s30, %s6377_s22  ;;  %p6386_p7 = scmp.lt.s32.totalorder %s6377_s22, %s6377_s22 }
  0x43   : > { %p6380_p2 = pnand %p6378_p1, %p6654_p0  ;;  %p6387_p8 = por %p6386_p7, %p6385_p4 }
  0x45   : > { %p6381_p3 = pneg %p6380_p2 }
  0x47   : > { %p6388_p11 = pnand %p6387_p8, %p6381_p3 }
  0x49   : > { %6391 = shalt.err (!%p6388_p11)
}
  0x4a   : > { %s6504_s13 = smov 384   ;;  %s6505_s25 = smov 24  }
  0x4b   : > { %5661 = dma.hbm_to_vmem [thread:$0]  (!%p6640_p12), %s7894_s5, 24576, %s6644_s30, [#allocation4], %s6504_s13, %s6504_s13, %s6505_s25  }
  0x4c   : > { %s6506_s27 = smov [#allocation8]   ;;  %s6392_s16 = scalar_lea.hbm %s7897_s8, 32768 }
  0x4d   : > { %s390_s14 = sshll.u32 %s6506_s27, 4  ;;  %p6393_p13 = scmp.ne.s32.totalorder %s7897_s8, %s6392_s16  ;;  %s391_s14 = int_to_ptr.vmem [resolvable:$true] %s390_s14 }
  0x4e   : > { %p6399_p9 = scmp.lt.u32.totalorder %s6392_s16, %s7897_s8 }
  0x4f   : > { %p6395_p5 = pnand %p6393_p13, %p6654_p0 }
  0x51   : > { %p6396_p6 = pneg %p6395_p5 }
  0x53   : > { %p6401_p10 = pnand %p6399_p9, %p6396_p6 }
  0x55   : > { %6404 = shalt.err (!%p6401_p10)
}
  0x56   : > { %s6405_s30 = scalar_lea.vmem %s391_s14, 32768  ;;  %p6413_p4 = scmp.lt.s32.totalorder %s391_s14, %s391_s14 }
  0x57   : > { %p6406_p1 = scmp.ne.s32.totalorder %s391_s14, %s6405_s30  ;;  %p6414_p7 = scmp.lt.s32.totalorder %s6405_s30, %s6405_s30 }
  0x59   : > { %p6408_p2 = pnand %p6406_p1, %p6654_p0  ;;  %p6415_p8 = por %p6414_p7, %p6413_p4 }
  0x5b   : > { %p6409_p3 = pneg %p6408_p2 }
  0x5d   : > { %p6416_p11 = pnand %p6415_p8, %p6409_p3 }
  0x5f   : > { %6419 = shalt.err (!%p6416_p11)
}
  0x60   : > { %s6507_s13 = smov 128   ;;  %s6508_s25 = smov 8  }
  0x61   : > { %5667 = dma.hbm_to_vmem [thread:$0]  (!%p6640_p12), %s7897_s8, 32768, %s391_s14, [#allocation7], %s6507_s13, %s6507_s13, %s6508_s25  }
  0x62   : > { %p7930_p13 = scmp.ne.s32.totalorder %s7926_s20, 0 }
  0x63   : > { %p7931_p5 = scmp.eq.s32.totalorder (!%p7930_p13), %s6604_s29, 0 }
  0x64   : > { %426 = sbr.rel (%p7930_p13) target bundleno = 4430 (0x114e), region = 72 }
  0x6b   : > { %6469 = dma.done.wait (%p7931_p5), [#allocation4], 24576   ;;  %p7932_p0 = pmov %p7931_p5 }
  0x6d   : > { %6471 = vsyncadd (%p7932_p0), [#allocation4], 4294942720  ;;  %p7933_p6 = pmov %p7932_p0 }
  0x6e   : > { %p7934_p9 = pmov %p7932_p0 }
  0x6f   : > { %6473 = dma.done.wait (%p7933_p6), [#allocation7], 65536  }
  0x70   : > { %6475 = vsyncadd (%p7934_p9), [#allocation7], 4294901760  ;;  %s475_s23 = sand.u32 1, %s6486_s26   ;;  %v6729_v0 = vld [vmem:[%s7893_s4 + $0x2] ss:$4 sm:$0x3]  ;;  %v528_v38 = vlaneseq }
  0x71   : > { %s6724_s21 = sshll.u32 %s475_s23, 4  ;;  %v6734_v1 = vld [vmem:[%s7893_s4 + $0x3] ss:$4 sm:$0x3]  ;;  %v5734_v4 = vld [vmem:[%s7890_s1 + $0x14] ss:$8 sps:$4 sm:$0xff]  }
  0x72   : > { %v5731_v2 = vld [vmem:[%s7890_s1 + $0x4] ss:$8 sps:$4 sm:$0xff]   ;;  %v5733_v3 = vld [vmem:[%s7890_s1] ss:$8 sps:$4 sm:$0xff]   ;;  %v5736_v5 = vld [vmem:[%s7890_s1 + $0x10] ss:$8 sps:$4 sm:$0xff]  }
  0x73   : > { %731 = vmatprep.subr.bf16.mxu0 %v5731_v2  ;;  %v5737_v6 = vld [vmem:[%s7890_s1 + $0x24] ss:$8 sps:$4 sm:$0xff]   ;;  %v5739_v7 = vld [vmem:[%s7890_s1 + $0x20] ss:$8 sps:$4 sm:$0xff]   ;;  %v5740_v8 = vld [vmem:[%s7890_s1 + $0x34] ss:$8 sps:$4 sm:$0xff]  }
  0x74   : > { %732 = vmatpush1.bf16.msra.mxu0 %v5733_v3  ;;  %p478_p12 = scmp.lt.s32.totalorder %s6604_s29, 1  ;;  %v5742_v9 = vld [vmem:[%s7890_s1 + $0x30] ss:$8 sps:$4 sm:$0xff]   ;;  %v5743_v10 = vld [vmem:[%s7890_s1 + $0x44] ss:$8 sps:$4 sm:$0xff]   ;;  %vm530_vm0 = vcmp.lt.s32.totalorder %v528_v38, 256 }
  0x75   : > { %733 = vmatprep.subr.bf16.mxu0 %v5734_v4  ;;  %v5745_v11 = vld [vmem:[%s7890_s1 + $0x40] ss:$8 sps:$4 sm:$0xff]   ;;  %v5746_v12 = vld [vmem:[%s7890_s1 + $0x54] ss:$8 sps:$4 sm:$0xff]   ;;  %v5748_v13 = vld [vmem:[%s7890_s1 + $0x50] ss:$8 sps:$4 sm:$0xff]  }
  0x76   : > { %s479_s24 = scalar_select %p478_p12, %s6604_s29, 1  ;;  %v5749_v14 = vld [vmem:[%s7890_s1 + $0x64] ss:$8 sps:$4 sm:$0xff]   ;;  %v5751_v16 = vld [vmem:[%s7890_s1 + $0x60] ss:$8 sps:$4 sm:$0xff]   ;;  %v536_v41 = vld [vmem:[%s7892_s3 + $0x10] sm:$0xff] }
  0x77   : > { %v5752_v17 = vld [vmem:[%s7890_s1 + $0x74] ss:$8 sps:$4 sm:$0xff]   ;;  %v5754_v18 = vld [vmem:[%s7890_s1 + $0x70] ss:$8 sps:$4 sm:$0xff]   ;;  %v5755_v19 = vld [vmem:[%s7890_s1 + $0x84] ss:$8 sps:$4 sm:$0xff]  }
  0x78   : > { %734 = vmatpush1.bf16.msra.mxu0 %v5736_v5  ;;  %s5551_s25 = sshll.u32 %s479_s24, 4  ;;  %v5757_v20 = vld [vmem:[%s7890_s1 + $0x80] ss:$8 sps:$4 sm:$0xff]   ;;  %v5758_v21 = vld [vmem:[%s7890_s1 + $0x94] ss:$8 sps:$4 sm:$0xff]   ;;  %v718_v46 = vrot.slane %v536_v41, 1 }
  0x79   : > { %735 = vmatprep.subr.bf16.mxu0 %v5737_v6  ;;  %s6777_s27 = scalar_lea.vmem %s7889_s0, %s5551_s25  ;;  %v5760_v22 = vld [vmem:[%s7890_s1 + $0x90] ss:$8 sps:$4 sm:$0xff]   ;;  %v5761_v23 = vld [vmem:[%s7890_s1 + $0xa4] ss:$8 sps:$4 sm:$0xff]   ;;  %v5763_v24 = vld [vmem:[%s7890_s1 + $0xa0] ss:$8 sps:$4 sm:$0xff]  }
  0x7a   : > { %v5781_v15 = vld [vmem:[%s6777_s27 + $0x4] ss:$8 sps:$4 sm:$0xff]   ;;  %v5764_v25 = vld [vmem:[%s7890_s1 + $0xb4] ss:$8 sps:$4 sm:$0xff]   ;;  %v5766_v26 = vld [vmem:[%s7890_s1 + $0xb0] ss:$8 sps:$4 sm:$0xff]  }
  0x7b   : > { %763 = vmatprep.mubr.bf16.mxu0 %v5781_v15  ;;  %v5767_v27 = vld [vmem:[%s7890_s1 + $0xc4] ss:$8 sps:$4 sm:$0xff]   ;;  %v5769_v28 = vld [vmem:[%s7890_s1 + $0xc0] ss:$8 sps:$4 sm:$0xff]   ;;  %v5770_v29 = vld [vmem:[%s7890_s1 + $0xd4] ss:$8 sps:$4 sm:$0xff]  }
  0x7c   : > { %736 = vmatpush1.bf16.msra.mxu0 %v5739_v7  ;;  %v5772_v30 = vld [vmem:[%s7890_s1 + $0xd0] ss:$8 sps:$4 sm:$0xff]   ;;  %v5773_v31 = vld [vmem:[%s7890_s1 + $0xe4] ss:$8 sps:$4 sm:$0xff]   ;;  %v5775_v32 = vld [vmem:[%s7890_s1 + $0xe0] ss:$8 sps:$4 sm:$0xff]  }
  0x7d   : > { %737 = vmatprep.subr.bf16.mxu0 %v5740_v8  ;;  %v5776_v33 = vld [vmem:[%s7890_s1 + $0xf4] ss:$8 sps:$4 sm:$0xff]   ;;  %v5778_v34 = vld [vmem:[%s7890_s1 + $0xf0] ss:$8 sps:$4 sm:$0xff]   ;;  %v5779_v35 = vld [vmem:[%s6777_s27] ss:$8 sps:$4 sm:$0xff]  }
  0x7e   : > { %v525_v36 = vld [vmem:[%s7891_s2] sm:$0x3]  ;;  %v535_v42 = vld [vmem:[%s7892_s3 + $0x8] sm:$0xfe]  ;;  %v537_v43 = vld [vmem:[%s7892_s3 + $0x18] sm:$0xff]  ;;  %vm716_vm1 = vcmask 1046528  }
  0x7f   : > { %v526_v37 = vld [vmem:[%s7892_s3] ss:$8 sm:$0x3]  ;;  %v534_v40 = vld [vmem:[%s7892_s3] sm:$0xfe]  ;;  %v720_v48 = vrot.slane %v535_v42, 1 }
  0x80   : > { %738 = vmatpush1.bf16.msra.mxu0 %v5742_v9  ;;  %v527_v39 = vadd.f32 %v526_v37, %v525_v36  ;;  %v538_v44 = vld [vmem:[%s7892_s3 + $0x20] sm:$0x1]  ;;  %v717_v45 = vrot.slane %v534_v40, 1  ;;  %v539_v47 = vld [vmem:[%s7892_s3 + $0x28] sm:$0x1]  ;;  %v721_v49 = vrot.slane %v537_v43, 1 }
  0x81   : > { %739 = vmatprep.subr.bf16.mxu0 %v5743_v10  ;;  %v723_v50 = vrot.slane %v538_v44, 1  ;;  %v725_v51 = vrot.slane %v539_v47, 1  ;;  %vm778_vm2 = vcmask 1040384   ;;  %v6873_v44 = vshrl.u32 %v528_v38, 7  ;;  %s6892_s16 = scalar_lea.vmem [#allocation9], %s6724_s21  ;;  %s6894_s27 = smov 0  }
  0x82   : > { %532 = vst.msk [vmem:[#allocation2] ss:$8 sm:$0x3] %vm530_vm0, %v527_v39  ;;  %v719_v52 = vsel %vm716_vm1, %v717_v45, %v718_v46  ;;  %v722_v53 = vsel %vm716_vm1, %v720_v48, %v721_v49  ;;  %v484_v47 = vld [vmem:[%s7893_s4] ss:$4 sm:$0x3] }
  0x83   : > { %v724_v55 = vsel %vm716_vm1, %v718_v46, %v723_v50  ;;  %v726_v58 = vsel %vm716_vm1, %v721_v49, %v725_v51  ;;  %v6876_v45 = vsub.s32 0, %v6873_v44  ;;  %v6879_v46 = vsub.s32 1, %v6873_v44  ;;  %v5072_v49 = vld [vmem:[%s7893_s4 + $0x1] ss:$4 sm:$0x3] }
  0x84   : > { %740 = vmatpush1.bf16.msra.mxu0 %v5745_v11 }
  0x85   : > { %741 = vmatprep.subr.bf16.mxu0 %v5746_v12  ;;  %v860_v51 = vrot.slane %v484_v47, %v6876_v45  ;;  %v864_v38 = vrot.slane %v484_v47, %v6879_v46 }
  0x88   : > { %742 = vmatpush1.bf16.msra.mxu0 %v5748_v13 }
  0x89   : > { %743 = vmatprep.subr.bf16.mxu0 %v5749_v14 }
  0x8c   : > { %744 = vmatpush1.bf16.msra.mxu0 %v5751_v16 }
  0x8d   : > { %745 = vmatprep.subr.bf16.mxu0 %v5752_v17 }
  0x90   : > { %746 = vmatpush1.bf16.msra.mxu0 %v5754_v18 }
  0x91   : > { %747 = vmatprep.subr.bf16.mxu0 %v5755_v19 }
  0x94   : > { %748 = vmatpush1.bf16.msra.mxu0 %v5757_v20 }
  0x95   : > { %749 = vmatprep.subr.bf16.mxu0 %v5758_v21 }
  0x98   : > { %750 = vmatpush1.bf16.msra.mxu0 %v5760_v22 }
  0x99   : > { %751 = vmatprep.subr.bf16.mxu0 %v5761_v23 }
  0x9c   : > { %752 = vmatpush1.bf16.msra.mxu0 %v5763_v24 }
  0x9d   : > { %753 = vmatprep.subr.bf16.mxu0 %v5764_v25 }
  0xa0   : > { %754 = vmatpush1.bf16.msra.mxu0 %v5766_v26 }
  0xa1   : > { %755 = vmatprep.subr.bf16.mxu0 %v5767_v27 }
  0xa4   : > { %756 = vmatpush1.bf16.msra.mxu0 %v5769_v28 }
  0xa5   : > { %757 = vmatprep.subr.bf16.mxu0 %v5770_v29 }
  0xa8   : > { %758 = vmatpush1.bf16.msra.mxu0 %v5772_v30 }
  0xa9   : > { %759 = vmatprep.subr.bf16.mxu0 %v5773_v31 }
  0xac   : > { %760 = vmatpush1.bf16.msra.mxu0 %v5775_v32 }
  0xad   : > { %761 = vmatprep.subr.bf16.mxu0 %v5776_v33 }
  0xb0   : > { %762 = vmatpush1.bf16.msra.mxu0 %v5778_v34 }
  0xb3   : > { %764 = vmatmul.mubr.bf16.vlgmr.msra.gmra.mrb[0].mxu0 %v5779_v35 }
 0x186   : > { %v765_v54 = vpop.f32.mrb[0].mxu0 }
 0x187   : > { %v766_v56 = vadd.f32 %v765_v54, %v719_v52  ;;  %v767_v57 = vpop.f32.mrb[1].mxu0 }
 0x188   : > { %v768_v59 = vadd.f32 %v767_v57, %v722_v53  ;;  %v769_v60 = vpop.f32.mrb[2].mxu0  ;;  %v881_v57 = vrot.slane %v5072_v49, %v6879_v46 }
 0x189   : > { %v779_v61 = vrot.slane %v766_v56, 7  ;;  %v770_v62 = vadd.f32 %v769_v60, %v724_v55  ;;  %v771_v63 = vpop.f32.mrb[3].mxu0  ;;  %v877_v56 = vrot.slane %v5072_v49, %v6876_v45 }
 0x18a   : > { %v780_v2 = vrot.slane %v768_v59, 7  ;;  %v772_v3 = vadd.f32 %v771_v63, %v726_v58 }
 0x18b   : > { %791 = vst [vmem:[#allocation2] sm:$0xfe] %v779_v61  ;;  %v781_v4 = vrot.slane %v770_v62, 7 }
 0x18c   : > { %792 = vst [vmem:[#allocation2 + $0x8] sm:$0xfe] %v780_v2  ;;  %v783_v5 = vrot.slane %v772_v3, 7 }
 0x18d   : > { %v782_v6 = vsel %vm778_vm2, %v779_v61, %v781_v4  ;;  %795 = vst [vmem:[#allocation2 + $0x20] sm:$0x1] %v781_v4 }
 0x18e   : > { %v784_v7 = vsel %vm778_vm2, %v780_v2, %v783_v5  ;;  %796 = vst [vmem:[#allocation2 + $0x28] sm:$0x1] %v783_v5 }
 0x18f   : > { %v806_v8 = vadd.f32 %v784_v7, %v782_v6 }
 0x191   : > { %807 = vadd.xlane.f32.xlu1 %v806_v8 }
 0x192   : > { %v797_v14 = vld [vmem:[#allocation2] sm:$0xff] }
 0x193   : > { %v798_v15 = vld [vmem:[#allocation2 + $0x8] sm:$0xff] }
 0x194   : > { %v801_v9 = vld [vmem:[#allocation2 + $0x20] sm:$0x1]  ;;  %v803_v16 = vadd.f32 %v798_v15, %v797_v14 }
 0x195   : > { %v802_v10 = vld [vmem:[#allocation2 + $0x28] sm:$0x1]  ;;  %v809_v11 = vsel %vm778_vm2, %v801_v9, 0.0 }
 0x196   : > { %v810_v12 = vsel %vm778_vm2, %v802_v10, 0.0 }
 0x197   : > { %v811_v13 = vadd.f32 %v810_v12, %v809_v11 }
 0x199   : > { %812 = vadd.xlane.f32.xlu0 %v811_v13 }
 0x19d   : > { %804 = vadd.xlane.f32.xlu0 %v803_v16 }
 0x21e   : > { %v808_v17 = vpop.xlane.xlu1 %807 }
 0x21f   : > { %v816_v18 = vmul.f32 0.00390625, %v808_v17 }
 0x221   : > { %v820_v19 = vsub.f32 %v782_v6, %v816_v18  ;;  %v821_v20 = vsub.f32 %v784_v7, %v816_v18 }
 0x223   : > { %v826_v21 = vmul.f32 %v820_v19, %v820_v19  ;;  %v827_v22 = vmul.f32 %v821_v20, %v821_v20 }
 0x225   : > { %v833_v23 = vadd.f32 %v827_v22, %v826_v21 }
 0x226   : > { %v813_v24 = vpop.xlane.xlu0 %812 }
 0x227   : > { %v817_v25 = vmul.f32 0.00390625, %v813_v24  ;;  %834 = vadd.xlane.f32.xlu0 %v833_v23 }
 0x229   : > { %v822_v26 = vsub.f32 %v801_v9, %v817_v25  ;;  %v823_v27 = vsub.f32 %v802_v10, %v817_v25 }
 0x22a   : > { %v805_v28 = vpop.xlane.xlu0 %804 }
 0x22b   : > { %v815_v29 = vmul.f32 0.00390625, %v805_v28  ;;  %v828_v32 = vmul.f32 %v822_v26, %v822_v26  ;;  %v829_v33 = vmul.f32 %v823_v27, %v823_v27 }
 0x22d   : > { %v818_v30 = vsub.f32 %v797_v14, %v815_v29  ;;  %v819_v31 = vsub.f32 %v798_v15, %v815_v29  ;;  %v836_v37 = vsel %vm778_vm2, %v828_v32, 0.0  ;;  %v837_v39 = vsel %vm778_vm2, %v829_v33, 0.0 }
 0x22e   : > { %v838_v40 = vadd.f32 %v837_v39, %v836_v37 }
 0x22f   : > { %v824_v34 = vmul.f32 %v818_v30, %v818_v30  ;;  %v825_v35 = vmul.f32 %v819_v31, %v819_v31 }
 0x231   : > { %v830_v36 = vadd.f32 %v825_v35, %v824_v34 }
 0x233   : > { %831 = vadd.xlane.f32.xlu1 %v830_v36 }
 0x237   : > { %839 = vadd.xlane.f32.xlu1 %v838_v40 }
 0x2b4   : > { %v835_v41 = vpop.xlane.xlu0 %834 }
 0x2b5   : > { %v842_v42 = vmul.f32 0.00390625, %v835_v41 }
 0x2b7   : > { %v845_v43 = vadd.f32 1e-05, %v842_v42 }
 0x2b9   : > { %5782 = vrsqrt.f32 %v845_v43 }
 0x2c0   : > { %v832_v48 = vpop.xlane.xlu1 %831 }
 0x2c1   : > { %v841_v50 = vmul.f32 0.00390625, %v832_v48 }
 0x2c3   : > { %v5783_v52 = vpop.eup %5782  ;;  %v844_v53 = vadd.f32 1e-05, %v841_v50 }
 0x2c4   : > { %v852_v54 = vmul.f32 %v5783_v52, %v820_v19  ;;  %v853_v55 = vmul.f32 %v5783_v52, %v821_v20  ;;  %v840_v58 = vpop.xlane.xlu1 %839 }
 0x2c5   : > { %5784 = vrsqrt.f32 %v844_v53  ;;  %v843_v59 = vmul.f32 0.00390625, %v840_v58 }
 0x2c6   : > { %v869_v60 = vmul.f32 %v860_v51, %v852_v54  ;;  %v870_v61 = vmul.f32 %v864_v38, %v853_v55 }
 0x2c7   : > { %v846_v62 = vadd.f32 1e-05, %v843_v59 }
 0x2c8   : > { %v886_v63 = vadd.f32 %v877_v56, %v869_v60  ;;  %v887_v2 = vadd.f32 %v881_v57, %v870_v61 }
 0x2c9   : > { %5786 = vrsqrt.f32 %v846_v62 }
 0x2ca   : > { %892 = vst [vmem:[#allocation2 + $0x10] sm:$0xff] %v886_v63  ;;  %893 = vst [vmem:[#allocation2 + $0x18] sm:$0xff] %v887_v2 }
 0x2cf   : > { %v5785_v3 = vpop.eup %5784 }
 0x2d0   : > { %v850_v4 = vmul.f32 %v5785_v3, %v818_v30  ;;  %v851_v5 = vmul.f32 %v5785_v3, %v819_v31 }
 0x2d2   : > { %v867_v6 = vmul.f32 %v860_v51, %v850_v4  ;;  %v868_v7 = vmul.f32 %v864_v38, %v851_v5 }
 0x2d3   : > { %v5787_v8 = vpop.eup %5786 }
 0x2d4   : > { %v884_v9 = vadd.f32 %v877_v56, %v867_v6  ;;  %v885_v10 = vadd.f32 %v881_v57, %v868_v7  ;;  %v854_v11 = vmul.f32 %v5787_v8, %v822_v26  ;;  %v855_v12 = vmul.f32 %v5787_v8, %v823_v27 }
 0x2d6   : > { %890 = vst [vmem:[#allocation2] sm:$0xff] %v884_v9  ;;  %891 = vst [vmem:[#allocation2 + $0x8] sm:$0xff] %v885_v10  ;;  %v871_v13 = vmul.f32 %v860_v51, %v854_v11  ;;  %v872_v14 = vmul.f32 %v864_v38, %v855_v12 }
 0x2d8   : > { %v888_v15 = vadd.f32 %v877_v56, %v871_v13  ;;  %v889_v16 = vadd.f32 %v881_v57, %v872_v14 }
 0x2da   : > { %894 = vst [vmem:[#allocation2 + $0x20] sm:$0x1] %v888_v15  ;;  %895 = vst [vmem:[#allocation2 + $0x28] sm:$0x1] %v889_v16 }
 0x2db LB: >> { %v904_v23 = vld [vmem:[#allocation2 + $0x10] sm:$0xff]  ;;  %v905_v24 = vld [vmem:[#allocation2 + $0x18] sm:$0xff]  ;;  %s5553_s21 = smul.u32 768, %s6498_s27  ;;  %s5555_s24 = sshll.u32 %s6498_s27, 10  ;;  %vm1820_vm3 = vcmask 138240   ;;  %vm1827_vm4 = vcmask 131072   ;;  %s6498_s27 = sphi %s6894_s27, %s901_s27  }
 0x2dc   : >> { %v916_v27 = vadd.f32 %v905_v24, %v904_v23  ;;  %s6905_s15 = scalar_lea.vmem [#allocation8], %s5555_s24  ;;  %s5552_s30 = sshll.u32 %s6498_s27, 4 }
 0x2dd   : >> { %v902_v17 = vld [vmem:[#allocation2] sm:$0xff]  ;;  %v903_v18 = vld [vmem:[#allocation2 + $0x8] sm:$0xff]  ;;  %s6907_s22 = scalar_lea.vmem [#allocation3], %s5553_s21  ;;  %s6972_s28 = scalar_lea.vmem %s7898_s9, %s5552_s30 }
 0x2de   : >> { %v913_v20 = vadd.f32 %v903_v18, %v902_v17  ;;  %v5788_v28 = vld [vmem:[%s6907_s22 + $0x4] ss:$24 sps:$4 sm:$0xff]   ;;  %v5790_v29 = vld [vmem:[%s6907_s22] ss:$24 sps:$4 sm:$0xff]   ;;  %v5791_v30 = vld [vmem:[%s6907_s22 + $0x34] ss:$24 sps:$4 sm:$0xff]  }
 0x2df   : >> { %1610 = vmatprep.subr.bf16.mxu1 %v5788_v28  ;;  %v5793_v31 = vld [vmem:[%s6907_s22 + $0x30] ss:$24 sps:$4 sm:$0xff]   ;;  %v5794_v32 = vld [vmem:[%s6907_s22 + $0x64] ss:$24 sps:$4 sm:$0xff]   ;;  %v5796_v33 = vld [vmem:[%s6907_s22 + $0x60] ss:$24 sps:$4 sm:$0xff]  }
 0x2e0   : >> { %914 = vadd.xlane.f32.xlu0 %v913_v20  ;;  %1611 = vmatpush1.bf16.msra.mxu1 %v5790_v29  ;;  %v5797_v34 = vld [vmem:[%s6907_s22 + $0x94] ss:$24 sps:$4 sm:$0xff]   ;;  %v5799_v35 = vld [vmem:[%s6907_s22 + $0x90] ss:$24 sps:$4 sm:$0xff]   ;;  %v5800_v36 = vld [vmem:[%s6907_s22 + $0xc4] ss:$24 sps:$4 sm:$0xff]  }
 0x2e1   : >> { %v906_v19 = vld [vmem:[#allocation2 + $0x20] sm:$0x1]  ;;  %v907_v21 = vld [vmem:[#allocation2 + $0x28] sm:$0x1]  ;;  %1612 = vmatprep.subr.bf16.mxu1 %v5791_v30  ;;  %v5803_v39 = vld [vmem:[%s6907_s22 + $0xf4] ss:$24 sps:$4 sm:$0xff]  }
 0x2e2   : >> { %v919_v22 = vsel %vm778_vm2, %v906_v19, 0.0  ;;  %v920_v25 = vsel %vm778_vm2, %v907_v21, 0.0  ;;  %v5802_v37 = vld [vmem:[%s6907_s22 + $0xc0] ss:$24 sps:$4 sm:$0xff]   ;;  %v5805_v40 = vld [vmem:[%s6907_s22 + $0xf0] ss:$24 sps:$4 sm:$0xff]  }
 0x2e3   : >> { %v921_v26 = vadd.f32 %v920_v25, %v919_v22  ;;  %v5806_v41 = vld [vmem:[%s6907_s22 + $0x124] ss:$24 sps:$4 sm:$0xff]   ;;  %v5808_v42 = vld [vmem:[%s6907_s22 + $0x120] ss:$24 sps:$4 sm:$0xff]   ;;  %v5809_v43 = vld [vmem:[%s6907_s22 + $0x154] ss:$24 sps:$4 sm:$0xff]  }
 0x2e4   : >> { %917 = vadd.xlane.f32.xlu0 %v916_v27  ;;  %1613 = vmatpush1.bf16.msra.mxu1 %v5793_v31  ;;  %v5811_v47 = vld [vmem:[%s6907_s22 + $0x150] ss:$24 sps:$4 sm:$0xff]   ;;  %v5812_v48 = vld [vmem:[%s6907_s22 + $0x184] ss:$24 sps:$4 sm:$0xff]   ;;  %v5814_v49 = vld [vmem:[%s6907_s22 + $0x180] ss:$24 sps:$4 sm:$0xff]  }
 0x2e5   : >> { %922 = vadd.xlane.f32.xlu1 %v921_v26  ;;  %1614 = vmatprep.subr.bf16.mxu1 %v5794_v32  ;;  %v5815_v10 = vld [vmem:[%s6907_s22 + $0x1b4] ss:$24 sps:$4 sm:$0xff]   ;;  %v5817_v11 = vld [vmem:[%s6907_s22 + $0x1b0] ss:$24 sps:$4 sm:$0xff]   ;;  %v5818_v12 = vld [vmem:[%s6907_s22 + $0x1e4] ss:$24 sps:$4 sm:$0xff]  }
 0x2e6   : >> { %v5820_v13 = vld [vmem:[%s6907_s22 + $0x1e0] ss:$24 sps:$4 sm:$0xff]   ;;  %v5821_v14 = vld [vmem:[%s6907_s22 + $0x214] ss:$24 sps:$4 sm:$0xff]   ;;  %v5823_v15 = vld [vmem:[%s6907_s22 + $0x210] ss:$24 sps:$4 sm:$0xff]  }
 0x2e7   : >> { %v5824_v16 = vld [vmem:[%s6907_s22 + $0x244] ss:$24 sps:$4 sm:$0xff]   ;;  %v5833_v22 = vld [vmem:[%s6907_s22 + $0x2d4] ss:$24 sps:$4 sm:$0xff]   ;;  %s1096_s7 = smul.u32 6, %s6498_s27  ;;  %s5554_s19 = sshll.u32 %s6498_s27, 8 }
 0x2e8   : >> { %1615 = vmatpush1.bf16.msra.mxu1 %v5796_v33  ;;  %v5830_v20 = vld [vmem:[%s6907_s22 + $0x2a4] ss:$24 sps:$4 sm:$0xff]   ;;  %s7218_s30 = scalar_lea.vmem [#allocation6], %s5555_s24  ;;  %s5248_s24 = sshll.u32 %s6498_s27, 3 }
 0x2e9   : >> { %1616 = vmatprep.subr.bf16.mxu1 %v5797_v34  ;;  %v6975_v34 = vld [vmem:[%s6972_s28 + $0x8] sm:$0x3f]  ;;  %s1097_s14 = scalar_lea.vmem %s7899_s10, %s1096_s7  ;;  %s2545_s7 = scalar_lea.vmem %s7900_s11, %s5248_s24 }
 0x2ea   : >> { %s901_s27 = sadd.s32 1, %s6498_s27  }
 0x2eb   : >> { %p898_p10 = scmp.ge.s32.totalorder %s901_s27, 2  }
 0x2ec   : >> { %1617 = vmatpush1.bf16.msra.mxu1 %v5799_v35  ;;  %v6978_v35 = vld [vmem:[%s6972_s28] sm:$0x3f]  ;;  %vm4640_vm5 = vcmask (%p898_p10), 1047553   ;;  %vm4767_vm6 = vsmask.f32 (%p898_p10), 7424  ;;  %s5557_s20 = sshll.u32 (%p898_p10), %s6604_s29, 8 }
 0x2ed   : >> { %1618 = vmatprep.subr.bf16.mxu1 %v5800_v36  ;;  %s4947_s18 = sshll.u32 (%p898_p10), %s6892_s16, 4  ;;  %s7936_s17 = sld [smem:[#allocation21_spill]] (%p898_p10)  ;;  %s7842_s18 = int_to_ptr.vmem [resolvable:$true] %s4947_s18 }
 0x2ee   : > { %s7848_s29 = scalar_lea.sflag (%p898_p10), [#allocation5], %s475_s23 }
 0x2f0   : >> { %1619 = vmatpush1.bf16.msra.mxu1 %v5802_v37  ;;  %v972_v37 = vrot.slane %v6975_v34, %v6876_v45 }
 0x2f1   : >> { %1620 = vmatprep.subr.bf16.mxu1 %v5803_v39  ;;  %v968_v39 = vrot.slane %v6978_v35, %v6876_v45 }
 0x2f3   : > { %s7840_s21 = scalar_lea.hbm (%p898_p10), %s7936_s17, %s5557_s20 }
 0x2f4   : >> { %1621 = vmatpush1.bf16.msra.mxu1 %v5805_v40 }
 0x2f5   : >> { %1622 = vmatprep.subr.bf16.mxu1 %v5806_v41 }
 0x2f8   : >> { %1623 = vmatpush1.bf16.msra.mxu1 %v5808_v42 }
 0x2f9   : >> { %1624 = vmatprep.subr.bf16.mxu1 %v5809_v43  ;;  %v986_v43 = vrot.slane %v6975_v34, %v6879_v46 }
 0x2fc   : >> { %1625 = vmatpush1.bf16.msra.mxu1 %v5811_v47  ;;  %v982_v47 = vrot.slane %v6978_v35, %v6879_v46 }
 0x2fd   : >> { %1626 = vmatprep.subr.bf16.mxu1 %v5812_v48 }
 0x300   : >> { %1627 = vmatpush1.bf16.msra.mxu1 %v5814_v49 }
 0x301   : >> { %1628 = vmatprep.subr.bf16.mxu1 %v5815_v10 }
 0x304   : >> { %1629 = vmatpush1.bf16.msra.mxu1 %v5817_v11  ;;  %v5847_v11 = vld [vmem:[%s6907_s22 + $0x9c] ss:$24 sps:$4 sm:$0xff]  }
 0x305   : >> { %1630 = vmatprep.subr.bf16.mxu1 %v5818_v12  ;;  %v5845_v12 = vld [vmem:[%s6907_s22 + $0x98] ss:$24 sps:$4 sm:$0xff]  }
 0x308   : >> { %1631 = vmatpush1.bf16.msra.mxu1 %v5820_v13  ;;  %v5850_v13 = vld [vmem:[%s6907_s22 + $0xcc] ss:$24 sps:$4 sm:$0xff]  }
 0x309   : >> { %1632 = vmatprep.subr.bf16.mxu1 %v5821_v14  ;;  %v5848_v14 = vld [vmem:[%s6907_s22 + $0xc8] ss:$24 sps:$4 sm:$0xff]  }
 0x30c   : >> { %1633 = vmatpush1.bf16.msra.mxu1 %v5823_v15  ;;  %v5853_v15 = vld [vmem:[%s6907_s22 + $0xfc] ss:$24 sps:$4 sm:$0xff]  }
 0x30d   : >> { %1634 = vmatprep.subr.bf16.mxu1 %v5824_v16  ;;  %v5851_v16 = vld [vmem:[%s6907_s22 + $0xf8] ss:$24 sps:$4 sm:$0xff]  }
 0x36d   : >> { %v915_v50 = vpop.xlane.xlu0 %914 }
 0x36e   : >> { %v924_v51 = vmul.f32 0.00390625, %v915_v50 }
 0x370   : >> { %v6927_v52 = vsub.f32 %v902_v17, %v924_v51  ;;  %v6929_v53 = vsub.f32 %v903_v18, %v924_v51  ;;  %v5826_v17 = vld [vmem:[%s6907_s22 + $0x240] ss:$24 sps:$4 sm:$0xff]   ;;  %v5827_v18 = vld [vmem:[%s6907_s22 + $0x274] ss:$24 sps:$4 sm:$0xff]  }
 0x371   : >> { %v918_v55 = vpop.xlane.xlu0 %917  ;;  %1635 = vmatpush1.bf16.msra.mxu1 %v5826_v17  ;;  %v5856_v17 = vld [vmem:[%s6907_s22 + $0x12c] ss:$24 sps:$4 sm:$0xff]  }
 0x372   : >> { %v923_v38 = vpop.xlane.xlu1 %922  ;;  %v925_v58 = vmul.f32 0.00390625, %v918_v55  ;;  %v933_v59 = vmul.f32 %v6927_v52, %v6927_v52  ;;  %v934_v60 = vmul.f32 %v6929_v53, %v6929_v53  ;;  %1636 = vmatprep.subr.bf16.mxu1 %v5827_v18  ;;  %v5854_v18 = vld [vmem:[%s6907_s22 + $0x128] ss:$24 sps:$4 sm:$0xff]  }
 0x373   : >> { %v926_v54 = vmul.f32 0.00390625, %v923_v38 }
 0x374   : >> { %v6939_v61 = vsub.f32 %v904_v23, %v925_v58  ;;  %v6941_v62 = vsub.f32 %v905_v24, %v925_v58  ;;  %v939_v3 = vadd.f32 %v934_v60, %v933_v59  ;;  %v5835_v23 = vld [vmem:[%s6907_s22 + $0x2d0] ss:$24 sps:$4 sm:$0xff]   ;;  %v5838_v24 = vld [vmem:[%s6907_s22 + $0xc] ss:$24 sps:$4 sm:$0xff]  }
 0x375   : >> { %v6931_v56 = vsub.f32 %v906_v19, %v926_v54  ;;  %v6933_v57 = vsub.f32 %v907_v21, %v926_v54  ;;  %v5829_v19 = vld [vmem:[%s6907_s22 + $0x270] ss:$24 sps:$4 sm:$0xff]   ;;  %v5832_v21 = vld [vmem:[%s6907_s22 + $0x2a0] ss:$24 sps:$4 sm:$0xff]  }
 0x376   : >> { %v935_v6 = vmul.f32 %v6939_v61, %v6939_v61  ;;  %v936_v7 = vmul.f32 %v6941_v62, %v6941_v62  ;;  %940 = vadd.xlane.f32.xlu1 %v939_v3  ;;  %1637 = vmatpush1.bf16.msra.mxu1 %v5829_v19  ;;  %v5859_v19 = vld [vmem:[%s6907_s22 + $0x15c] ss:$24 sps:$4 sm:$0xff]  }
 0x377   : >> { %v937_v63 = vmul.f32 %v6931_v56, %v6931_v56  ;;  %v938_v2 = vmul.f32 %v6933_v57, %v6933_v57  ;;  %1638 = vmatprep.subr.bf16.mxu1 %v5830_v20  ;;  %v5857_v20 = vld [vmem:[%s6907_s22 + $0x158] ss:$24 sps:$4 sm:$0xff]  }
 0x378   : >> { %v942_v9 = vadd.f32 %v936_v7, %v935_v6  ;;  %v5844_v7 = vld [vmem:[%s6907_s22 + $0x6c] ss:$24 sps:$4 sm:$0xff]  }
 0x379   : >> { %v945_v4 = vsel %vm778_vm2, %v937_v63, 0.0  ;;  %v946_v5 = vsel %vm778_vm2, %v938_v2, 0.0 }
 0x37a   : >> { %v947_v8 = vadd.f32 %v946_v5, %v945_v4  ;;  %943 = vadd.xlane.f32.xlu0 %v942_v9  ;;  %1639 = vmatpush1.bf16.msra.mxu1 %v5832_v21  ;;  %v5836_v4 = vld [vmem:[%s6907_s22 + $0x8] ss:$24 sps:$4 sm:$0xff]   ;;  %v5862_v21 = vld [vmem:[%s6907_s22 + $0x18c] ss:$24 sps:$4 sm:$0xff]  }
 0x37b   : >> { %1640 = vmatprep.subr.bf16.mxu1 %v5833_v22  ;;  %v5842_v9 = vld [vmem:[%s6907_s22 + $0x68] ss:$24 sps:$4 sm:$0xff]  }
 0x37c   : >> { %948 = vadd.xlane.f32.xlu1 %v947_v8  ;;  %v5860_v22 = vld [vmem:[%s6907_s22 + $0x188] ss:$24 sps:$4 sm:$0xff]  }
 0x37e   : >> { %1641 = vmatpush1.bf16.msra.mxu1 %v5835_v23  ;;  %v5865_v23 = vld [vmem:[%s6907_s22 + $0x1bc] ss:$24 sps:$4 sm:$0xff]  }
 0x37f   : >> { %1661 = vmatprep.subr.bf16.mxu1 %v5838_v24  ;;  %v5863_v24 = vld [vmem:[%s6907_s22 + $0x1b8] ss:$24 sps:$4 sm:$0xff]  }
 0x403   : >> { %v941_v25 = vpop.xlane.xlu1 %940 }
 0x404   : >> { %v950_v26 = vmul.f32 0.00390625, %v941_v25  ;;  %v5868_v25 = vld [vmem:[%s6907_s22 + $0x1ec] ss:$24 sps:$4 sm:$0xff]  }
 0x406   : >> { %v953_v27 = vadd.f32 1e-05, %v950_v26  ;;  %v5866_v26 = vld [vmem:[%s6907_s22 + $0x1e8] ss:$24 sps:$4 sm:$0xff]  }
 0x407   : >> { %v944_v28 = vpop.xlane.xlu0 %943 }
 0x408   : >> { %v951_v30 = vmul.f32 0.00390625, %v944_v28  ;;  %6172 = vrsqrt.f32 %v953_v27  ;;  %v5871_v27 = vld [vmem:[%s6907_s22 + $0x21c] ss:$24 sps:$4 sm:$0xff]   ;;  %v5869_v28 = vld [vmem:[%s6907_s22 + $0x218] ss:$24 sps:$4 sm:$0xff]  }
 0x409   : >> { %v949_v29 = vpop.xlane.xlu1 %948 }
 0x40a   : >> { %v952_v31 = vmul.f32 0.00390625, %v949_v29  ;;  %v954_v32 = vadd.f32 1e-05, %v951_v30  ;;  %v5874_v29 = vld [vmem:[%s6907_s22 + $0x24c] ss:$24 sps:$4 sm:$0xff]  }
 0x40b   : >> { %v5872_v30 = vld [vmem:[%s6907_s22 + $0x248] ss:$24 sps:$4 sm:$0xff]  }
 0x40c   : >> { %v955_v33 = vadd.f32 1e-05, %v952_v31  ;;  %6174 = vrsqrt.f32 %v954_v32  ;;  %v5877_v31 = vld [vmem:[%s6907_s22 + $0x27c] ss:$24 sps:$4 sm:$0xff]   ;;  %v5875_v32 = vld [vmem:[%s6907_s22 + $0x278] ss:$24 sps:$4 sm:$0xff]  }
 0x40e   : >> { %6176 = vrsqrt.f32 %v955_v33  ;;  %v5880_v33 = vld [vmem:[%s6907_s22 + $0x2ac] ss:$24 sps:$4 sm:$0xff]  }
 0x412   : >> { %v6173_v36 = vpop.eup %6172 }
 0x413   : >> { %v960_v40 = vmul.f32 %v6173_v36, %v6929_v53  ;;  %v959_v41 = vmul.f32 %v6173_v36, %v6927_v52  ;;  %v5878_v36 = vld [vmem:[%s6907_s22 + $0x2a8] ss:$24 sps:$4 sm:$0xff]  }
 0x415   : >> { %v974_v50 = vmul.f32 %v972_v37, %v960_v40  ;;  %v973_v38 = vmul.f32 %v968_v39, %v959_v41  ;;  %v5886_v40 = vld [vmem:[%s6907_s22 + $0x14] ss:$24 sps:$4 sm:$0xff]   ;;  %v5884_v41 = vld [vmem:[%s6907_s22 + $0x10] ss:$24 sps:$4 sm:$0xff]  }
 0x416   : >> { %v6175_v42 = vpop.eup %6174 }
 0x417   : >> { %v962_v49 = vmul.f32 %v6175_v42, %v6941_v62  ;;  %v961_v51 = vmul.f32 %v6175_v42, %v6939_v61  ;;  %v988_v59 = vadd.f32 %v986_v43, %v974_v50  ;;  %v987_v63 = vadd.f32 %v982_v47, %v973_v38  ;;  %v5889_v42 = vld [vmem:[%s6907_s22 + $0x44] ss:$24 sps:$4 sm:$0xff]   ;;  %v5893_v50 = vld [vmem:[%s6907_s22 + $0xa0] ss:$24 sps:$4 sm:$0xff]   ;;  %v5896_v38 = vld [vmem:[%s6907_s22 + $0xd0] ss:$24 sps:$4 sm:$0xff]  }
 0x418   : >> { %v6177_v48 = vpop.eup %6176 }
 0x419   : >> { %v964_v53 = vmul.f32 %v6177_v48, %v6933_v57  ;;  %v976_v54 = vmul.f32 %v972_v37, %v962_v49  ;;  %v975_v52 = vmul.f32 %v968_v39, %v961_v51  ;;  %v963_v58 = vmul.f32 %v6177_v48, %v6931_v56  ;;  %v5841_v57 = vld [vmem:[%s6907_s22 + $0x3c] ss:$24 sps:$4 sm:$0xff]   ;;  %v5839_v56 = vld [vmem:[%s6907_s22 + $0x38] ss:$24 sps:$4 sm:$0xff]  }
 0x41a   : >> { %v5890_v48 = vld [vmem:[%s6907_s22 + $0x70] ss:$24 sps:$4 sm:$0xff]   ;;  %v5895_v49 = vld [vmem:[%s6907_s22 + $0xa4] ss:$24 sps:$4 sm:$0xff]   ;;  %v5898_v51 = vld [vmem:[%s6907_s22 + $0xd4] ss:$24 sps:$4 sm:$0xff]  }
 0x41b   : >> { %v978_v55 = vmul.f32 %v972_v37, %v964_v53  ;;  %v990_v60 = vadd.f32 %v986_v43, %v976_v54  ;;  %v989_v2 = vadd.f32 %v982_v47, %v975_v52  ;;  %v977_v5 = vmul.f32 %v968_v39, %v963_v58  ;;  %v5883_v37 = vld [vmem:[%s6907_s22 + $0x2dc] ss:$24 sps:$4 sm:$0xff]   ;;  %v5881_v39 = vld [vmem:[%s6907_s22 + $0x2d8] ss:$24 sps:$4 sm:$0xff]  }
 0x41c   : >> { %v5901_v53 = vld [vmem:[%s6907_s22 + $0x104] ss:$24 sps:$4 sm:$0xff]   ;;  %v5899_v54 = vld [vmem:[%s6907_s22 + $0x100] ss:$24 sps:$4 sm:$0xff]   ;;  %v5904_v52 = vld [vmem:[%s6907_s22 + $0x134] ss:$24 sps:$4 sm:$0xff]  }
 0x41d   : >> { %v992_v3 = vadd.f32 %v986_v43, %v978_v55  ;;  %v6994_v62 = vpack.c.bf16 %v990_v60, %v988_v59  ;;  %v6997_v61 = vpack.c.bf16 %v989_v2, %v987_v63  ;;  %v991_v8 = vadd.f32 %v982_v47, %v977_v5  ;;  %v5887_v43 = vld [vmem:[%s6907_s22 + $0x40] ss:$24 sps:$4 sm:$0xff]   ;;  %v5892_v47 = vld [vmem:[%s6907_s22 + $0x74] ss:$24 sps:$4 sm:$0xff]   ;;  %v5902_v55 = vld [vmem:[%s6907_s22 + $0x130] ss:$24 sps:$4 sm:$0xff]  }
 0x41e   : >> { %v5907_v58 = vld [vmem:[%s6907_s22 + $0x164] ss:$24 sps:$4 sm:$0xff]   ;;  %v5905_v59 = vld [vmem:[%s6907_s22 + $0x160] ss:$24 sps:$4 sm:$0xff]   ;;  %v5910_v60 = vld [vmem:[%s6907_s22 + $0x194] ss:$24 sps:$4 sm:$0xff]  }
 0x41f   : >> { %1642 = vmatprep.mubr.bf16.mxu1 %v6994_v62  ;;  %v7001_v6 = vpack.c.bf16 %v992_v3, %v992_v3  ;;  %v7008_v10 = vpack.c.bf16 %v991_v8, %v991_v8  ;;  %v5908_v63 = vld [vmem:[%s6907_s22 + $0x190] ss:$24 sps:$4 sm:$0xff]   ;;  %v5913_v2 = vld [vmem:[%s6907_s22 + $0x1c4] ss:$24 sps:$4 sm:$0xff]   ;;  %v5911_v3 = vld [vmem:[%s6907_s22 + $0x1c0] ss:$24 sps:$4 sm:$0xff]  }
 0x420   : >> { %1643 = vmatmul.mubr.bf16.vlgmr.msra.gmra.mrb[0].mxu1 %v6997_v61  ;;  %v5917_v5 = vld [vmem:[%s6907_s22 + $0x220] ss:$24 sps:$4 sm:$0xff]   ;;  %v5925_v8 = vld [vmem:[%s6907_s22 + $0x284] ss:$24 sps:$4 sm:$0xff]  }
 0x421   : >> { %1662 = vmatpush1.bf16.msra.mxu1 %v5836_v4  ;;  %1652 = vmatprep.mubr.bf16.mxu1 %v7001_v6  ;;  %v5914_v4 = vld [vmem:[%s6907_s22 + $0x1f0] ss:$24 sps:$4 sm:$0xff]  }
 0x422   : >> { %1663 = vmatprep.subr.bf16.mxu1 %v5841_v57  ;;  %v5919_v57 = vld [vmem:[%s6907_s22 + $0x224] ss:$24 sps:$4 sm:$0xff]  }
 0x425   : >> { %1664 = vmatpush1.bf16.msra.mxu1 %v5839_v56  ;;  %v5922_v56 = vld [vmem:[%s6907_s22 + $0x254] ss:$24 sps:$4 sm:$0xff]  }
 0x426   : >> { %1665 = vmatprep.subr.bf16.mxu1 %v5844_v7  ;;  %v5920_v7 = vld [vmem:[%s6907_s22 + $0x250] ss:$24 sps:$4 sm:$0xff]  }
 0x428   : >> { %1653 = vmatmul.mubr.bf16.gmra.mrb[4].mxu1 %v7008_v10 }
 0x429   : >> { %1666 = vmatpush1.bf16.msra.mxu1 %v5842_v9  ;;  %1693 = vmatprep.mubr.bf16.mxu1 %v6994_v62  ;;  %v5923_v9 = vld [vmem:[%s6907_s22 + $0x280] ss:$24 sps:$4 sm:$0xff]  }
 0x42a   : >> { %1667 = vmatprep.subr.bf16.mxu1 %v5847_v11  ;;  %v5928_v11 = vld [vmem:[%s6907_s22 + $0x2b4] ss:$24 sps:$4 sm:$0xff]  }
 0x42d   : >> { %1668 = vmatpush1.bf16.msra.mxu1 %v5845_v12  ;;  %v5926_v12 = vld [vmem:[%s6907_s22 + $0x2b0] ss:$24 sps:$4 sm:$0xff]  }
 0x42e   : >> { %1669 = vmatprep.subr.bf16.mxu1 %v5850_v13  ;;  %v5931_v13 = vld [vmem:[%s6907_s22 + $0x2e4] ss:$24 sps:$4 sm:$0xff]  }
 0x431   : >> { %1670 = vmatpush1.bf16.msra.mxu1 %v5848_v14  ;;  %v5929_v14 = vld [vmem:[%s6907_s22 + $0x2e0] ss:$24 sps:$4 sm:$0xff]  }
 0x432   : >> { %1671 = vmatprep.subr.bf16.mxu1 %v5853_v15  ;;  %v1098_v15 = vld [vmem:[%s1097_s14] sm:$0x3f] }
 0x435   : >> { %1672 = vmatpush1.bf16.msra.mxu1 %v5851_v16  ;;  %v1103_v16 = vrot.slane %v1098_v15, %v6876_v45 }
 0x436   : >> { %1673 = vmatprep.subr.bf16.mxu1 %v5856_v17 }
 0x439   : >> { %1674 = vmatpush1.bf16.msra.mxu1 %v5854_v18  ;;  %v7083_v18 = vrot.slane %v1098_v15, %v6879_v46 }
 0x43a   : >> { %1675 = vmatprep.subr.bf16.mxu1 %v5859_v19 }
 0x43d   : >> { %1676 = vmatpush1.bf16.msra.mxu1 %v5857_v20 }
 0x43e   : >> { %1677 = vmatprep.subr.bf16.mxu1 %v5862_v21 }
 0x441   : >> { %1678 = vmatpush1.bf16.msra.mxu1 %v5860_v22 }
 0x442   : >> { %1679 = vmatprep.subr.bf16.mxu1 %v5865_v23 }
 0x445   : >> { %1680 = vmatpush1.bf16.msra.mxu1 %v5863_v24 }
 0x446   : >> { %1681 = vmatprep.subr.bf16.mxu1 %v5868_v25 }
 0x449   : >> { %1682 = vmatpush1.bf16.msra.mxu1 %v5866_v26 }
 0x44a   : >> { %1683 = vmatprep.subr.bf16.mxu1 %v5871_v27 }
 0x44d   : >> { %1684 = vmatpush1.bf16.msra.mxu1 %v5869_v28 }
 0x44e   : >> { %1685 = vmatprep.subr.bf16.mxu1 %v5874_v29 }
 0x451   : >> { %1686 = vmatpush1.bf16.msra.mxu1 %v5872_v30  ;;  %v7096_v30 = vsub.s32 2, %v6873_v44 }
 0x452   : >> { %1687 = vmatprep.subr.bf16.mxu1 %v5877_v31  ;;  %v7099_v31 = vsub.s32 3, %v6873_v44 }
 0x455   : >> { %1688 = vmatpush1.bf16.msra.mxu1 %v5875_v32  ;;  %v1111_v32 = vrot.slane %v1098_v15, %v7096_v30 }
 0x456   : >> { %1689 = vmatprep.subr.bf16.mxu1 %v5880_v33 }
 0x459   : >> { %1690 = vmatpush1.bf16.msra.mxu1 %v5878_v36  ;;  %v1115_v36 = vrot.slane %v1098_v15, %v7099_v31 }
 0x45a   : >> { %1691 = vmatprep.subr.bf16.mxu1 %v5883_v37 }
 0x45d   : >> { %1692 = vmatpush1.bf16.msra.mxu1 %v5881_v39 }
 0x45e   : >> { %1712 = vmatprep.subr.bf16.mxu1 %v5886_v40 }
 0x460   : >> { %1694 = vmatmul.mubr.bf16.vlgmr.msra.gmra.mrb[8].mxu1 %v6997_v61 }
 0x461   : >> { %1703 = vmatprep.mubr.bf16.mxu1 %v7001_v6  ;;  %1713 = vmatpush1.bf16.msra.mxu1 %v5884_v41 }
 0x462   : >> { %1714 = vmatprep.subr.bf16.mxu1 %v5889_v42 }
 0x465   : >> { %1715 = vmatpush1.bf16.msra.mxu1 %v5887_v43 }
 0x466   : >> { %1716 = vmatprep.subr.bf16.mxu1 %v5892_v47 }
 0x468   : >> { %1704 = vmatmul.mubr.bf16.gmra.mrb[12].mxu1 %v7008_v10 }
 0x469   : >> { %1717 = vmatpush1.bf16.msra.mxu1 %v5890_v48  ;;  %1744 = vmatprep.mubr.bf16.mxu1 %v6994_v62  ;;  %v5916_v62 = vld [vmem:[%s6907_s22 + $0x1f4] ss:$24 sps:$4 sm:$0xff]   ;;  %s7151_s22 = scalar_lea.vmem %s7895_s6, %s5554_s19 }
 0x46a   : >> { %1718 = vmatprep.subr.bf16.mxu1 %v5895_v49 }
 0x46d   : >> { %1719 = vmatpush1.bf16.msra.mxu1 %v5893_v50 }
 0x46e   : >> { %1720 = vmatprep.subr.bf16.mxu1 %v5898_v51 }
 0x471   : >> { %1721 = vmatpush1.bf16.msra.mxu1 %v5896_v38 }
 0x472   : >> { %1722 = vmatprep.subr.bf16.mxu1 %v5901_v53 }
 0x475   : >> { %1723 = vmatpush1.bf16.msra.mxu1 %v5899_v54 }
 0x476   : >> { %1724 = vmatprep.subr.bf16.mxu1 %v5904_v52 }
 0x479   : >> { %1725 = vmatpush1.bf16.msra.mxu1 %v5902_v55 }
 0x47a   : >> { %1726 = vmatprep.subr.bf16.mxu1 %v5907_v58 }
 0x47d   : >> { %1727 = vmatpush1.bf16.msra.mxu1 %v5905_v59  ;;  %v7108_v59 = vsub.s32 4, %v6873_v44 }
 0x47e   : >> { %1728 = vmatprep.subr.bf16.mxu1 %v5910_v60  ;;  %v7111_v60 = vsub.s32 5, %v6873_v44 }
 0x481   : >> { %1729 = vmatpush1.bf16.msra.mxu1 %v5908_v63  ;;  %v1119_v63 = vrot.slane %v1098_v15, %v7108_v59 }
 0x482   : >> { %1730 = vmatprep.subr.bf16.mxu1 %v5913_v2 }
 0x485   : >> { %1731 = vmatpush1.bf16.msra.mxu1 %v5911_v3  ;;  %v1123_v3 = vrot.slane %v1098_v15, %v7111_v60 }
 0x486   : >> { %1732 = vmatprep.subr.bf16.mxu1 %v5916_v62 }
 0x489   : >> { %1733 = vmatpush1.bf16.msra.mxu1 %v5914_v4 }
 0x48a   : >> { %1734 = vmatprep.subr.bf16.mxu1 %v5919_v57 }
 0x48d   : >> { %1735 = vmatpush1.bf16.msra.mxu1 %v5917_v5 }
 0x48e   : >> { %1736 = vmatprep.subr.bf16.mxu1 %v5922_v56 }
 0x491   : >> { %1737 = vmatpush1.bf16.msra.mxu1 %v5920_v7 }
 0x492   : >> { %1738 = vmatprep.subr.bf16.mxu1 %v5925_v8 }
 0x495   : >> { %1739 = vmatpush1.bf16.msra.mxu1 %v5923_v9 }
 0x496   : >> { %1740 = vmatprep.subr.bf16.mxu1 %v5928_v11 }
 0x499   : >> { %1741 = vmatpush1.bf16.msra.mxu1 %v5926_v12 }
 0x49a   : >> { %1742 = vmatprep.subr.bf16.mxu1 %v5931_v13 }
 0x49d   : >> { %1743 = vmatpush1.bf16.msra.mxu1 %v5929_v14 }
 0x4a0   : >> { %1745 = vmatmul.mubr.bf16.vlgmr.msra.gmra.mrb[16].mxu1 %v6997_v61 }
 0x4a1   : >> { %1754 = vmatprep.mubr.bf16.mxu1 %v7001_v6 }
 0x4a8   : >> { %1755 = vmatmul.mubr.bf16.gmra.mrb[20].mxu1 %v7008_v10 }
 0x4f3   : >> { %v1644_v17 = vpop.f32.mrb[0].mxu1 }
 0x4f4   : >> { %v1646_v19 = vpop.f32.mrb[1].mxu1  ;;  %v1645_v21 = vadd.f32 %v1644_v17, %v1103_v16 }
 0x4f5   : >> { %v1648_v20 = vpop.f32.mrb[2].mxu1  ;;  %v7086_v6 = vadd.f32 %v1646_v19, %v7083_v18 }
 0x4f6   : >> { %v1649_v61 = vadd.f32 %v1648_v20, %v1103_v16  ;;  %v1650_v22 = vpop.f32.mrb[3].mxu1 }
 0x4f7   : >> { %v7089_v10 = vadd.f32 %v1650_v22, %v7083_v18 }
 0x4f8   : >> { %v1763_v23 = vpack.c.bf16 %v1649_v61, %v1645_v21 }
 0x4f9   : >> { %v1916_v24 = vpack.c.bf16 %v7089_v10, %v7086_v6 }
 0x4fa   : >> { %5600 = vmatprep.mubr.bf16.mxu1 %v1763_v23 }
 0x4fb   : >> { %v1654_v25 = vpop.f32.mrb[4].mxu1 }
 0x4fc   : >> { %v1655_v26 = vadd.f32 %v1654_v25, %v1103_v16  ;;  %v7093_v27 = vpop.f32.mrb[5].mxu1  ;;  %v6509_v16 = vmov 0  }
 0x4fd   : >> { %v1658_v28 = vpop.f32.mrb[6].mxu1  ;;  %v1864_v17 = vsel %vm778_vm2, 65535, %v6509_v16  ;;  %v1657_v16 = vadd.f32 %v7093_v27, %v7083_v18 }
 0x4fe   : >> { %v1659_v29 = vpop.f32.mrb[7].mxu1  ;;  %v1764_v58 = vpack.c.bf16 %v1655_v26, %v1655_v26 }
 0x533   : >> { %v1695_v33 = vpop.f32.mrb[8].mxu1 }
 0x534   : >> { %v1697_v37 = vpop.f32.mrb[9].mxu1  ;;  %v1696_v40 = vadd.f32 %v1695_v33, %v1111_v32 }
 0x535   : >> { %v1699_v39 = vpop.f32.mrb[10].mxu1  ;;  %v1698_v43 = vadd.f32 %v1697_v37, %v1115_v36 }
 0x536   : >> { %v1700_v41 = vadd.f32 %v1699_v39, %v1111_v32  ;;  %v1701_v42 = vpop.f32.mrb[11].mxu1 }
 0x537   : >> { %v1702_v47 = vadd.f32 %v1701_v42, %v1115_v36 }
 0x538   : >> { %v1765_v48 = vpack.c.bf16 %v1700_v41, %v1696_v40 }
 0x539   : >> { %v7103_v49 = vpack.c.bf16 %v1702_v47, %v1698_v43 }
 0x53a   : >> { %5596 = vmatprep.subr.bf16.mxu1 %v1765_v48 }
 0x53b   : >> { %v1705_v50 = vpop.f32.mrb[12].mxu1  ;;  %5597 = vmatpush3.bf16.xpose.msra.mxu1 %v1765_v48 }
 0x53c   : >> { %v1706_v51 = vadd.f32 %v1705_v50, %v1111_v32  ;;  %v1707_v38 = vpop.f32.mrb[13].mxu1 }
 0x53d   : >> { %v7105_v53 = vadd.f32 %v1707_v38, %v1115_v36  ;;  %v1709_v54 = vpop.f32.mrb[14].mxu1 }
 0x53e   : >> { %v1766_v52 = vpack.c.bf16 %v1706_v51, %v1706_v51  ;;  %v1710_v55 = vpop.f32.mrb[15].mxu1 }
 0x540   : >> { %5598 = vmatprep.subr.bf16.mxu1 %v1766_v52 }
 0x543   : >> { %5599 = vmatpush3.bf16.xpose.msra.mxu1 %v1766_v52 }
 0x54a   : >> { %5601 = vmatmul.mubr.bf16.vlgmr.msra.gmra.mrb[24].mxu1 %v1764_v58 }
 0x573   : >> { %v1746_v2 = vpop.f32.mrb[16].mxu1 }
 0x574   : >> { %v1748_v62 = vpop.f32.mrb[17].mxu1  ;;  %v1747_v57 = vadd.f32 %v1746_v2, %v1119_v63 }
 0x575   : >> { %v1750_v4 = vpop.f32.mrb[18].mxu1  ;;  %v1749_v7 = vadd.f32 %v1748_v62, %v1123_v3 }
 0x576   : >> { %v1751_v5 = vadd.f32 %v1750_v4, %v1119_v63  ;;  %v1752_v56 = vpop.f32.mrb[19].mxu1 }
 0x577   : >> { %v1753_v8 = vadd.f32 %v1752_v56, %v1123_v3 }
 0x578   : >> { %v1767_v9 = vpack.c.bf16 %v1751_v5, %v1747_v57 }
 0x579   : >> { %v1920_v11 = vpack.c.bf16 %v1753_v8, %v1749_v7 }
 0x57a   : >> { %5604 = vmatprep.subr.bf16.mxu0 %v1767_v9 }
 0x57b   : >> { %v1756_v12 = vpop.f32.mrb[20].mxu1  ;;  %5605 = vmatpush3.bf16.msra.mxu0 %v1767_v9  ;;  %5620 = vmatprep.subr.bf16.mxu1 %v1920_v11 }
 0x57c   : >> { %v1757_v13 = vadd.f32 %v1756_v12, %v1119_v63  ;;  %v1758_v14 = vpop.f32.mrb[21].mxu1  ;;  %5621 = vmatpush3.bf16.msra.mxu1 %v1920_v11 }
 0x57d   : >> { %v1759_v15 = vadd.f32 %v1758_v14, %v1123_v3  ;;  %v1760_v19 = vpop.f32.mrb[22].mxu1  ;;  %v1919_v14 = vpack.c.bf16 %v7105_v53, %v7105_v53 }
 0x57e   : >> { %v1768_v20 = vpack.c.bf16 %v1757_v13, %v1757_v13  ;;  %v1761_v21 = vpop.f32.mrb[23].mxu1 }
 0x57f   : >> { %v1921_v61 = vpack.c.bf16 %v1759_v15, %v1759_v15 }
 0x580   : >> { %v1866_v22 = vand.u32 %v1864_v17, %v1768_v20 }
 0x581   : >> { %v2015_v23 = vand.u32 %v1921_v61, %v1864_v17  ;;  %v1917_v17 = vpack.c.bf16 %v1657_v16, %v1657_v16  ;;  %v5949_v16 = vld [vmem:[%s7151_s22 + $0x54] ss:$8 sps:$4 sm:$0xff]  }
 0x582   : >> { %5606 = vmatprep.subr.bf16.mxu0 %v1866_v22 }
 0x583   : >> { %5607 = vmatpush3.bf16.msra.mxu0 %v1866_v22  ;;  %5622 = vmatprep.subr.bf16.mxu1 %v2015_v23 }
 0x584   : >> { %5612 = vmatprep.subr.bf16.mxu0 %v7103_v49  ;;  %5623 = vmatpush3.bf16.msra.mxu1 %v2015_v23 }
 0x61d   : >> { %v5602_v25 = vpop.f32.mrb[24].mxu1 }
 0x61e   : >> { %v1803_v26 = vpop.f32.mrb[25].mxu1  ;;  %v1819_v33 = vmul.f32 0.088388346, %v5602_v25 }
 0x61f   : >> { %v1817_v28 = vmul.f32 0.088388346, %v1803_v26  ;;  %v5603_v29 = vpop.f32.mrb[26].mxu1 }
 0x620   : >> { %v1806_v32 = vpop.f32.mrb[27].mxu1  ;;  %v1828_v40 = vsel %vm1827_vm4, %v1819_v33, -inf }
 0x621   : >> { %v1818_v36 = vmul.f32 0.088388346, %v1806_v32  ;;  %v1821_v37 = vsel %vm1820_vm3, %v1817_v28, -inf }
 0x622   : >> { %1822 = vmax.xlane.f32.xlu0 %v1821_v37 }
 0x623   : >> { %v1824_v39 = vsel %vm1820_vm3, %v1818_v36, -inf }
 0x624   : >> { %1825 = vmax.xlane.f32.xlu1 %v1824_v39 }
 0x626   : >> { %1829 = vmax.xlane.f32.xlu0 %v1828_v40 }
 0x6af   : >> { %v1823_v41 = vpop.xlane.xlu0 %1822 }
 0x6b0   : >> { %v1831_v42 = vsub.f32 %v1817_v28, %v1823_v41 }
 0x6b1   : >> { %v1826_v43 = vpop.xlane.xlu1 %1825 }
 0x6b2   : >> { %v1834_v47 = vmul.f32 1.442695, %v1831_v42  ;;  %v1832_v48 = vsub.f32 %v1818_v36, %v1826_v43 }
 0x6b3   : >> { %v1830_v50 = vpop.xlane.xlu0 %1829 }
 0x6b4   : >> { %6178 = vpow2.f32 %v1834_v47  ;;  %v1836_v51 = vmul.f32 1.442695, %v1832_v48  ;;  %v1833_v38 = vsub.f32 %v1819_v33, %v1830_v50 }
 0x6b6   : >> { %6180 = vpow2.f32 %v1836_v51  ;;  %v1838_v54 = vmul.f32 1.442695, %v1833_v38  ;;  %v5934_v51 = vld [vmem:[%s7151_s22 + $0x4] ss:$8 sps:$4 sm:$0xff]  }
 0x6b7   : >> { %2272 = vmatprep.subr.bf16.mxu1 %v5934_v51 }
 0x6b8   : >> { %6182 = vpow2.f32 %v1838_v54 }
 0x6be   : >> { %v6179_v52 = vpop.eup %6178 }
 0x6bf   : >> { %v1840_v55 = vsel %vm1820_vm3, %v6179_v52, 0.0 }
 0x6c0   : >> { %v6181_v58 = vpop.eup %6180  ;;  %1841 = vadd.xlane.f32.xlu1 %v1840_v55 }
 0x6c1   : >> { %v1843_v63 = vsel %vm1820_vm3, %v6181_v58, 0.0 }
 0x6c2   : >> { %v6183_v2 = vpop.eup %6182  ;;  %1844 = vadd.xlane.f32.xlu0 %v1843_v63 }
 0x6c3   : >> { %v1846_v3 = vsel %vm1827_vm4, %v6183_v2, 0.0 }
 0x6c4   : >> { %1847 = vadd.xlane.f32.xlu1 %v1846_v3 }
 0x74d   : >> { %v1842_v62 = vpop.xlane.xlu1 %1841 }
 0x74e   : >> { %6184 = vrcp.f32 %v1842_v62 }
 0x74f   : >> { %v1845_v4 = vpop.xlane.xlu0 %1844 }
 0x750   : >> { %6186 = vrcp.f32 %v1845_v4 }
 0x751   : >> { %v1848_v57 = vpop.xlane.xlu1 %1847 }
 0x752   : >> { %6188 = vrcp.f32 %v1848_v57  ;;  %v5932_v57 = vld [vmem:[%s7151_s22] ss:$8 sps:$4 sm:$0xff]  }
 0x758   : >> { %v6185_v5 = vpop.eup %6184 }
 0x759   : >> { %v1852_v7 = vmul.f32 %v6185_v5, %v6179_v52 }
 0x75a   : >> { %v6187_v56 = vpop.eup %6186 }
 0x75b   : >> { %v1853_v8 = vmul.f32 %v6187_v56, %v6181_v58  ;;  %v5937_v56 = vld [vmem:[%s7151_s22 + $0x14] ss:$8 sps:$4 sm:$0xff]  }
 0x75c   : >> { %v6189_v9 = vpop.eup %6188 }
 0x75d   : >> { %v1855_v11 = vpack.c.bf16 %v1853_v8, %v1852_v7  ;;  %v1854_v12 = vmul.f32 %v6189_v9, %v6183_v2  ;;  %v5935_v7 = vld [vmem:[%s7151_s22 + $0x10] ss:$8 sps:$4 sm:$0xff]   ;;  %v5940_v8 = vld [vmem:[%s7151_s22 + $0x24] ss:$8 sps:$4 sm:$0xff]   ;;  %v5938_v9 = vld [vmem:[%s7151_s22 + $0x20] ss:$8 sps:$4 sm:$0xff]  }
 0x75f   : >> { %5608 = vmatprep.mubr.msk.bf16.mxu0 %vm1820_vm3, %v1855_v11  ;;  %v1856_v13 = vpack.c.bf16 %v1854_v12, %v1854_v12  ;;  %v5943_v11 = vld [vmem:[%s7151_s22 + $0x34] ss:$8 sps:$4 sm:$0xff]   ;;  %v5941_v12 = vld [vmem:[%s7151_s22 + $0x30] ss:$8 sps:$4 sm:$0xff]  }
 0x761   : >> { %5609 = vmatmul.mubr.msk.bf16.vlgmr.msra.gmra.mrb[0].mxu0 %vm1820_vm3, %v1856_v13  ;;  %v5946_v13 = vld [vmem:[%s7151_s22 + $0x44] ss:$8 sps:$4 sm:$0xff]  }
 0x762   : >> { %5613 = vmatpush3.bf16.xpose.msra.mxu0 %v7103_v49  ;;  %5616 = vmatprep.mubr.bf16.mxu0 %v1916_v24 }
 0x763   : >> { %5614 = vmatprep.subr.bf16.mxu0 %v1919_v14 }
 0x76a   : >> { %5615 = vmatpush3.bf16.xpose.msra.mxu0 %v1919_v14  ;;  %v5944_v14 = vld [vmem:[%s7151_s22 + $0x40] ss:$8 sps:$4 sm:$0xff]  }
 0x771   : >> { %5617 = vmatmul.mubr.bf16.vlgmr.msra.gmra.mrb[4].mxu0 %v1917_v17  ;;  %v5947_v17 = vld [vmem:[%s7151_s22 + $0x50] ss:$8 sps:$4 sm:$0xff]  }
 0x834   : >> { %v7133_v15 = vpop.f32.mrb[0].mxu0 }
 0x835   : >> { %v7135_v19 = vpop.f32.mrb[1].mxu0  ;;  %v2067_v51 = vpack.c.bf16 %v7133_v15, %v7133_v15 }
 0x836   : >> { %v5611_v53 = vpop.f32.mrb[2].mxu0 }
 0x837   : >> { %v7137_v20 = vpop.f32.mrb[3].mxu0  ;;  %v5952_v53 = vld [vmem:[%s7151_s22 + $0x64] ss:$8 sps:$4 sm:$0xff]  }
 0x838   : >> { %v2065_v49 = vpack.c.bf16 %v7137_v20, %v7135_v19 }
 0x844   : >> { %v5618_v21 = vpop.f32.mrb[4].mxu0 }
 0x845   : >> { %v1956_v6 = vpop.f32.mrb[5].mxu0  ;;  %v1972_v22 = vmul.f32 0.088388346, %v5618_v21  ;;  %v5950_v21 = vld [vmem:[%s7151_s22 + $0x60] ss:$8 sps:$4 sm:$0xff]  }
 0x846   : >> { %v1970_v10 = vmul.f32 0.088388346, %v1956_v6  ;;  %v5619_v24 = vpop.f32.mrb[6].mxu0  ;;  %v5955_v6 = vld [vmem:[%s7151_s22 + $0x74] ss:$8 sps:$4 sm:$0xff]  }
 0x847   : >> { %v1959_v61 = vpop.f32.mrb[7].mxu0  ;;  %v1979_v25 = vsel %vm1827_vm4, %v1972_v22, -inf  ;;  %v5958_v24 = vld [vmem:[%s7151_s22 + $0x84] ss:$8 sps:$4 sm:$0xff]  }
 0x848   : >> { %v1971_v23 = vmul.f32 0.088388346, %v1959_v61  ;;  %v1973_v18 = vsel %vm1820_vm3, %v1970_v10, -inf  ;;  %v5956_v61 = vld [vmem:[%s7151_s22 + $0x80] ss:$8 sps:$4 sm:$0xff]  }
 0x849   : >> { %1974 = vmax.xlane.f32.xlu0 %v1973_v18  ;;  %v5964_v18 = vld [vmem:[%s7151_s22 + $0xa4] ss:$8 sps:$4 sm:$0xff]  }
 0x84a   : >> { %v1976_v27 = vsel %vm1820_vm3, %v1971_v23, -inf }
 0x84b   : >> { %1977 = vmax.xlane.f32.xlu1 %v1976_v27  ;;  %v5962_v27 = vld [vmem:[%s7151_s22 + $0xa0] ss:$8 sps:$4 sm:$0xff]  }
 0x84d   : >> { %1980 = vmax.xlane.f32.xlu0 %v1979_v25  ;;  %v5967_v25 = vld [vmem:[%s7151_s22 + $0xb4] ss:$8 sps:$4 sm:$0xff]  }
 0x8d6   : >> { %v1975_v26 = vpop.xlane.xlu0 %1974 }
 0x8d7   : >> { %v1982_v28 = vsub.f32 %v1970_v10, %v1975_v26  ;;  %v5953_v10 = vld [vmem:[%s7151_s22 + $0x70] ss:$8 sps:$4 sm:$0xff]  }
 0x8d8   : >> { %v1978_v29 = vpop.xlane.xlu1 %1977  ;;  %v5965_v26 = vld [vmem:[%s7151_s22 + $0xb0] ss:$8 sps:$4 sm:$0xff]  }
 0x8d9   : >> { %v1985_v32 = vmul.f32 1.442695, %v1982_v28  ;;  %v1983_v33 = vsub.f32 %v1971_v23, %v1978_v29  ;;  %v5959_v23 = vld [vmem:[%s7151_s22 + $0x90] ss:$8 sps:$4 sm:$0xff]   ;;  %v5970_v28 = vld [vmem:[%s7151_s22 + $0xc4] ss:$8 sps:$4 sm:$0xff]  }
 0x8da   : >> { %v1981_v36 = vpop.xlane.xlu0 %1980  ;;  %v5968_v29 = vld [vmem:[%s7151_s22 + $0xc0] ss:$8 sps:$4 sm:$0xff]  }
 0x8db   : >> { %6190 = vpow2.f32 %v1985_v32  ;;  %v1987_v37 = vmul.f32 1.442695, %v1983_v33  ;;  %v1984_v39 = vsub.f32 %v1972_v22, %v1981_v36  ;;  %v5961_v22 = vld [vmem:[%s7151_s22 + $0x94] ss:$8 sps:$4 sm:$0xff]   ;;  %v5971_v33 = vld [vmem:[%s7151_s22 + $0xd0] ss:$8 sps:$4 sm:$0xff]  }
 0x8dc   : >> { %v5973_v32 = vld [vmem:[%s7151_s22 + $0xd4] ss:$8 sps:$4 sm:$0xff]   ;;  %v5976_v36 = vld [vmem:[%s7151_s22 + $0xe4] ss:$8 sps:$4 sm:$0xff]  }
 0x8dd   : >> { %6192 = vpow2.f32 %v1987_v37  ;;  %v1989_v40 = vmul.f32 1.442695, %v1984_v39  ;;  %v5974_v37 = vld [vmem:[%s7151_s22 + $0xe0] ss:$8 sps:$4 sm:$0xff]   ;;  %v5979_v39 = vld [vmem:[%s7151_s22 + $0xf4] ss:$8 sps:$4 sm:$0xff]  }
 0x8df   : >> { %6194 = vpow2.f32 %v1989_v40  ;;  %v5977_v40 = vld [vmem:[%s7151_s22 + $0xf0] ss:$8 sps:$4 sm:$0xff]   ;;  %s6420_s22 = scalar_lea.vmem (%p898_p10), %s7842_s18, 256 }
 0x8e0   : > { %p6421_p1 = scmp.ne.s32.totalorder (%p898_p10), %s7842_s18, %s6420_s22 }
 0x8e5   : >> { %v6191_v41 = vpop.eup %6190 }
 0x8e6   : >> { %v1991_v42 = vsel %vm1820_vm3, %v6191_v41, 0.0 }
 0x8e7   : >> { %v6193_v43 = vpop.eup %6192  ;;  %1992 = vadd.xlane.f32.xlu1 %v1991_v42 }
 0x8e8   : >> { %v1994_v47 = vsel %vm1820_vm3, %v6193_v43, 0.0 }
 0x8e9   : >> { %v6195_v48 = vpop.eup %6194  ;;  %1995 = vadd.xlane.f32.xlu0 %v1994_v47 }
 0x8ea   : >> { %v1997_v50 = vsel %vm1827_vm4, %v6195_v48, 0.0 }
 0x8eb   : >> { %1998 = vadd.xlane.f32.xlu1 %v1997_v50 }
 0x974   : >> { %v1993_v38 = vpop.xlane.xlu1 %1992 }
 0x975   : >> { %6196 = vrcp.f32 %v1993_v38  ;;  %v2107_v38 = vrot.slane %v6978_v35, %v7108_v59  ;;  %v6307_v35 = vld [vmem:[#allocation2 + $0x18] sm:$0xff] }
 0x976   : >> { %v1996_v54 = vpop.xlane.xlu0 %1995 }
 0x977   : >> { %6198 = vrcp.f32 %v1996_v54  ;;  %v2111_v54 = vrot.slane %v6975_v34, %v7108_v59 }
 0x978   : >> { %v1999_v52 = vpop.xlane.xlu1 %1998 }
 0x979   : >> { %6200 = vrcp.f32 %v1999_v52 }
 0x97f   : >> { %v6197_v55 = vpop.eup %6196 }
 0x980   : >> { %v2003_v63 = vmul.f32 %v6197_v55, %v6191_v41 }
 0x981   : >> { %v6199_v58 = vpop.eup %6198 }
 0x982   : >> { %v2004_v2 = vmul.f32 %v6199_v58, %v6193_v43 }
 0x983   : >> { %v6201_v3 = vpop.eup %6200 }
 0x984   : >> { %v2005_v62 = vmul.f32 %v6201_v3, %v6195_v48  ;;  %v2006_v4 = vpack.c.bf16 %v2004_v2, %v2003_v63  ;;  %v6304_v3 = vld [vmem:[#allocation2] sm:$0xff] }
 0x986   : >> { %5624 = vmatprep.mubr.msk.bf16.mxu1 %vm1820_vm3, %v2006_v4  ;;  %v2007_v5 = vpack.c.bf16 %v2005_v62, %v2005_v62 }
 0x988   : >> { %5625 = vmatmul.mubr.msk.bf16.vlgmr.msra.gmra.mrb[28].mxu1 %vm1820_vm3, %v2007_v5 }
 0x989   : >> { %2273 = vmatpush1.bf16.msra.mxu1 %v5932_v57  ;;  %v6306_v57 = vld [vmem:[#allocation2 + $0x10] sm:$0xff] }
 0x98a   : >> { %2274 = vmatprep.subr.bf16.mxu1 %v5937_v56 }
 0x98d   : >> { %2275 = vmatpush1.bf16.msra.mxu1 %v5935_v7 }
 0x98e   : >> { %2276 = vmatprep.subr.bf16.mxu1 %v5940_v8 }
 0x991   : >> { %2277 = vmatpush1.bf16.msra.mxu1 %v5938_v9 }
 0x992   : >> { %2278 = vmatprep.subr.bf16.mxu1 %v5943_v11 }
 0x995   : >> { %2279 = vmatpush1.bf16.msra.mxu1 %v5941_v12 }
 0x996   : >> { %2280 = vmatprep.subr.bf16.mxu1 %v5946_v13 }
 0x999   : >> { %2281 = vmatpush1.bf16.msra.mxu1 %v5944_v14  ;;  %v6308_v14 = vld [vmem:[#allocation2 + $0x20] sm:$0x1] }
 0x99a   : >> { %2282 = vmatprep.subr.bf16.mxu1 %v5949_v16 }
 0x99d   : >> { %2283 = vmatpush1.bf16.msra.mxu1 %v5947_v17 }
 0x99e   : >> { %2284 = vmatprep.subr.bf16.mxu1 %v5952_v53  ;;  %v6309_v53 = vld [vmem:[#allocation2 + $0x28] sm:$0x1] }
 0x9a1   : >> { %2285 = vmatpush1.bf16.msra.mxu1 %v5950_v21 }
 0x9a2   : >> { %2286 = vmatprep.subr.bf16.mxu1 %v5955_v6 }
 0x9a5   : >> { %2287 = vmatpush1.bf16.msra.mxu1 %v5953_v10 }
 0x9a6   : >> { %2288 = vmatprep.subr.bf16.mxu1 %v5958_v24 }
 0x9a9   : >> { %2289 = vmatpush1.bf16.msra.mxu1 %v5956_v61  ;;  %v2416_v61 = vld [vmem:[%s7218_s30] sm:$0xff] }
 0x9aa   : >> { %2290 = vmatprep.subr.bf16.mxu1 %v5961_v22  ;;  %v2420_v22 = vld [vmem:[%s7218_s30 + $0x20] sm:$0xff] }
 0x9ad   : >> { %2291 = vmatpush1.bf16.msra.mxu1 %v5959_v23  ;;  %v2417_v23 = vld [vmem:[%s7218_s30 + $0x8] sm:$0xff] }
 0x9ae   : >> { %2292 = vmatprep.subr.bf16.mxu1 %v5964_v18  ;;  %v5249_v18 = vcombine.low %v2416_v61, %v2420_v22 }
 0x9b1   : >> { %2293 = vmatpush1.bf16.msra.mxu1 %v5962_v27  ;;  %v5250_v27 = vcombine.high %v2416_v61, %v2420_v22  ;;  %v2469_v61 = vld [vmem:[%s7218_s30 + $0x1a8] sm:$0xff] }
 0x9b2   : >> { %2294 = vmatprep.subr.bf16.mxu1 %v5967_v25  ;;  %v2421_v25 = vld [vmem:[%s7218_s30 + $0x28] sm:$0xff] }
 0x9b3   : >> { %3228 = vmatprep.subr.bf16.mxu0 %v5250_v27 }
 0x9b4   : >> { %3229 = vmatpush1.bf16.msra.mxu0 %v5249_v18 }
 0x9b5   : >> { %2295 = vmatpush1.bf16.msra.mxu1 %v5965_v26  ;;  %v2424_v26 = vld [vmem:[%s7218_s30 + $0x40] sm:$0xff] }
 0x9b6   : >> { %2296 = vmatprep.subr.bf16.mxu1 %v5970_v28  ;;  %v2428_v28 = vld [vmem:[%s7218_s30 + $0x60] sm:$0xff] }
 0x9b9   : >> { %2297 = vmatpush1.bf16.msra.mxu1 %v5968_v29  ;;  %v5251_v29 = vcombine.low %v2417_v23, %v2421_v25 }
 0x9ba   : >> { %2298 = vmatprep.subr.bf16.mxu1 %v5973_v32  ;;  %v5252_v32 = vcombine.high %v2417_v23, %v2421_v25  ;;  %v2472_v25 = vld [vmem:[%s7218_s30 + $0x1c0] sm:$0xff] }
 0x9bd   : >> { %2299 = vmatpush1.bf16.msra.mxu1 %v5971_v33  ;;  %v5258_v33 = vcombine.high %v2424_v26, %v2428_v28 }
 0x9be   : >> { %2300 = vmatprep.subr.bf16.mxu1 %v5976_v36  ;;  %v2425_v36 = vld [vmem:[%s7218_s30 + $0x48] sm:$0xff] }
 0x9bf   : >> { %3230 = vmatprep.subr.bf16.mxu0 %v5258_v33 }
 0x9c1   : >> { %2301 = vmatpush1.bf16.msra.mxu1 %v5974_v37  ;;  %v2429_v37 = vld [vmem:[%s7218_s30 + $0x68] sm:$0xff] }
 0x9c2   : >> { %2302 = vmatprep.subr.bf16.mxu1 %v5979_v39  ;;  %v2432_v39 = vld [vmem:[%s7218_s30 + $0x80] sm:$0xff] }
 0x9c5   : >> { %2303 = vmatpush1.bf16.msra.mxu1 %v5977_v40  ;;  %v5260_v40 = vcombine.high %v2425_v36, %v2429_v37 }
 0x9c6   : >> { %3279 = vmatprep.subr.bf16.mxu1 %v5252_v32 }
 0xa5b   : >> { %v5626_v41 = vpop.f32.mrb[28].mxu1 }
 0xa5c   : >> { %v2051_v42 = vpop.f32.mrb[29].mxu1  ;;  %v2068_v50 = vpack.c.bf16 %v5626_v41, %v5626_v41  ;;  %v2436_v41 = vld [vmem:[%s7218_s30 + $0xa0] sm:$0xff] }
 0xa5d   : >> { %v5627_v43 = vpop.f32.mrb[30].mxu1 }
 0xa5e   : >> { %v2054_v47 = vpop.f32.mrb[31].mxu1  ;;  %v2437_v43 = vld [vmem:[%s7218_s30 + $0xa8] sm:$0xff] }
 0xa5f   : >> { %v2066_v48 = vpack.c.bf16 %v2054_v47, %v2051_v42  ;;  %v2433_v42 = vld [vmem:[%s7218_s30 + $0x88] sm:$0xff]  ;;  %v5257_v47 = vcombine.low %v2424_v26, %v2428_v28  ;;  %v2476_v26 = vld [vmem:[%s7218_s30 + $0x1e0] sm:$0xff] }
 0xa60   : >> { %v2473_v28 = vld [vmem:[%s7218_s30 + $0x1c8] sm:$0xff] }
 0xa61   : >> { %2304 = vmatprep.mubr.bf16.mxu1 %v2066_v48  ;;  %v5259_v48 = vcombine.low %v2425_v36, %v2429_v37  ;;  %3231 = vmatpush1.bf16.msra.mxu0 %v5257_v47  ;;  %v5306_v36 = vcombine.high %v2472_v25, %v2476_v26 }
 0xa62   : >> { %2305 = vmatmul.mubr.bf16.vlgmr.msra.gmra.mrb[32].mxu1 %v2065_v49  ;;  %v6305_v49 = vld [vmem:[#allocation2 + $0x8] sm:$0xff] }
 0xa63   : >> { %2314 = vmatprep.mubr.bf16.mxu1 %v2068_v50  ;;  %3280 = vmatpush1.bf16.msra.mxu1 %v5251_v29  ;;  %v5266_v50 = vcombine.high %v2432_v39, %v2436_v41  ;;  %v2477_v29 = vld [vmem:[%s7218_s30 + $0x1e8] sm:$0xff] }
 0xa64   : >> { %3281 = vmatprep.subr.bf16.mxu1 %v5260_v40  ;;  %v5308_v37 = vcombine.high %v2473_v28, %v2477_v29  ;;  %v2484_v40 = vld [vmem:[%s7218_s30 + $0x220] sm:$0xff]  ;;  %v5307_v47 = vcombine.low %v2473_v28, %v2477_v29  ;;  %v2497_v28 = vld [vmem:[%s7218_s30 + $0x288] sm:$0xff] }
 0xa65   : >> { %3232 = vmatprep.subr.bf16.mxu0 %v5266_v50 }
 0xa67   : >> { %3282 = vmatpush1.bf16.msra.mxu1 %v5259_v48 }
 0xa6a   : >> { %2315 = vmatmul.mubr.bf16.gmra.mrb[36].mxu1 %v2067_v51  ;;  %v5268_v51 = vcombine.high %v2433_v42, %v2437_v43 }
 0xa6c   : >> { %3283 = vmatprep.subr.bf16.mxu1 %v5268_v51  ;;  %v2488_v51 = vld [vmem:[%s7218_s30 + $0x240] sm:$0xff] }
 0xb35   : >> { %v2306_v52 = vpop.f32.mrb[32].mxu1 }
 0xb36   : >> { %v2307_v55 = vadd.f32 %v2306_v52, %v2107_v38  ;;  %v2308_v58 = vpop.f32.mrb[33].mxu1  ;;  %v2441_v52 = vld [vmem:[%s7218_s30 + $0xc8] sm:$0xff] }
 0xb37   : >> { %v2309_v63 = vadd.f32 %v2308_v58, %v2111_v54  ;;  %v2310_v2 = vpop.f32.mrb[34].mxu1  ;;  %v5265_v58 = vcombine.low %v2432_v39, %v2436_v41  ;;  %v2480_v39 = vld [vmem:[%s7218_s30 + $0x200] sm:$0xff]  ;;  %v2481_v41 = vld [vmem:[%s7218_s30 + $0x208] sm:$0xff] }
 0xb38   : >> { %v7196_v62 = vadd.f32 %v6304_v3, %v2307_v55  ;;  %v2311_v19 = vadd.f32 %v2310_v2, %v2107_v38  ;;  %v2312_v20 = vpop.f32.mrb[35].mxu1  ;;  %v2445_v55 = vld [vmem:[%s7218_s30 + $0xe8] sm:$0xff]  ;;  %v5314_v48 = vcombine.high %v2480_v39, %v2484_v40 }
 0xb39   : >> { %v7198_v4 = vadd.f32 %v6305_v49, %v2309_v63  ;;  %v2313_v15 = vadd.f32 %v2312_v20, %v2111_v54  ;;  %v5267_v63 = vcombine.low %v2433_v42, %v2437_v43  ;;  %v5276_v3 = vcombine.high %v2441_v52, %v2445_v55  ;;  %v2452_v20 = vld [vmem:[%s7218_s30 + $0x120] sm:$0xff]  ;;  %v2449_v49 = vld [vmem:[%s7218_s30 + $0x108] sm:$0xff]  ;;  %3233 = vmatpush1.bf16.msra.mxu0 %v5265_v58 }
 0xb3a   : >> { %v7200_v5 = vadd.f32 %v6306_v57, %v2311_v19  ;;  %v2448_v19 = vld [vmem:[%s7218_s30 + $0x100] sm:$0xff]  ;;  %v2485_v42 = vld [vmem:[%s7218_s30 + $0x228] sm:$0xff]  ;;  %v5305_v43 = vcombine.low %v2472_v25, %v2476_v26 }
 0xb3b   : >> { %v7202_v56 = vadd.f32 %v6307_v35, %v2313_v15  ;;  %v2329_v34 = vadd.f32 %v7198_v4, %v7196_v62  ;;  %v2453_v15 = vld [vmem:[%s7218_s30 + $0x128] sm:$0xff]  ;;  %3284 = vmatpush1.bf16.msra.mxu1 %v5267_v63  ;;  %v5275_v35 = vcombine.low %v2441_v52, %v2445_v55  ;;  %v5316_v50 = vcombine.high %v2481_v41, %v2485_v42  ;;  %v2496_v25 = vld [vmem:[%s7218_s30 + $0x280] sm:$0xff] }
 0xb3c   : >> { %3285 = vmatprep.subr.bf16.mxu1 %v5276_v3  ;;  %v2493_v52 = vld [vmem:[%s7218_s30 + $0x268] sm:$0xff]  ;;  %v5313_v55 = vcombine.low %v2480_v39, %v2484_v40  ;;  %v5315_v58 = vcombine.low %v2481_v41, %v2485_v42  ;;  %v2500_v26 = vld [vmem:[%s7218_s30 + $0x2a0] sm:$0xff] }
 0xb3d   : >> { %v2316_v7 = vpop.f32.mrb[36].mxu1  ;;  %2330 = vadd.xlane.f32.xlu0 %v2329_v34  ;;  %v2332_v8 = vadd.f32 %v7202_v56, %v7200_v5  ;;  %v5282_v34 = vcombine.high %v2448_v19, %v2452_v20  ;;  %v5330_v29 = vcombine.high %v2496_v25, %v2500_v26  ;;  %v2504_v39 = vld [vmem:[%s7218_s30 + $0x2c0] sm:$0xff]  ;;  %v2505_v41 = vld [vmem:[%s7218_s30 + $0x2c8] sm:$0xff] }
 0xb3e   : >> { %v2317_v9 = vadd.f32 %v2316_v7, %v2107_v38  ;;  %v2318_v11 = vpop.f32.mrb[37].mxu1  ;;  %v2440_v38 = vld [vmem:[%s7218_s30 + $0xc0] sm:$0xff]  ;;  %v5284_v7 = vcombine.high %v2449_v49, %v2453_v15 }
 0xb3f   : >> { %v2319_v12 = vadd.f32 %v2318_v11, %v2111_v54  ;;  %v2320_v13 = vpop.f32.mrb[38].mxu1  ;;  %2333 = vadd.xlane.f32.xlu1 %v2332_v8  ;;  %v2444_v54 = vld [vmem:[%s7218_s30 + $0xe0] sm:$0xff]  ;;  %v2457_v11 = vld [vmem:[%s7218_s30 + $0x148] sm:$0xff]  ;;  %3286 = vmatpush1.bf16.msra.mxu1 %v5275_v35 }
 0xb40   : >> { %v7208_v16 = vadd.f32 %v6308_v14, %v2317_v9  ;;  %v2321_v17 = vpop.f32.mrb[39].mxu1  ;;  %v5274_v2 = vcombine.high %v2440_v38, %v2444_v54  ;;  %v5273_v57 = vcombine.low %v2440_v38, %v2444_v54  ;;  %v2456_v8 = vld [vmem:[%s7218_s30 + $0x140] sm:$0xff]  ;;  %v5281_v13 = vcombine.low %v2448_v19, %v2452_v20  ;;  %3287 = vmatprep.subr.bf16.mxu1 %v5284_v7  ;;  %v2489_v54 = vld [vmem:[%s7218_s30 + $0x248] sm:$0xff] }
 0xb41   : >> { %v7210_v21 = vadd.f32 %v6309_v53, %v2319_v12  ;;  %v2460_v9 = vld [vmem:[%s7218_s30 + $0x160] sm:$0xff]  ;;  %v2461_v12 = vld [vmem:[%s7218_s30 + $0x168] sm:$0xff]  ;;  %v5283_v14 = vcombine.low %v2449_v49, %v2453_v15  ;;  %v5323_v19 = vcombine.low %v2489_v54, %v2493_v52 }
 0xb42   : >> { %v2335_v6 = vsel %vm778_vm2, %v7208_v16, 0.0  ;;  %3234 = vmatprep.subr.bf16.mxu0 %v5274_v2  ;;  %v5290_v17 = vcombine.high %v2456_v8, %v2460_v9  ;;  %v5292_v53 = vcombine.high %v2457_v11, %v2461_v12  ;;  %v5289_v22 = vcombine.low %v2456_v8, %v2460_v9  ;;  %v2492_v38 = vld [vmem:[%s7218_s30 + $0x260] sm:$0xff] }
 0xb43   : >> { %v2336_v10 = vsel %vm778_vm2, %v7210_v21, 0.0  ;;  %3235 = vmatpush1.bf16.msra.mxu0 %v5273_v57  ;;  %3288 = vmatpush1.bf16.msra.mxu1 %v5283_v14  ;;  %v5291_v23 = vcombine.low %v2457_v11, %v2461_v12  ;;  %v5322_v63 = vcombine.high %v2488_v51, %v2492_v38  ;;  %v5324_v2 = vcombine.high %v2489_v54, %v2493_v52  ;;  %v2508_v40 = vld [vmem:[%s7218_s30 + $0x2e0] sm:$0xff]  ;;  %v2513_v54 = vld [vmem:[%s7218_s30 + $0x308] sm:$0xff] }
 0xb44   : >> { %v2337_v24 = vadd.f32 %v2336_v10, %v2335_v6  ;;  %3236 = vmatprep.subr.bf16.mxu0 %v5282_v34  ;;  %v2464_v6 = vld [vmem:[%s7218_s30 + $0x180] sm:$0xff]  ;;  %3289 = vmatprep.subr.bf16.mxu1 %v5292_v53  ;;  %v5321_v3 = vcombine.low %v2488_v51, %v2492_v38  ;;  %v5338_v42 = vcombine.high %v2504_v39, %v2508_v40 }
 0xb45   : >> { %v2468_v10 = vld [vmem:[%s7218_s30 + $0x1a0] sm:$0xff] }
 0xb46   : >> { %2338 = vadd.xlane.f32.xlu0 %v2337_v24  ;;  %v2465_v24 = vld [vmem:[%s7218_s30 + $0x188] sm:$0xff]  ;;  %v5298_v18 = vcombine.high %v2464_v6, %v2468_v10  ;;  %v5297_v32 = vcombine.low %v2464_v6, %v2468_v10  ;;  %v2512_v51 = vld [vmem:[%s7218_s30 + $0x300] sm:$0xff] }
 0xb47   : >> { %3237 = vmatpush1.bf16.msra.mxu0 %v5281_v13  ;;  %v5300_v27 = vcombine.high %v2465_v24, %v2469_v61  ;;  %3290 = vmatpush1.bf16.msra.mxu1 %v5291_v23  ;;  %v5299_v33 = vcombine.low %v2465_v24, %v2469_v61  ;;  %v2516_v38 = vld [vmem:[%s7218_s30 + $0x320] sm:$0xff] }
 0xb48   : >> { %3238 = vmatprep.subr.bf16.mxu0 %v5290_v17  ;;  %v5346_v52 = vcombine.high %v2512_v51, %v2516_v38 }
 0xb49   : >> { %3291 = vmatprep.subr.bf16.mxu1 %v5300_v27 }
 0xb4b   : >> { %3239 = vmatpush1.bf16.msra.mxu0 %v5289_v22  ;;  %3292 = vmatpush1.bf16.msra.mxu1 %v5299_v33  ;;  %v5329_v33 = vcombine.low %v2496_v25, %v2500_v26  ;;  %v2541_v26 = vld [vmem:[%s7218_s30 + $0x3e8] sm:$0xff] }
 0xb4c   : >> { %3240 = vmatprep.subr.bf16.mxu0 %v5298_v18  ;;  %3293 = vmatprep.subr.bf16.mxu1 %v5308_v37 }
 0xb4f   : >> { %3241 = vmatpush1.bf16.msra.mxu0 %v5297_v32  ;;  %3294 = vmatpush1.bf16.msra.mxu1 %v5307_v47  ;;  %v2501_v32 = vld [vmem:[%s7218_s30 + $0x2a8] sm:$0xff]  ;;  %v5337_v47 = vcombine.low %v2504_v39, %v2508_v40  ;;  %v2423_v40 = vld [vmem:[%s7218_s30 + $0x38] sm:$0xff] }
 0xb50   : >> { %3242 = vmatprep.subr.bf16.mxu0 %v5306_v36  ;;  %3295 = vmatprep.subr.bf16.mxu1 %v5316_v50  ;;  %v5331_v36 = vcombine.low %v2497_v28, %v2501_v32  ;;  %v5332_v37 = vcombine.high %v2497_v28, %v2501_v32 }
 0xb53   : >> { %3243 = vmatpush1.bf16.msra.mxu0 %v5305_v43  ;;  %3296 = vmatpush1.bf16.msra.mxu1 %v5315_v58  ;;  %v2509_v43 = vld [vmem:[%s7218_s30 + $0x2e8] sm:$0xff]  ;;  %v5345_v58 = vcombine.low %v2512_v51, %v2516_v38 }
 0xb54   : >> { %3244 = vmatprep.subr.bf16.mxu0 %v5314_v48  ;;  %3297 = vmatprep.subr.bf16.mxu1 %v5324_v2  ;;  %v5339_v48 = vcombine.low %v2505_v41, %v2509_v43  ;;  %v5340_v50 = vcombine.high %v2505_v41, %v2509_v43 }
 0xb57   : >> { %3245 = vmatpush1.bf16.msra.mxu0 %v5313_v55  ;;  %3298 = vmatpush1.bf16.msra.mxu1 %v5323_v19  ;;  %v2517_v55 = vld [vmem:[%s7218_s30 + $0x328] sm:$0xff]  ;;  %v2524_v19 = vld [vmem:[%s7218_s30 + $0x360] sm:$0xff] }
 0xb58   : >> { %3246 = vmatprep.subr.bf16.mxu0 %v5322_v63  ;;  %3299 = vmatprep.subr.bf16.mxu1 %v5332_v37  ;;  %v5347_v63 = vcombine.low %v2513_v54, %v2517_v55  ;;  %v5348_v2 = vcombine.high %v2513_v54, %v2517_v55  ;;  %v2419_v37 = vld [vmem:[%s7218_s30 + $0x18] sm:$0xff] }
 0xb59   : >> { %v5256_v43 = vcombine.high %v2419_v37, %v2423_v40 }
 0xb5b   : >> { %3247 = vmatpush1.bf16.msra.mxu0 %v5321_v3  ;;  %3300 = vmatpush1.bf16.msra.mxu1 %v5331_v36  ;;  %v2520_v3 = vld [vmem:[%s7218_s30 + $0x340] sm:$0xff]  ;;  %v2422_v36 = vld [vmem:[%s7218_s30 + $0x30] sm:$0xff] }
 0xb5c   : >> { %3248 = vmatprep.subr.bf16.mxu0 %v5330_v29  ;;  %3301 = vmatprep.subr.bf16.mxu1 %v5340_v50 }
 0xb5f   : >> { %3249 = vmatpush1.bf16.msra.mxu0 %v5329_v33  ;;  %3302 = vmatpush1.bf16.msra.mxu1 %v5339_v48  ;;  %v7317_v33 = vld [vmem:[%s7218_s30 + $0x10] sm:$0xff] }
 0xb60   : >> { %3250 = vmatprep.subr.bf16.mxu0 %v5338_v42  ;;  %3303 = vmatprep.subr.bf16.mxu1 %v5348_v2  ;;  %v5254_v39 = vcombine.high %v7317_v33, %v2422_v36  ;;  %v5253_v41 = vcombine.low %v7317_v33, %v2422_v36  ;;  %v5255_v42 = vcombine.low %v2419_v37, %v2423_v40  ;;  %v2438_v37 = vld [vmem:[%s7218_s30 + $0xb0] sm:$0xff]  ;;  %v2439_v40 = vld [vmem:[%s7218_s30 + $0xb8] sm:$0xff] }
 0xb63   : >> { %3251 = vmatpush1.bf16.msra.mxu0 %v5337_v47  ;;  %3304 = vmatpush1.bf16.msra.mxu1 %v5347_v63  ;;  %v6310_v63 = vld [vmem:[%s6972_s28 + $0x8] sm:$0x3f] }
 0xb64   : >> { %3252 = vmatprep.subr.bf16.mxu0 %v5346_v52  ;;  %v2388_v2 = vrot.slane %v6310_v63, %v7096_v30 }
 0xb67   : >> { %3253 = vmatpush1.bf16.msra.mxu0 %v5345_v58 }
 0xbca   : >> { %v2331_v20 = vpop.xlane.xlu0 %2330 }
 0xbcb   : >> { %v2340_v49 = vmul.f32 0.00390625, %v2331_v20  ;;  %v2521_v20 = vld [vmem:[%s7218_s30 + $0x348] sm:$0xff] }
 0xbcc   : >> { %v2334_v15 = vpop.xlane.xlu1 %2333 }
 0xbcd   : >> { %v7261_v57 = vsub.f32 %v7196_v62, %v2340_v49  ;;  %v7264_v35 = vsub.f32 %v7198_v4, %v2340_v49  ;;  %v2341_v34 = vmul.f32 0.00390625, %v2334_v15  ;;  %v5354_v49 = vcombine.high %v2520_v3, %v2524_v19  ;;  %v2525_v15 = vld [vmem:[%s7218_s30 + $0x368] sm:$0xff] }
 0xbcf   : >> { %v7267_v7 = vsub.f32 %v7200_v5, %v2341_v34  ;;  %v7270_v8 = vsub.f32 %v7202_v56, %v2341_v34  ;;  %v2349_v9 = vmul.f32 %v7261_v57, %v7261_v57  ;;  %v2350_v11 = vmul.f32 %v7264_v35, %v7264_v35  ;;  %3254 = vmatprep.subr.bf16.mxu0 %v5354_v49 }
 0xbd0   : >> { %v5353_v34 = vcombine.low %v2520_v3, %v2524_v19  ;;  %v6311_v3 = vld [vmem:[%s6972_s28] sm:$0x3f] }
 0xbd1   : >> { %v2355_v12 = vadd.f32 %v2350_v11, %v2349_v9  ;;  %v2351_v13 = vmul.f32 %v7267_v7, %v7267_v7  ;;  %v2352_v14 = vmul.f32 %v7270_v8, %v7270_v8  ;;  %v5355_v9 = vcombine.low %v2521_v20, %v2525_v15 }
 0xbd2   : >> { %v5356_v11 = vcombine.high %v2521_v20, %v2525_v15  ;;  %3255 = vmatpush1.bf16.msra.mxu0 %v5353_v34  ;;  %v2384_v19 = vrot.slane %v6311_v3, %v7096_v30 }
 0xbd3   : >> { %2356 = vadd.xlane.f32.xlu1 %v2355_v12  ;;  %v2339_v17 = vpop.xlane.xlu0 %2338  ;;  %v2358_v53 = vadd.f32 %v2352_v14, %v2351_v13  ;;  %v2528_v12 = vld [vmem:[%s7218_s30 + $0x380] sm:$0xff]  ;;  %v2529_v14 = vld [vmem:[%s7218_s30 + $0x388] sm:$0xff] }
 0xbd4   : >> { %v2342_v6 = vmul.f32 0.00390625, %v2339_v17  ;;  %3305 = vmatprep.subr.bf16.mxu1 %v5356_v11  ;;  %v2532_v13 = vld [vmem:[%s7218_s30 + $0x3a0] sm:$0xff]  ;;  %v2398_v11 = vrot.slane %v6311_v3, %v7099_v31  ;;  %v2450_v3 = vld [vmem:[%s7218_s30 + $0x110] sm:$0xff] }
 0xbd5   : >> { %2359 = vadd.xlane.f32.xlu0 %v2358_v53  ;;  %3306 = vmatpush1.bf16.msra.mxu1 %v5355_v9  ;;  %v5362_v17 = vcombine.high %v2528_v12, %v2532_v13  ;;  %v2533_v53 = vld [vmem:[%s7218_s30 + $0x3a8] sm:$0xff]  ;;  %v2402_v9 = vrot.slane %v6310_v63, %v7099_v31  ;;  %v2447_v63 = vld [vmem:[%s7218_s30 + $0xf8] sm:$0xff] }
 0xbd6   : >> { %v7281_v10 = vsub.f32 %v7208_v16, %v2342_v6  ;;  %v7284_v24 = vsub.f32 %v7210_v21, %v2342_v6  ;;  %v5361_v6 = vcombine.low %v2528_v12, %v2532_v13 }
 0xbd7   : >> { %3256 = vmatprep.subr.bf16.mxu0 %v5362_v17 }
 0xbd8   : >> { %v2353_v61 = vmul.f32 %v7281_v10, %v7281_v10  ;;  %v2354_v22 = vmul.f32 %v7284_v24, %v7284_v24  ;;  %3257 = vmatpush1.bf16.msra.mxu0 %v5361_v6 }
 0xbda   : >> { %v2361_v23 = vsel %vm778_vm2, %v2353_v61, 0.0  ;;  %v2362_v18 = vsel %vm778_vm2, %v2354_v22, 0.0  ;;  %v5363_v61 = vcombine.low %v2529_v14, %v2533_v53  ;;  %v5364_v22 = vcombine.high %v2529_v14, %v2533_v53 }
 0xbdb   : >> { %v2363_v27 = vadd.f32 %v2362_v18, %v2361_v23  ;;  %v2536_v23 = vld [vmem:[%s7218_s30 + $0x3c0] sm:$0xff] }
 0xbdc   : >> { %3307 = vmatprep.subr.bf16.mxu1 %v5364_v22  ;;  %v2540_v18 = vld [vmem:[%s7218_s30 + $0x3e0] sm:$0xff] }
 0xbdd   : >> { %2364 = vadd.xlane.f32.xlu1 %v2363_v27  ;;  %v2537_v27 = vld [vmem:[%s7218_s30 + $0x3c8] sm:$0xff]  ;;  %3308 = vmatpush1.bf16.msra.mxu1 %v5363_v61  ;;  %v5370_v25 = vcombine.high %v2536_v23, %v2540_v18  ;;  %v5369_v28 = vcombine.low %v2536_v23, %v2540_v18  ;;  %v2430_v18 = vld [vmem:[%s7218_s30 + $0x70] sm:$0xff] }
 0xbde   : >> { %v5371_v29 = vcombine.low %v2537_v27, %v2541_v26  ;;  %v5372_v32 = vcombine.high %v2537_v27, %v2541_v26  ;;  %v2427_v27 = vld [vmem:[%s7218_s30 + $0x58] sm:$0xff] }
 0xbdf   : >> { %3258 = vmatprep.subr.bf16.mxu0 %v5370_v25  ;;  %v2431_v25 = vld [vmem:[%s7218_s30 + $0x78] sm:$0xff] }
 0xbe0   : >> { %3309 = vmatprep.subr.bf16.mxu1 %v5372_v32  ;;  %3259 = vmatpush1.bf16.msra.mxu0 %v5369_v28  ;;  %v2434_v32 = vld [vmem:[%s7218_s30 + $0x90] sm:$0xff] }
 0xbe1   : >> { %3310 = vmatpush1.bf16.msra.mxu1 %v5371_v29  ;;  %3330 = vmatprep.subr.bf16.mxu0 %v5254_v39  ;;  %v5264_v29 = vcombine.high %v2427_v27, %v2431_v25  ;;  %v2435_v39 = vld [vmem:[%s7218_s30 + $0x98] sm:$0xff] }
 0xbe2   : >> { %3381 = vmatprep.subr.bf16.mxu1 %v5256_v43 }
 0xc60   : >> { %v2357_v47 = vpop.xlane.xlu1 %2356 }
 0xc61   : >> { %v2366_v48 = vmul.f32 0.00390625, %v2357_v47  ;;  %v5263_v47 = vcombine.low %v2427_v27, %v2431_v25  ;;  %v2467_v27 = vld [vmem:[%s7218_s30 + $0x198] sm:$0xff] }
 0xc62   : >> { %v2360_v50 = vpop.xlane.xlu0 %2359  ;;  %v2471_v25 = vld [vmem:[%s7218_s30 + $0x1b8] sm:$0xff] }
 0xc63   : >> { %v2369_v51 = vadd.f32 1e-05, %v2366_v48  ;;  %v2367_v38 = vmul.f32 0.00390625, %v2360_v50  ;;  %v5272_v50 = vcombine.high %v2435_v39, %v2439_v40 }
 0xc65   : >> { %6202 = vrsqrt.f32 %v2369_v51  ;;  %v2370_v54 = vadd.f32 1e-05, %v2367_v38 }
 0xc67   : >> { %6204 = vrsqrt.f32 %v2370_v54  ;;  %v2442_v54 = vld [vmem:[%s7218_s30 + $0xd0] sm:$0xff] }
 0xc6a   : >> { %v2365_v52 = vpop.xlane.xlu1 %2364 }
 0xc6b   : >> { %v2368_v55 = vmul.f32 0.00390625, %v2365_v52  ;;  %v5269_v52 = vcombine.low %v2434_v32, %v2438_v37 }
 0xc6d   : >> { %v2371_v58 = vadd.f32 1e-05, %v2368_v55  ;;  %v2446_v55 = vld [vmem:[%s7218_s30 + $0xf0] sm:$0xff] }
 0xc6f   : >> { %v6203_v20 = vpop.eup %6202  ;;  %6206 = vrsqrt.f32 %v2371_v58  ;;  %v2443_v58 = vld [vmem:[%s7218_s30 + $0xd8] sm:$0xff] }
 0xc70   : >> { %v2375_v49 = vmul.f32 %v6203_v20, %v7261_v57  ;;  %v2376_v15 = vmul.f32 %v6203_v20, %v7264_v35  ;;  %v2426_v57 = vld [vmem:[%s7218_s30 + $0x50] sm:$0xff]  ;;  %v5280_v20 = vcombine.high %v2443_v58, %v2447_v63 }
 0xc71   : >> { %v6205_v34 = vpop.eup %6204  ;;  %v5262_v28 = vcombine.high %v2426_v57, %v2430_v18  ;;  %v5261_v43 = vcombine.low %v2426_v57, %v2430_v18  ;;  %v2470_v18 = vld [vmem:[%s7218_s30 + $0x1b0] sm:$0xff] }
 0xc72   : >> { %v2377_v12 = vmul.f32 %v6205_v34, %v7267_v7  ;;  %v2378_v13 = vmul.f32 %v6205_v34, %v7270_v8  ;;  %v2390_v14 = vmul.f32 %v2388_v2, %v2376_v15  ;;  %v2389_v17 = vmul.f32 %v2384_v19, %v2375_v49  ;;  %v2454_v49 = vld [vmem:[%s7218_s30 + $0x130] sm:$0xff]  ;;  %v2451_v15 = vld [vmem:[%s7218_s30 + $0x118] sm:$0xff] }
 0xc73   : >> { %v2455_v34 = vld [vmem:[%s7218_s30 + $0x138] sm:$0xff]  ;;  %v5285_v57 = vcombine.low %v2450_v3, %v2454_v49 }
 0xc74   : >> { %v2392_v53 = vmul.f32 %v2388_v2, %v2378_v13  ;;  %v2391_v6 = vmul.f32 %v2384_v19, %v2377_v12  ;;  %v2404_v61 = vadd.f32 %v2402_v9, %v2390_v14  ;;  %v2403_v35 = vadd.f32 %v2398_v11, %v2389_v17  ;;  %v2458_v14 = vld [vmem:[%s7218_s30 + $0x150] sm:$0xff] }
 0xc75   : >> { %v5286_v12 = vcombine.high %v2450_v3, %v2454_v49  ;;  %v5288_v13 = vcombine.high %v2451_v15, %v2455_v34  ;;  %v2462_v17 = vld [vmem:[%s7218_s30 + $0x170] sm:$0xff] }
 0xc76   : >> { %v2406_v22 = vadd.f32 %v2402_v9, %v2392_v53  ;;  %v2405_v23 = vadd.f32 %v2398_v11, %v2391_v6  ;;  %v2459_v53 = vld [vmem:[%s7218_s30 + $0x158] sm:$0xff] }
 0xc77   : >> { %v2463_v6 = vld [vmem:[%s7218_s30 + $0x178] sm:$0xff] }
 0xc78   : >> { %v2410_v26 = vpack.c.bf16 %v2406_v22, %v2404_v61  ;;  %v7338_v7 = vpack.c.bf16 %v2405_v23, %v2403_v35  ;;  %v5287_v61 = vcombine.low %v2451_v15, %v2455_v34  ;;  %v5294_v22 = vcombine.high %v2458_v14, %v2462_v17  ;;  %v2466_v23 = vld [vmem:[%s7218_s30 + $0x190] sm:$0xff] }
 0xc79   : >> { %v6207_v8 = vpop.eup %6206  ;;  %v5296_v35 = vcombine.high %v2459_v53, %v2463_v6  ;;  %v2498_v15 = vld [vmem:[%s7218_s30 + $0x290] sm:$0xff] }
 0xc7a   : >> { %v2379_v33 = vmul.f32 %v6207_v8, %v7281_v10  ;;  %v2380_v36 = vmul.f32 %v6207_v8, %v7284_v24  ;;  %3260 = vmatprep.mubr.bf16.mxu0 %v2410_v26  ;;  %3311 = vmatprep.mubr.bf16.mxu1 %v2410_v26  ;;  %v5270_v24 = vcombine.high %v2434_v32, %v2438_v37  ;;  %v2474_v32 = vld [vmem:[%s7218_s30 + $0x1d0] sm:$0xff]  ;;  %v2479_v37 = vld [vmem:[%s7218_s30 + $0x1f8] sm:$0xff] }
 0xc7b   : >> { %3261 = vmatmul.mubr.bf16.vlgmr.msra.gmra.mrb[8].mxu0 %v7338_v7  ;;  %3312 = vmatmul.mubr.bf16.vlgmr.msra.gmra.mrb[40].mxu1 %v7338_v7  ;;  %v5295_v8 = vcombine.low %v2459_v53, %v2463_v6  ;;  %v2502_v34 = vld [vmem:[%s7218_s30 + $0x2b0] sm:$0xff] }
 0xc7c   : >> { %3331 = vmatpush1.bf16.msra.mxu0 %v5253_v41  ;;  %3382 = vmatpush1.bf16.msra.mxu1 %v5255_v42  ;;  %v2394_v10 = vmul.f32 %v2388_v2, %v2380_v36  ;;  %v2393_v48 = vmul.f32 %v2384_v19, %v2379_v33  ;;  %v5271_v42 = vcombine.low %v2435_v39, %v2439_v40  ;;  %v2478_v33 = vld [vmem:[%s7218_s30 + $0x1f0] sm:$0xff]  ;;  %v2475_v36 = vld [vmem:[%s7218_s30 + $0x1d8] sm:$0xff] }
 0xc7d   : >> { %3332 = vmatprep.subr.bf16.mxu0 %v5262_v28  ;;  %3383 = vmatprep.subr.bf16.mxu1 %v5264_v29  ;;  %v5278_v19 = vcombine.high %v2442_v54, %v2446_v55  ;;  %v5302_v28 = vcombine.high %v2466_v23, %v2470_v18  ;;  %v5304_v29 = vcombine.high %v2467_v27, %v2471_v25  ;;  %v2506_v53 = vld [vmem:[%s7218_s30 + $0x2d0] sm:$0xff] }
 0xc7e   : >> { %v2408_v51 = vadd.f32 %v2402_v9, %v2394_v10  ;;  %v2407_v38 = vadd.f32 %v2398_v11, %v2393_v48  ;;  %v5277_v9 = vcombine.low %v2442_v54, %v2446_v55  ;;  %v5279_v11 = vcombine.low %v2443_v58, %v2447_v63  ;;  %v2482_v10 = vld [vmem:[%s7218_s30 + $0x210] sm:$0xff]  ;;  %v2491_v63 = vld [vmem:[%s7218_s30 + $0x258] sm:$0xff] }
 0xc7f   : >> { %v5301_v39 = vcombine.low %v2466_v23, %v2470_v18  ;;  %v5303_v40 = vcombine.low %v2467_v27, %v2471_v25  ;;  %v2486_v48 = vld [vmem:[%s7218_s30 + $0x230] sm:$0xff] }
 0xc80   : >> { %3333 = vmatpush1.bf16.msra.mxu0 %v5261_v43  ;;  %3384 = vmatpush1.bf16.msra.mxu1 %v5263_v47  ;;  %v7352_v41 = vpack.c.bf16 %v2408_v51, %v2408_v51  ;;  %v7354_v2 = vpack.c.bf16 %v2407_v38, %v2407_v38  ;;  %v5310_v43 = vcombine.high %v2474_v32, %v2478_v33  ;;  %v2490_v55 = vld [vmem:[%s7218_s30 + $0x250] sm:$0xff] }
 0xc81   : >> { %3334 = vmatprep.subr.bf16.mxu0 %v5270_v24  ;;  %3385 = vmatprep.subr.bf16.mxu1 %v5272_v50  ;;  %v5312_v47 = vcombine.high %v2475_v36, %v2479_v37  ;;  %v2483_v24 = vld [vmem:[%s7218_s30 + $0x218] sm:$0xff]  ;;  %v5309_v51 = vcombine.low %v2474_v32, %v2478_v33  ;;  %v5311_v38 = vcombine.low %v2475_v36, %v2479_v37  ;;  %v2494_v58 = vld [vmem:[%s7218_s30 + $0x270] sm:$0xff] }
 0xc82   : >> { %3270 = vmatprep.mubr.bf16.mxu0 %v7352_v41  ;;  %3321 = vmatprep.mubr.bf16.mxu1 %v7352_v41  ;;  %v2487_v50 = vld [vmem:[%s7218_s30 + $0x238] sm:$0xff]  ;;  %v5318_v54 = vcombine.high %v2482_v10, %v2486_v48  ;;  %v5317_v3 = vcombine.low %v2482_v10, %v2486_v48  ;;  %v2510_v6 = vld [vmem:[%s7218_s30 + $0x2f0] sm:$0xff] }
 0xc83   : >> { %3271 = vmatmul.mubr.bf16.gmra.mrb[12].mxu0 %v7354_v2  ;;  %3322 = vmatmul.mubr.bf16.gmra.mrb[44].mxu1 %v7354_v2  ;;  %v5342_v23 = vcombine.high %v2506_v53, %v2510_v6  ;;  %v2514_v27 = vld [vmem:[%s7218_s30 + $0x310] sm:$0xff] }
 0xc84   : >> { %3335 = vmatpush1.bf16.msra.mxu0 %v5269_v52  ;;  %3386 = vmatpush1.bf16.msra.mxu1 %v5271_v42  ;;  %v5320_v52 = vcombine.high %v2483_v24, %v2487_v50  ;;  %v2495_v42 = vld [vmem:[%s7218_s30 + $0x278] sm:$0xff]  ;;  %v2518_v25 = vld [vmem:[%s7218_s30 + $0x330] sm:$0xff] }
 0xc85   : >> { %3362 = vmatprep.mubr.bf16.mxu0 %v2410_v26  ;;  %3413 = vmatprep.mubr.bf16.mxu1 %v2410_v26  ;;  %v5293_v26 = vcombine.low %v2458_v14, %v2462_v17  ;;  %v5328_v49 = vcombine.high %v2491_v63, %v2495_v42  ;;  %v5334_v14 = vcombine.high %v2498_v15, %v2502_v34  ;;  %v2522_v36 = vld [vmem:[%s7218_s30 + $0x350] sm:$0xff] }
 0xc86   : >> { %3336 = vmatprep.subr.bf16.mxu0 %v5278_v19  ;;  %3387 = vmatprep.subr.bf16.mxu1 %v5280_v20  ;;  %v5319_v19 = vcombine.low %v2483_v24, %v2487_v50  ;;  %v5326_v20 = vcombine.high %v2490_v55, %v2494_v58  ;;  %v5350_v32 = vcombine.high %v2514_v27, %v2518_v25  ;;  %v2526_v37 = vld [vmem:[%s7218_s30 + $0x370] sm:$0xff] }
 0xc87   : >> { %v5358_v10 = vcombine.high %v2522_v36, %v2526_v37  ;;  %v2530_v24 = vld [vmem:[%s7218_s30 + $0x390] sm:$0xff] }
 0xc88   : >> { %3337 = vmatpush1.bf16.msra.mxu0 %v5277_v9  ;;  %3388 = vmatpush1.bf16.msra.mxu1 %v5279_v11  ;;  %v2499_v9 = vld [vmem:[%s7218_s30 + $0x298] sm:$0xff]  ;;  %v2534_v50 = vld [vmem:[%s7218_s30 + $0x3b0] sm:$0xff] }
 0xc89   : >> { %3338 = vmatprep.subr.bf16.mxu0 %v5286_v12  ;;  %3389 = vmatprep.subr.bf16.mxu1 %v5288_v13  ;;  %v2503_v11 = vld [vmem:[%s7218_s30 + $0x2b8] sm:$0xff]  ;;  %v5325_v12 = vcombine.low %v2490_v55, %v2494_v58  ;;  %v5327_v13 = vcombine.low %v2491_v63, %v2495_v42  ;;  %v5366_v55 = vcombine.high %v2530_v24, %v2534_v50  ;;  %v2538_v63 = vld [vmem:[%s7218_s30 + $0x3d0] sm:$0xff] }
 0xc8a   : >> { %v5336_v17 = vcombine.high %v2499_v9, %v2503_v11  ;;  %v2542_v42 = vld [vmem:[%s7218_s30 + $0x3f0] sm:$0xff] }
 0xc8c   : >> { %3339 = vmatpush1.bf16.msra.mxu0 %v5285_v57  ;;  %3390 = vmatpush1.bf16.msra.mxu1 %v5287_v61  ;;  %v2507_v57 = vld [vmem:[%s7218_s30 + $0x2d8] sm:$0xff] }
 0xc8d   : >> { %3340 = vmatprep.subr.bf16.mxu0 %v5294_v22  ;;  %3391 = vmatprep.subr.bf16.mxu1 %v5296_v35  ;;  %v2511_v61 = vld [vmem:[%s7218_s30 + $0x2f8] sm:$0xff]  ;;  %v5333_v22 = vcombine.low %v2498_v15, %v2502_v34  ;;  %v5335_v35 = vcombine.low %v2499_v9, %v2503_v11  ;;  %v5374_v15 = vcombine.high %v2538_v63, %v2542_v42 }
 0xc8e   : >> { %v5344_v18 = vcombine.high %v2507_v57, %v2511_v61  ;;  %v5373_v9 = vcombine.low %v2538_v63, %v2542_v42 }
 0xc90   : >> { %3341 = vmatpush1.bf16.msra.mxu0 %v5293_v26  ;;  %3392 = vmatpush1.bf16.msra.mxu1 %v5295_v8  ;;  %v2515_v26 = vld [vmem:[%s7218_s30 + $0x318] sm:$0xff] }
 0xc91   : >> { %3342 = vmatprep.subr.bf16.mxu0 %v5302_v28  ;;  %3393 = vmatprep.subr.bf16.mxu1 %v5304_v29  ;;  %v2519_v8 = vld [vmem:[%s7218_s30 + $0x338] sm:$0xff]  ;;  %v5341_v28 = vcombine.low %v2506_v53, %v2510_v6  ;;  %v5343_v29 = vcombine.low %v2507_v57, %v2511_v61  ;;  %v5988_v53 = vld [vmem:[%s6905_s15 + $0x24] ss:$8 sps:$4 sm:$0xff]   ;;  %v5986_v6 = vld [vmem:[%s6905_s15 + $0x20] ss:$8 sps:$4 sm:$0xff]  }
 0xc92   : >> { %v5352_v33 = vcombine.high %v2515_v26, %v2519_v8  ;;  %v5991_v57 = vld [vmem:[%s6905_s15 + $0x34] ss:$8 sps:$4 sm:$0xff]   ;;  %v5992_v61 = vld [vmem:[%s6905_s15 + $0x40] ss:$8 sps:$4 sm:$0xff]  }
 0xc94   : >> { %3343 = vmatpush1.bf16.msra.mxu0 %v5301_v39  ;;  %3394 = vmatpush1.bf16.msra.mxu1 %v5303_v40  ;;  %v2523_v39 = vld [vmem:[%s7218_s30 + $0x358] sm:$0xff] }
 0xc95   : >> { %3344 = vmatprep.subr.bf16.mxu0 %v5310_v43  ;;  %3395 = vmatprep.subr.bf16.mxu1 %v5312_v47  ;;  %v2527_v40 = vld [vmem:[%s7218_s30 + $0x378] sm:$0xff]  ;;  %v5349_v43 = vcombine.low %v2514_v27, %v2518_v25  ;;  %v5351_v47 = vcombine.low %v2515_v26, %v2519_v8  ;;  %v6006_v25 = vld [vmem:[%s6905_s15 + $0x84] ss:$8 sps:$4 sm:$0xff]   ;;  %v6004_v26 = vld [vmem:[%s6905_s15 + $0x80] ss:$8 sps:$4 sm:$0xff]  }
 0xc96   : >> { %v5360_v48 = vcombine.high %v2523_v39, %v2527_v40  ;;  %v6001_v27 = vld [vmem:[%s6905_s15 + $0x70] ss:$8 sps:$4 sm:$0xff]   ;;  %v6009_v8 = vld [vmem:[%s6905_s15 + $0x94] ss:$8 sps:$4 sm:$0xff]  }
 0xc98   : >> { %3345 = vmatpush1.bf16.msra.mxu0 %v5309_v51  ;;  %3396 = vmatpush1.bf16.msra.mxu1 %v5311_v38  ;;  %v2531_v51 = vld [vmem:[%s7218_s30 + $0x398] sm:$0xff] }
 0xc99   : >> { %3346 = vmatprep.subr.bf16.mxu0 %v5318_v54  ;;  %3397 = vmatprep.subr.bf16.mxu1 %v5320_v52  ;;  %v2535_v38 = vld [vmem:[%s7218_s30 + $0x3b8] sm:$0xff]  ;;  %v5357_v54 = vcombine.low %v2522_v36, %v2526_v37  ;;  %v5359_v52 = vcombine.low %v2523_v39, %v2527_v40  ;;  %v6018_v37 = vld [vmem:[%s6905_s15 + $0xc4] ss:$8 sps:$4 sm:$0xff]   ;;  %v6016_v39 = vld [vmem:[%s6905_s15 + $0xc0] ss:$8 sps:$4 sm:$0xff]  }
 0xc9a   : >> { %v5368_v58 = vcombine.high %v2531_v51, %v2535_v38  ;;  %v6013_v36 = vld [vmem:[%s6905_s15 + $0xb0] ss:$8 sps:$4 sm:$0xff]   ;;  %v6021_v40 = vld [vmem:[%s6905_s15 + $0xd4] ss:$8 sps:$4 sm:$0xff]  }
 0xc9c   : >> { %3347 = vmatpush1.bf16.msra.mxu0 %v5317_v3  ;;  %3398 = vmatpush1.bf16.msra.mxu1 %v5319_v19  ;;  %v2539_v3 = vld [vmem:[%s7218_s30 + $0x3d8] sm:$0xff] }
 0xc9d   : >> { %3348 = vmatprep.subr.bf16.mxu0 %v5326_v20  ;;  %3399 = vmatprep.subr.bf16.mxu1 %v5328_v49  ;;  %v2543_v19 = vld [vmem:[%s7218_s30 + $0x3f8] sm:$0xff]  ;;  %v5365_v20 = vcombine.low %v2530_v24, %v2534_v50  ;;  %v5367_v49 = vcombine.low %v2531_v51, %v2535_v38  ;;  %v6030_v50 = vld [vmem:[%s6905_s15 + $0x104] ss:$8 sps:$4 sm:$0xff]   ;;  %s6510_s30 = smov (%p898_p10), [#allocation9]  }
 0xc9e   : >> { %v5376_v34 = vcombine.high %v2539_v3, %v2543_v19  ;;  %v5375_v11 = vcombine.low %v2539_v3, %v2543_v19  ;;  %v6025_v24 = vld [vmem:[%s6905_s15 + $0xf0] ss:$8 sps:$4 sm:$0xff]   ;;  %v7451_v51 = vld [vmem:[%s2545_s7] sm:$0xff]  ;;  %s6424_s24 = sshll.u32 (%p898_p10), %s6510_s30, 4  ;;  %s6425_s24 = int_to_ptr.vmem [resolvable:$false] %s6424_s24 }
 0xc9f   : >> { %v2551_v38 = vrot.slane %v7451_v51, %v6876_v45  ;;  %s6426_s13 = scalar_lea.vmem (%p898_p10), %s6425_s24, 512  ;;  %p6427_p7 = scmp.lt.s32.totalorder (%p898_p10), %s7842_s18, %s6425_s24 }
 0xca0   : >> { %3349 = vmatpush1.bf16.msra.mxu0 %v5325_v12  ;;  %3400 = vmatpush1.bf16.msra.mxu1 %v5327_v13  ;;  %v5982_v12 = vld [vmem:[%s6905_s15 + $0x4] ss:$8 sps:$4 sm:$0xff]   ;;  %v5980_v13 = vld [vmem:[%s6905_s15] ss:$8 sps:$4 sm:$0xff]   ;;  %p6428_p8 = scmp.lt.s32.totalorder (%p898_p10), %s6426_s13, %s6420_s22 }
 0xca1   : >> { %3350 = vmatprep.subr.bf16.mxu0 %v5334_v14  ;;  %3401 = vmatprep.subr.bf16.mxu1 %v5336_v17  ;;  %v5985_v14 = vld [vmem:[%s6905_s15 + $0x14] ss:$8 sps:$4 sm:$0xff]   ;;  %v5983_v17 = vld [vmem:[%s6905_s15 + $0x10] ss:$8 sps:$4 sm:$0xff]  }
 0xca2   : > { %p6429_p11 = por (%p898_p10), %p6428_p8, %p6427_p7 }
 0xca4   : >> { %3351 = vmatpush1.bf16.msra.mxu0 %v5333_v22  ;;  %3402 = vmatpush1.bf16.msra.mxu1 %v5335_v35  ;;  %v5997_v22 = vld [vmem:[%s6905_s15 + $0x54] ss:$8 sps:$4 sm:$0xff]   ;;  %v5995_v35 = vld [vmem:[%s6905_s15 + $0x50] ss:$8 sps:$4 sm:$0xff]  }
 0xca5   : >> { %3352 = vmatprep.subr.bf16.mxu0 %v5342_v23  ;;  %3403 = vmatprep.subr.bf16.mxu1 %v5344_v18  ;;  %v6000_v23 = vld [vmem:[%s6905_s15 + $0x64] ss:$8 sps:$4 sm:$0xff]   ;;  %v6003_v18 = vld [vmem:[%s6905_s15 + $0x74] ss:$8 sps:$4 sm:$0xff]  }
 0xca8   : >> { %3353 = vmatpush1.bf16.msra.mxu0 %v5341_v28  ;;  %3404 = vmatpush1.bf16.msra.mxu1 %v5343_v29  ;;  %v6007_v28 = vld [vmem:[%s6905_s15 + $0x90] ss:$8 sps:$4 sm:$0xff]   ;;  %v6012_v29 = vld [vmem:[%s6905_s15 + $0xa4] ss:$8 sps:$4 sm:$0xff]  }
 0xca9   : >> { %3354 = vmatprep.subr.bf16.mxu0 %v5350_v32  ;;  %3405 = vmatprep.subr.bf16.mxu1 %v5352_v33  ;;  %v6010_v32 = vld [vmem:[%s6905_s15 + $0xa0] ss:$8 sps:$4 sm:$0xff]   ;;  %v6015_v33 = vld [vmem:[%s6905_s15 + $0xb4] ss:$8 sps:$4 sm:$0xff]  }
 0xcac   : >> { %3355 = vmatpush1.bf16.msra.mxu0 %v5349_v43  ;;  %3406 = vmatpush1.bf16.msra.mxu1 %v5351_v47  ;;  %v6019_v43 = vld [vmem:[%s6905_s15 + $0xd0] ss:$8 sps:$4 sm:$0xff]   ;;  %v6024_v47 = vld [vmem:[%s6905_s15 + $0xe4] ss:$8 sps:$4 sm:$0xff]  }
 0xcad   : >> { %3356 = vmatprep.subr.bf16.mxu0 %v5358_v10  ;;  %3407 = vmatprep.subr.bf16.mxu1 %v5360_v48  ;;  %v6022_v10 = vld [vmem:[%s6905_s15 + $0xe0] ss:$8 sps:$4 sm:$0xff]   ;;  %v6027_v48 = vld [vmem:[%s6905_s15 + $0xf4] ss:$8 sps:$4 sm:$0xff]  }
 0xcb0   : >> { %3357 = vmatpush1.bf16.msra.mxu0 %v5357_v54  ;;  %3408 = vmatpush1.bf16.msra.mxu1 %v5359_v52  ;;  %v7457_v54 = vrot.slane %v7451_v51, %v7096_v30  ;;  %v2555_v52 = vrot.slane %v7451_v51, %v6879_v46 }
 0xcb1   : >> { %3358 = vmatprep.subr.bf16.mxu0 %v5366_v55  ;;  %3409 = vmatprep.subr.bf16.mxu1 %v5368_v58  ;;  %v7463_v55 = vrot.slane %v7451_v51, %v7099_v31 }
 0xcb4   : >> { %3359 = vmatpush1.bf16.msra.mxu0 %v5365_v20  ;;  %3410 = vmatpush1.bf16.msra.mxu1 %v5367_v49 }
 0xcb5   : >> { %3360 = vmatprep.subr.bf16.mxu0 %v5374_v15  ;;  %3411 = vmatprep.subr.bf16.mxu1 %v5376_v34 }
 0xcb8   : >> { %3361 = vmatpush1.bf16.msra.mxu0 %v5373_v9  ;;  %3412 = vmatpush1.bf16.msra.mxu1 %v5375_v11 }
 0xcb9   : >> { %4418 = vmatprep.subr.bf16.mxu0 %v5982_v12 }
 0xcbb   : >> { %3363 = vmatmul.mubr.bf16.vlgmr.msra.gmra.mrb[16].mxu0 %v7338_v7  ;;  %3414 = vmatmul.mubr.bf16.vlgmr.msra.gmra.mrb[48].mxu1 %v7338_v7  ;;  %v5989_v7 = vld [vmem:[%s6905_s15 + $0x30] ss:$8 sps:$4 sm:$0xff]  }
 0xcbc   : >> { %3372 = vmatprep.mubr.bf16.mxu0 %v7352_v41  ;;  %3423 = vmatprep.mubr.bf16.mxu1 %v7352_v41  ;;  %v5994_v41 = vld [vmem:[%s6905_s15 + $0x44] ss:$8 sps:$4 sm:$0xff]  }
 0xcbd   : >> { %4419 = vmatpush1.bf16.msra.mxu0 %v5980_v13 }
 0xcbe   : >> { %4420 = vmatprep.subr.bf16.mxu0 %v5985_v14 }
 0xcc1   : >> { %4421 = vmatpush1.bf16.msra.mxu0 %v5983_v17 }
 0xcc2   : >> { %4422 = vmatprep.subr.bf16.mxu0 %v5988_v53 }
 0xcc3   : >> { %3373 = vmatmul.mubr.bf16.gmra.mrb[20].mxu0 %v7354_v2  ;;  %3424 = vmatmul.mubr.bf16.gmra.mrb[52].mxu1 %v7354_v2  ;;  %v5998_v2 = vld [vmem:[%s6905_s15 + $0x60] ss:$8 sps:$4 sm:$0xff]  }
 0xcc5   : >> { %4423 = vmatpush1.bf16.msra.mxu0 %v5986_v6 }
 0xcc6   : >> { %4424 = vmatprep.subr.bf16.mxu0 %v5991_v57 }
 0xcc9   : >> { %4425 = vmatpush1.bf16.msra.mxu0 %v5989_v7 }
 0xcca   : >> { %4426 = vmatprep.subr.bf16.mxu0 %v5994_v41 }
 0xccd   : >> { %4427 = vmatpush1.bf16.msra.mxu0 %v5992_v61 }
 0xcce   : >> { %4428 = vmatprep.subr.bf16.mxu0 %v5997_v22 }
 0xcd1   : >> { %4429 = vmatpush1.bf16.msra.mxu0 %v5995_v35 }
 0xcd2   : >> { %4430 = vmatprep.subr.bf16.mxu0 %v6000_v23 }
 0xcd5   : >> { %4431 = vmatpush1.bf16.msra.mxu0 %v5998_v2 }
 0xcd6   : >> { %4432 = vmatprep.subr.bf16.mxu0 %v6003_v18 }
 0xcd9   : >> { %4433 = vmatpush1.bf16.msra.mxu0 %v6001_v27 }
 0xcda   : >> { %4434 = vmatprep.subr.bf16.mxu0 %v6006_v25 }
 0xcdd   : >> { %4435 = vmatpush1.bf16.msra.mxu0 %v6004_v26 }
 0xcde   : >> { %4436 = vmatprep.subr.bf16.mxu0 %v6009_v8 }
 0xce1   : >> { %4437 = vmatpush1.bf16.msra.mxu0 %v6007_v28 }
 0xce2   : >> { %4438 = vmatprep.subr.bf16.mxu0 %v6012_v29 }
 0xce5   : >> { %4439 = vmatpush1.bf16.msra.mxu0 %v6010_v32 }
 0xce6   : >> { %4440 = vmatprep.subr.bf16.mxu0 %v6015_v33 }
 0xce9   : >> { %4441 = vmatpush1.bf16.msra.mxu0 %v6013_v36 }
 0xcea   : >> { %4442 = vmatprep.subr.bf16.mxu0 %v6018_v37 }
 0xced   : >> { %4443 = vmatpush1.bf16.msra.mxu0 %v6016_v39 }
 0xcee   : >> { %4444 = vmatprep.subr.bf16.mxu0 %v6021_v40 }
 0xcf1   : >> { %4445 = vmatpush1.bf16.msra.mxu0 %v6019_v43 }
 0xcf2   : >> { %4446 = vmatprep.subr.bf16.mxu0 %v6024_v47 }
 0xcf5   : >> { %4447 = vmatpush1.bf16.msra.mxu0 %v6022_v10 }
 0xcf6   : >> { %4448 = vmatprep.subr.bf16.mxu0 %v6027_v48 }
 0xcf9   : >> { %4449 = vmatpush1.bf16.msra.mxu0 %v6025_v24 }
 0xcfa   : >> { %4469 = vmatprep.subr.bf16.mxu0 %v6030_v50 }
 0xd4e   : >> { %v3262_v58 = vpop.f32.mrb[8].mxu0  ;;  %v3313_v63 = vpop.f32.mrb[40].mxu1 }
 0xd4f   : >> { %v7465_v42 = vadd.f32 %v3262_v58, %v2551_v38  ;;  %v7468_v3 = vadd.f32 %v3313_v63, %v7457_v54  ;;  %v3264_v19 = vpop.f32.mrb[9].mxu0  ;;  %v3315_v20 = vpop.f32.mrb[41].mxu1 }
 0xd50   : >> { %v7470_v49 = vadd.f32 %v3264_v19, %v2555_v52  ;;  %v7473_v30 = vadd.f32 %v3315_v20, %v7463_v55  ;;  %v3266_v15 = vpop.f32.mrb[10].mxu0  ;;  %v3317_v34 = vpop.f32.mrb[42].mxu1 }
 0xd51   : >> { %v5377_v9 = vmul.f32 -1.702, %v7465_v42  ;;  %v5379_v31 = vmul.f32 -1.702, %v7468_v3  ;;  %v7477_v11 = vadd.f32 %v3266_v15, %v2551_v38  ;;  %v7480_v12 = vadd.f32 %v3317_v34, %v7457_v54  ;;  %v3268_v13 = vpop.f32.mrb[11].mxu0  ;;  %v3319_v14 = vpop.f32.mrb[43].mxu1 }
 0xd52   : >> { %v5378_v17 = vmul.f32 -1.702, %v7470_v49  ;;  %v5380_v53 = vmul.f32 -1.702, %v7473_v30  ;;  %v7484_v6 = vadd.f32 %v3268_v13, %v2555_v52  ;;  %v7487_v57 = vadd.f32 %v3319_v14, %v7463_v55 }
 0xd53   : >> { %v3480_v7 = vmul.f32 1.442695, %v5377_v9  ;;  %v3484_v41 = vmul.f32 1.442695, %v5379_v31  ;;  %v5385_v61 = vmul.f32 -1.702, %v7477_v11 }
 0xd54   : >> { %v3482_v22 = vmul.f32 1.442695, %v5378_v17  ;;  %v3486_v35 = vmul.f32 1.442695, %v5380_v53  ;;  %v5387_v23 = vmul.f32 -1.702, %v7480_v12 }
 0xd55   : >> { %6208 = vpow2.f32 %v3480_v7  ;;  %v3496_v2 = vmul.f32 1.442695, %v5385_v61  ;;  %v5386_v18 = vmul.f32 -1.702, %v7484_v6  ;;  %v5388_v27 = vmul.f32 -1.702, %v7487_v57 }
 0xd56   : >> { %6210 = vpow2.f32 %v3484_v41  ;;  %v3500_v25 = vmul.f32 1.442695, %v5387_v23  ;;  %v3272_v26 = vpop.f32.mrb[12].mxu0  ;;  %v7493_v8 = vpop.f32.mrb[44].mxu1 }
 0xd57   : >> { %6212 = vpow2.f32 %v3482_v22  ;;  %v3498_v28 = vmul.f32 1.442695, %v5386_v18  ;;  %v7495_v29 = vadd.f32 %v3272_v26, %v2551_v38  ;;  %v3274_v32 = vpop.f32.mrb[13].mxu0  ;;  %v7497_v33 = vpop.f32.mrb[45].mxu1  ;;  %v3502_v36 = vmul.f32 1.442695, %v5388_v27 }
 0xd58   : >> { %6214 = vpow2.f32 %v3486_v35  ;;  %v7499_v37 = vadd.f32 %v3274_v32, %v2555_v52  ;;  %v3276_v39 = vpop.f32.mrb[14].mxu0  ;;  %v3327_v40 = vpop.f32.mrb[46].mxu1 }
 0xd59   : >> { %6216 = vpow2.f32 %v3496_v2  ;;  %v5393_v43 = vmul.f32 -1.702, %v7495_v29  ;;  %v3277_v47 = vpop.f32.mrb[15].mxu0  ;;  %v3328_v10 = vpop.f32.mrb[47].mxu1 }
 0xd5a   : >> { %6218 = vpow2.f32 %v3500_v25  ;;  %v5394_v48 = vmul.f32 -1.702, %v7499_v37 }
 0xd5b   : >> { %6220 = vpow2.f32 %v3498_v28  ;;  %v3512_v24 = vmul.f32 1.442695, %v5393_v43 }
 0xd5c   : >> { %6222 = vpow2.f32 %v3502_v36  ;;  %v3514_v50 = vmul.f32 1.442695, %v5394_v48 }
 0xd5d   : >> { %6224 = vpow2.f32 %v3512_v24 }
 0xd5e   : >> { %6226 = vpow2.f32 %v3514_v50 }
 0xd5f   : >> { %v6209_v38 = vpop.eup %6208 }
 0xd60   : >> { %v6211_v58 = vpop.eup %6210  ;;  %v3528_v52 = vadd.f32 1.0, %v6209_v38  ;;  %v6028_v38 = vld [vmem:[%s6905_s15 + $0x100] ss:$8 sps:$4 sm:$0xff]  }
 0xd61   : >> { %v6213_v63 = vpop.eup %6212  ;;  %v3530_v19 = vadd.f32 1.0, %v6211_v58  ;;  %v6033_v58 = vld [vmem:[%s6905_s15 + $0x114] ss:$8 sps:$4 sm:$0xff]  }
 0xd62   : >> { %v6215_v20 = vpop.eup %6214  ;;  %6228 = vrcp.f32 %v3528_v52  ;;  %v3529_v15 = vadd.f32 1.0, %v6213_v63 }
 0xd63   : >> { %v6217_v34 = vpop.eup %6216  ;;  %6230 = vrcp.f32 %v3530_v19  ;;  %v3531_v9 = vadd.f32 1.0, %v6215_v20  ;;  %v6034_v20 = vld [vmem:[%s6905_s15 + $0x120] ss:$8 sps:$4 sm:$0xff]  }
 0xd64   : >> { %v6219_v31 = vpop.eup %6218  ;;  %6232 = vrcp.f32 %v3529_v15  ;;  %v3536_v13 = vadd.f32 1.0, %v6217_v34  ;;  %v6039_v34 = vld [vmem:[%s6905_s15 + $0x134] ss:$8 sps:$4 sm:$0xff]  }
 0xd65   : >> { %v6221_v14 = vpop.eup %6220  ;;  %6234 = vrcp.f32 %v3531_v9  ;;  %v3538_v17 = vadd.f32 1.0, %v6219_v31  ;;  %v6042_v9 = vld [vmem:[%s6905_s15 + $0x144] ss:$8 sps:$4 sm:$0xff]   ;;  %v6040_v31 = vld [vmem:[%s6905_s15 + $0x140] ss:$8 sps:$4 sm:$0xff]  }
 0xd66   : >> { %v6223_v53 = vpop.eup %6222  ;;  %6236 = vrcp.f32 %v3536_v13  ;;  %v3537_v7 = vadd.f32 1.0, %v6221_v14  ;;  %v6045_v13 = vld [vmem:[%s6905_s15 + $0x154] ss:$8 sps:$4 sm:$0xff]   ;;  %v2574_v14 = vsub.s32 6, %v6873_v44 }
 0xd67   : >> { %v6225_v41 = vpop.eup %6224  ;;  %6238 = vrcp.f32 %v3538_v17  ;;  %v3539_v61 = vadd.f32 1.0, %v6223_v53  ;;  %v7536_v17 = vadd.f32 %v7493_v8, %v7457_v54  ;;  %v7552_v8 = vrot.slane %v7451_v51, %v7111_v60 }
 0xd68   : >> { %6240 = vrcp.f32 %v3537_v7  ;;  %v6227_v22 = vpop.eup %6226  ;;  %v3544_v35 = vadd.f32 1.0, %v6225_v41  ;;  %v2578_v7 = vsub.s32 7, %v6873_v44  ;;  %v6043_v41 = vld [vmem:[%s6905_s15 + $0x150] ss:$8 sps:$4 sm:$0xff]  }
 0xd69   : >> { %6242 = vrcp.f32 %v3539_v61  ;;  %v3545_v23 = vadd.f32 1.0, %v6227_v22  ;;  %v7547_v61 = vrot.slane %v7451_v51, %v2574_v14  ;;  %v5395_v22 = vmul.f32 -1.702, %v7536_v17 }
 0xd6b   : >> { %6244 = vrcp.f32 %v3545_v23  ;;  %v6046_v23 = vld [vmem:[%s6905_s15 + $0x160] ss:$8 sps:$4 sm:$0xff]  }
 0xd6c   : >> { %v6229_v2 = vpop.eup %6228  ;;  %6246 = vrcp.f32 %v3544_v35  ;;  %v7555_v35 = vrot.slane %v7451_v51, %v2578_v7  ;;  %v6057_v7 = vld [vmem:[%s6905_s15 + $0x194] ss:$8 sps:$4 sm:$0xff]  }
 0xd6d   : >> { %v6231_v18 = vpop.eup %6230  ;;  %v3600_v32 = vmul.f32 %v6229_v2, %v7465_v42 }
 0xd6e   : >> { %v6233_v27 = vpop.eup %6232  ;;  %v7506_v40 = vmul.f32 %v6231_v18, %v7468_v3  ;;  %v6051_v18 = vld [vmem:[%s6905_s15 + $0x174] ss:$8 sps:$4 sm:$0xff]  }
 0xd6f   : >> { %v6235_v25 = vpop.eup %6234  ;;  %v3601_v10 = vmul.f32 %v6233_v27, %v7470_v49 }
 0xd70   : >> { %v6237_v26 = vpop.eup %6236  ;;  %v3603_v50 = vmul.f32 %v6235_v25, %v7473_v30 }
 0xd71   : >> { %v6239_v28 = vpop.eup %6238  ;;  %v3608_v36 = vmul.f32 %v6237_v26, %v7477_v11 }
 0xd72   : >> { %v6241_v39 = vpop.eup %6240  ;;  %v7509_v43 = vmul.f32 %v6239_v28, %v7480_v12 }
 0xd73   : >> { %v6243_v47 = vpop.eup %6242  ;;  %v3624_v48 = vpack.c.bf16 %v3608_v36, %v3600_v32  ;;  %v3609_v24 = vmul.f32 %v6241_v39, %v7484_v6  ;;  %v6031_v6 = vld [vmem:[%s6905_s15 + $0x110] ss:$8 sps:$4 sm:$0xff]   ;;  %v3516_v32 = vmul.f32 1.442695, %v5395_v22 }
 0xd74   : >> { %v3626_v42 = vpack.c.bf16 %v7509_v43, %v7506_v40  ;;  %v3611_v11 = vmul.f32 %v6243_v47, %v7487_v57  ;;  %v6036_v57 = vld [vmem:[%s6905_s15 + $0x124] ss:$8 sps:$4 sm:$0xff]   ;;  %v6085_v40 = vld [vmem:[%s6905_s15 + $0x230] ss:$8 sps:$4 sm:$0xff]  }
 0xd75   : >> { %v3625_v3 = vpack.c.bf16 %v3609_v24, %v3601_v10  ;;  %v6245_v12 = vpop.eup %6244  ;;  %v6049_v10 = vld [vmem:[%s6905_s15 + $0x170] ss:$8 sps:$4 sm:$0xff]   ;;  %v6090_v43 = vld [vmem:[%s6905_s15 + $0x244] ss:$8 sps:$4 sm:$0xff]  }
 0xd76   : >> { %v3627_v52 = vpack.c.bf16 %v3611_v11, %v3603_v50  ;;  %v6247_v49 = vpop.eup %6246  ;;  %v3617_v63 = vmul.f32 %v6245_v12, %v7499_v37  ;;  %v6037_v37 = vld [vmem:[%s6905_s15 + $0x130] ss:$8 sps:$4 sm:$0xff]  }
 0xd77   : >> { %4450 = vmatprep.mubr.bf16.mxu0 %v3625_v3  ;;  %v3616_v19 = vmul.f32 %v6247_v49, %v7495_v29  ;;  %v7529_v29 = vadd.f32 %v7497_v33, %v7463_v55  ;;  %v6048_v55 = vld [vmem:[%s6905_s15 + $0x164] ss:$8 sps:$4 sm:$0xff]   ;;  %v7544_v33 = vrot.slane %v7451_v51, %v7108_v59 }
 0xd78   : >> { %4451 = vmatmul.mubr.bf16.vlgmr.msra.gmra.mrb[24].mxu0 %v3624_v48  ;;  %v3633_v30 = vpack.c.bf16 %v3617_v63, %v3617_v63  ;;  %v6054_v63 = vld [vmem:[%s6905_s15 + $0x184] ss:$8 sps:$4 sm:$0xff]  }
 0xd79   : >> { %4470 = vmatpush1.bf16.msra.mxu0 %v6028_v38  ;;  %v3632_v15 = vpack.c.bf16 %v3616_v19, %v3616_v19  ;;  %v5396_v53 = vmul.f32 -1.702, %v7529_v29 }
 0xd7a   : >> { %4471 = vmatprep.subr.bf16.mxu0 %v6033_v58  ;;  %4460 = vmatprep.mubr.bf16.mxu0 %v3633_v30 }
 0xd7b   : >> { %v3518_v54 = vmul.f32 1.442695, %v5396_v53 }
 0xd7d   : >> { %4472 = vmatpush1.bf16.msra.mxu0 %v6031_v6  ;;  %6248 = vpow2.f32 %v3518_v54 }
 0xd7e   : >> { %4473 = vmatprep.subr.bf16.mxu0 %v6036_v57  ;;  %v6052_v57 = vld [vmem:[%s6905_s15 + $0x180] ss:$8 sps:$4 sm:$0xff]   ;;  %6250 = vpow2.f32 %v3516_v32  ;;  %v6060_v32 = vld [vmem:[%s6905_s15 + $0x1a4] ss:$8 sps:$4 sm:$0xff]  }
 0xd80   : >> { %4461 = vmatmul.mubr.bf16.gmra.mrb[28].mxu0 %v3632_v15 }
 0xd81   : >> { %4474 = vmatpush1.bf16.msra.mxu0 %v6034_v20  ;;  %4501 = vmatprep.mubr.bf16.mxu0 %v3627_v52 }
 0xd82   : >> { %4475 = vmatprep.subr.bf16.mxu0 %v6039_v34 }
 0xd85   : >> { %4476 = vmatpush1.bf16.msra.mxu0 %v6037_v37 }
 0xd86   : >> { %4477 = vmatprep.subr.bf16.mxu0 %v6042_v9 }
 0xd89   : >> { %4478 = vmatpush1.bf16.msra.mxu0 %v6040_v31 }
 0xd8a   : >> { %4479 = vmatprep.subr.bf16.mxu0 %v6045_v13 }
 0xd8d   : >> { %4480 = vmatpush1.bf16.msra.mxu0 %v6043_v41 }
 0xd8e   : >> { %4481 = vmatprep.subr.bf16.mxu0 %v6048_v55  ;;  %v3364_v2 = vpop.f32.mrb[16].mxu0  ;;  %v3415_v59 = vpop.f32.mrb[48].mxu1 }
 0xd8f   : >> { %v7560_v27 = vadd.f32 %v3364_v2, %v7544_v33  ;;  %v7563_v25 = vadd.f32 %v3415_v59, %v7547_v61  ;;  %v3366_v26 = vpop.f32.mrb[17].mxu0  ;;  %v3417_v28 = vpop.f32.mrb[49].mxu1 }
 0xd90   : >> { %v7566_v51 = vadd.f32 %v3366_v26, %v7552_v8  ;;  %v7569_v36 = vadd.f32 %v3417_v28, %v7555_v35  ;;  %v3368_v39 = vpop.f32.mrb[18].mxu0  ;;  %v3419_v47 = vpop.f32.mrb[50].mxu1  ;;  %v6055_v26 = vld [vmem:[%s6905_s15 + $0x190] ss:$8 sps:$4 sm:$0xff]  }
 0xd91   : >> { %v5381_v48 = vmul.f32 -1.702, %v7560_v27  ;;  %v5383_v24 = vmul.f32 -1.702, %v7563_v25  ;;  %4482 = vmatpush1.bf16.msra.mxu0 %v6046_v23  ;;  %v7575_v50 = vadd.f32 %v3368_v39, %v7544_v33  ;;  %v7578_v11 = vadd.f32 %v3419_v47, %v7547_v61  ;;  %v3370_v3 = vpop.f32.mrb[19].mxu0  ;;  %v3421_v38 = vpop.f32.mrb[51].mxu1 }
 0xd92   : >> { %v5382_v12 = vmul.f32 -1.702, %v7566_v51  ;;  %v5384_v58 = vmul.f32 -1.702, %v7569_v36  ;;  %v7583_v52 = vadd.f32 %v3370_v3, %v7552_v8  ;;  %v7586_v49 = vadd.f32 %v3421_v38, %v7555_v35  ;;  %4483 = vmatprep.subr.bf16.mxu0 %v6051_v18  ;;  %v6249_v28 = vpop.eup %6248  ;;  %v6058_v47 = vld [vmem:[%s6905_s15 + $0x1a0] ss:$8 sps:$4 sm:$0xff]  }
 0xd93   : >> { %v3488_v30 = vmul.f32 1.442695, %v5381_v48  ;;  %v3492_v6 = vmul.f32 1.442695, %v5383_v24  ;;  %v5389_v19 = vmul.f32 -1.702, %v7575_v50 }
 0xd94   : >> { %v3490_v20 = vmul.f32 1.442695, %v5382_v12  ;;  %v3494_v15 = vmul.f32 1.442695, %v5384_v58  ;;  %v5391_v34 = vmul.f32 -1.702, %v7578_v11 }
 0xd95   : >> { %6252 = vpow2.f32 %v3488_v30  ;;  %v3504_v37 = vmul.f32 1.442695, %v5389_v19  ;;  %v5390_v9 = vmul.f32 -1.702, %v7583_v52  ;;  %v5392_v31 = vmul.f32 -1.702, %v7586_v49  ;;  %4484 = vmatpush1.bf16.msra.mxu0 %v6049_v10  ;;  %v6251_v10 = vpop.eup %6250 }
 0xd96   : >> { %6254 = vpow2.f32 %v3492_v6  ;;  %v3508_v13 = vmul.f32 1.442695, %v5391_v34  ;;  %4485 = vmatprep.subr.bf16.mxu0 %v6054_v63  ;;  %v7594_v14 = vpop.f32.mrb[20].mxu0  ;;  %v7596_v53 = vpop.f32.mrb[52].mxu1  ;;  %v3547_v39 = vadd.f32 1.0, %v6249_v28 }
 0xd97   : >> { %6256 = vpow2.f32 %v3490_v20  ;;  %v3506_v41 = vmul.f32 1.442695, %v5390_v9  ;;  %v7599_v55 = vpop.f32.mrb[21].mxu0  ;;  %v7601_v22 = vpop.f32.mrb[53].mxu1  ;;  %v3510_v54 = vmul.f32 1.442695, %v5392_v31 }
 0xd98   : >> { %6258 = vpow2.f32 %v3494_v15  ;;  %v3378_v23 = vpop.f32.mrb[22].mxu0  ;;  %v3429_v2 = vpop.f32.mrb[54].mxu1  ;;  %v6063_v48 = vld [vmem:[%s6905_s15 + $0x1b4] ss:$8 sps:$4 sm:$0xff]   ;;  %v6061_v63 = vld [vmem:[%s6905_s15 + $0x1b0] ss:$8 sps:$4 sm:$0xff]  }
 0xd99   : >> { %6260 = vpow2.f32 %v3504_v37  ;;  %4486 = vmatpush1.bf16.msra.mxu0 %v6052_v57  ;;  %v3379_v59 = vpop.f32.mrb[23].mxu0  ;;  %v3430_v18 = vpop.f32.mrb[55].mxu1  ;;  %v6066_v19 = vld [vmem:[%s6905_s15 + $0x1c4] ss:$8 sps:$4 sm:$0xff]   ;;  %v6064_v31 = vld [vmem:[%s6905_s15 + $0x1c0] ss:$8 sps:$4 sm:$0xff]  }
 0xd9a   : >> { %6262 = vpow2.f32 %v3508_v13  ;;  %4487 = vmatprep.subr.bf16.mxu0 %v6057_v7  ;;  %v3546_v23 = vadd.f32 1.0, %v6251_v10  ;;  %v6067_v2 = vld [vmem:[%s6905_s15 + $0x1d0] ss:$8 sps:$4 sm:$0xff]   ;;  %v6072_v59 = vld [vmem:[%s6905_s15 + $0x1e4] ss:$8 sps:$4 sm:$0xff]  }
 0xd9b   : >> { %6264 = vpow2.f32 %v3506_v41  ;;  %v6069_v41 = vld [vmem:[%s6905_s15 + $0x1d4] ss:$8 sps:$4 sm:$0xff]  }
 0xd9c   : >> { %6266 = vpow2.f32 %v3510_v54 }
 0xd9d   : >> { %4488 = vmatpush1.bf16.msra.mxu0 %v6055_v26  ;;  %6268 = vrcp.f32 %v3547_v39 }
 0xd9e   : >> { %4489 = vmatprep.subr.bf16.mxu0 %v6060_v32  ;;  %v6070_v32 = vld [vmem:[%s6905_s15 + $0x1e0] ss:$8 sps:$4 sm:$0xff]  }
 0xd9f   : >> { %v6253_v24 = vpop.eup %6252 }
 0xda0   : >> { %v6255_v3 = vpop.eup %6254  ;;  %v3532_v38 = vadd.f32 1.0, %v6253_v24 }
 0xda1   : >> { %v6257_v12 = vpop.eup %6256  ;;  %v3534_v58 = vadd.f32 1.0, %v6255_v3  ;;  %4490 = vmatpush1.bf16.msra.mxu0 %v6058_v47  ;;  %v6075_v47 = vld [vmem:[%s6905_s15 + $0x1f4] ss:$8 sps:$4 sm:$0xff]  }
 0xda2   : >> { %v6259_v30 = vpop.eup %6258  ;;  %6270 = vrcp.f32 %v3532_v38  ;;  %v3533_v6 = vadd.f32 1.0, %v6257_v12  ;;  %4491 = vmatprep.subr.bf16.mxu0 %v6063_v48  ;;  %v6073_v12 = vld [vmem:[%s6905_s15 + $0x1f0] ss:$8 sps:$4 sm:$0xff]  }
 0xda3   : >> { %v6261_v57 = vpop.eup %6260  ;;  %6272 = vrcp.f32 %v3534_v58  ;;  %v3535_v20 = vadd.f32 1.0, %v6259_v30 }
 0xda4   : >> { %v6263_v15 = vpop.eup %6262  ;;  %6274 = vrcp.f32 %v3533_v6  ;;  %v3540_v34 = vadd.f32 1.0, %v6261_v57  ;;  %v6078_v6 = vld [vmem:[%s6905_s15 + $0x204] ss:$8 sps:$4 sm:$0xff]  }
 0xda5   : >> { %v6265_v37 = vpop.eup %6264  ;;  %6276 = vrcp.f32 %v3535_v20  ;;  %v3542_v9 = vadd.f32 1.0, %v6263_v15  ;;  %4492 = vmatpush1.bf16.msra.mxu0 %v6061_v63 }
 0xda6   : >> { %v6267_v13 = vpop.eup %6266  ;;  %6278 = vrcp.f32 %v3540_v34  ;;  %v3541_v7 = vadd.f32 1.0, %v6265_v37  ;;  %4493 = vmatprep.subr.bf16.mxu0 %v6066_v19  ;;  %v6081_v34 = vld [vmem:[%s6905_s15 + $0x214] ss:$8 sps:$4 sm:$0xff]  }
 0xda7   : >> { %6280 = vrcp.f32 %v3542_v9  ;;  %v3543_v54 = vadd.f32 1.0, %v6267_v13  ;;  %v6269_v18 = vpop.eup %6268  ;;  %v6082_v13 = vld [vmem:[%s6905_s15 + $0x220] ss:$8 sps:$4 sm:$0xff]  }
 0xda8   : >> { %6282 = vrcp.f32 %v3541_v7 }
 0xda9   : >> { %6284 = vrcp.f32 %v3543_v54  ;;  %4494 = vmatpush1.bf16.msra.mxu0 %v6064_v31  ;;  %v6084_v31 = vld [vmem:[%s6905_s15 + $0x224] ss:$8 sps:$4 sm:$0xff]   ;;  %v3377_v54 = vadd.f32 %v7599_v55, %v7552_v8 }
 0xdaa   : >> { %4495 = vmatprep.subr.bf16.mxu0 %v6069_v41  ;;  %6286 = vrcp.f32 %v3546_v23  ;;  %v6087_v41 = vld [vmem:[%s6905_s15 + $0x234] ss:$8 sps:$4 sm:$0xff]   ;;  %v6091_v23 = vld [vmem:[%s6905_s15 + $0x250] ss:$8 sps:$4 sm:$0xff]   ;;  %v6102_v8 = vld [vmem:[%s6905_s15 + $0x284] ss:$8 sps:$4 sm:$0xff]  }
 0xdac   : >> { %v6271_v26 = vpop.eup %6270 }
 0xdad   : >> { %v6273_v28 = vpop.eup %6272  ;;  %4496 = vmatpush1.bf16.msra.mxu0 %v6067_v2  ;;  %v7616_v10 = vmul.f32 %v6271_v26, %v7560_v27  ;;  %v3619_v27 = vmul.f32 %v6269_v18, %v7529_v29  ;;  %v6076_v29 = vld [vmem:[%s6905_s15 + $0x200] ss:$8 sps:$4 sm:$0xff]   ;;  %v6096_v2 = vld [vmem:[%s6905_s15 + $0x264] ss:$8 sps:$4 sm:$0xff]   ;;  %v6099_v26 = vld [vmem:[%s6905_s15 + $0x274] ss:$8 sps:$4 sm:$0xff]  }
 0xdae   : >> { %v6275_v39 = vpop.eup %6274  ;;  %4497 = vmatprep.subr.bf16.mxu0 %v6072_v59  ;;  %v7623_v63 = vmul.f32 %v6273_v28, %v7563_v25  ;;  %v5398_v59 = vmul.f32 -1.702, %v3377_v54  ;;  %v6094_v18 = vld [vmem:[%s6905_s15 + $0x260] ss:$8 sps:$4 sm:$0xff]   ;;  %v3375_v28 = vadd.f32 %v7594_v14, %v7544_v33  ;;  %v6103_v33 = vld [vmem:[%s6905_s15 + $0x290] ss:$8 sps:$4 sm:$0xff]  }
 0xdaf   : >> { %v6277_v48 = vpop.eup %6276  ;;  %v3605_v57 = vmul.f32 %v6275_v39, %v7566_v51  ;;  %v6097_v39 = vld [vmem:[%s6905_s15 + $0x270] ss:$8 sps:$4 sm:$0xff]   ;;  %v6108_v14 = vld [vmem:[%s6905_s15 + $0x2a4] ss:$8 sps:$4 sm:$0xff]  }
 0xdb0   : >> { %v6279_v24 = vpop.eup %6278  ;;  %v7635_v25 = vmul.f32 %v6277_v48, %v7569_v36  ;;  %v3635_v36 = vpack.c.bf16 %v3619_v27, %v3619_v27  ;;  %v5397_v55 = vmul.f32 -1.702, %v3375_v28  ;;  %v6105_v48 = vld [vmem:[%s6905_s15 + $0x294] ss:$8 sps:$4 sm:$0xff]   ;;  %v6114_v27 = vld [vmem:[%s6905_s15 + $0x2c4] ss:$8 sps:$4 sm:$0xff]  }
 0xdb1   : >> { %v6281_v3 = vpop.eup %6280  ;;  %v7619_v38 = vmul.f32 %v6279_v24, %v7575_v50  ;;  %4498 = vmatpush1.bf16.msra.mxu0 %v6070_v32  ;;  %v3522_v32 = vmul.f32 1.442695, %v5398_v59 }
 0xdb2   : >> { %v6283_v58 = vpop.eup %6282  ;;  %v7626_v30 = vmul.f32 %v6281_v3, %v7578_v11  ;;  %4499 = vmatprep.subr.bf16.mxu0 %v6075_v47  ;;  %v6100_v47 = vld [vmem:[%s6905_s15 + $0x280] ss:$8 sps:$4 sm:$0xff]   ;;  %v3520_v24 = vmul.f32 1.442695, %v5397_v55 }
 0xdb3   : >> { %v6285_v19 = vpop.eup %6284  ;;  %v3628_v50 = vpack.c.bf16 %v7619_v38, %v7616_v10  ;;  %v3613_v20 = vmul.f32 %v6283_v58, %v7583_v52  ;;  %6288 = vpow2.f32 %v3522_v32  ;;  %v6106_v3 = vld [vmem:[%s6905_s15 + $0x2a0] ss:$8 sps:$4 sm:$0xff]   ;;  %v6133_v10 = vld [vmem:[%s6905_s15 + $0x330] ss:$8 sps:$4 sm:$0xff]   ;;  %v6138_v38 = vld [vmem:[%s6905_s15 + $0x344] ss:$8 sps:$4 sm:$0xff]  }
 0xdb4   : >> { %v3630_v11 = vpack.c.bf16 %v7626_v30, %v7623_v63  ;;  %v7640_v15 = vmul.f32 %v6285_v19, %v7586_v49  ;;  %v6287_v37 = vpop.eup %6286  ;;  %v6079_v49 = vld [vmem:[%s6905_s15 + $0x210] ss:$8 sps:$4 sm:$0xff]   ;;  %6290 = vpow2.f32 %v3520_v24  ;;  %v6153_v24 = vld [vmem:[%s6905_s15 + $0x394] ss:$8 sps:$4 sm:$0xff]  }
 0xdb5   : >> { %4500 = vmatpush1.bf16.msra.mxu0 %v6073_v12  ;;  %v3629_v51 = vpack.c.bf16 %v3613_v20, %v3605_v57  ;;  %v3618_v9 = vmul.f32 %v6287_v37, %v7536_v17  ;;  %v6093_v17 = vld [vmem:[%s6905_s15 + $0x254] ss:$8 sps:$4 sm:$0xff]   ;;  %v6112_v57 = vld [vmem:[%s6905_s15 + $0x2c0] ss:$8 sps:$4 sm:$0xff]   ;;  %v6120_v37 = vld [vmem:[%s6905_s15 + $0x2e4] ss:$8 sps:$4 sm:$0xff]  }
 0xdb6   : >> { %4520 = vmatprep.subr.bf16.mxu0 %v6078_v6  ;;  %v3631_v52 = vpack.c.bf16 %v7640_v15, %v7635_v25  ;;  %v6111_v12 = vld [vmem:[%s6905_s15 + $0x2b4] ss:$8 sps:$4 sm:$0xff]   ;;  %v6109_v6 = vld [vmem:[%s6905_s15 + $0x2b0] ss:$8 sps:$4 sm:$0xff]   ;;  %v6144_v25 = vld [vmem:[%s6905_s15 + $0x364] ss:$8 sps:$4 sm:$0xff]  }
 0xdb7   : >> { %v3634_v7 = vpack.c.bf16 %v3618_v9, %v3618_v9  ;;  %v6139_v32 = vld [vmem:[%s6905_s15 + $0x350] ss:$8 sps:$4 sm:$0xff]  }
 0xdb8   : >> { %4502 = vmatmul.mubr.bf16.vlgmr.msra.gmra.mrb[24].mxu0 %v3626_v42  ;;  %v6088_v42 = vld [vmem:[%s6905_s15 + $0x240] ss:$8 sps:$4 sm:$0xff]  }
 0xdb9   : >> { %4511 = vmatprep.mubr.bf16.mxu0 %v3635_v36  ;;  %4521 = vmatpush1.bf16.msra.mxu0 %v6076_v29  ;;  %v6117_v29 = vld [vmem:[%s6905_s15 + $0x2d4] ss:$8 sps:$4 sm:$0xff]   ;;  %v6118_v36 = vld [vmem:[%s6905_s15 + $0x2e0] ss:$8 sps:$4 sm:$0xff]  }
 0xdba   : >> { %4522 = vmatprep.subr.bf16.mxu0 %v6081_v34  ;;  %v6115_v34 = vld [vmem:[%s6905_s15 + $0x2d0] ss:$8 sps:$4 sm:$0xff]  }
 0xdbd   : >> { %4523 = vmatpush1.bf16.msra.mxu0 %v6079_v49  ;;  %v6289_v58 = vpop.eup %6288  ;;  %v6123_v49 = vld [vmem:[%s6905_s15 + $0x2f4] ss:$8 sps:$4 sm:$0xff]  }
 0xdbe   : >> { %4524 = vmatprep.subr.bf16.mxu0 %v6084_v31  ;;  %v3549_v19 = vadd.f32 1.0, %v6289_v58  ;;  %v6291_v20 = vpop.eup %6290  ;;  %v6121_v31 = vld [vmem:[%s6905_s15 + $0x2f0] ss:$8 sps:$4 sm:$0xff]  }
 0xdbf   : >> { %v6157_v58 = vld [vmem:[%s6905_s15 + $0x3b0] ss:$8 sps:$4 sm:$0xff]  }
 0xdc0   : >> { %4512 = vmatmul.mubr.bf16.gmra.mrb[32].mxu0 %v3634_v7  ;;  %6292 = vrcp.f32 %v3549_v19  ;;  %v6162_v19 = vld [vmem:[%s6905_s15 + $0x3c4] ss:$8 sps:$4 sm:$0xff]  }
 0xdc1   : >> { %4525 = vmatpush1.bf16.msra.mxu0 %v6082_v13  ;;  %4552 = vmatprep.mubr.bf16.mxu0 %v3629_v51  ;;  %v3548_v51 = vadd.f32 1.0, %v6291_v20  ;;  %v6126_v13 = vld [vmem:[%s6905_s15 + $0x304] ss:$8 sps:$4 sm:$0xff]   ;;  %v6165_v20 = vld [vmem:[%s6905_s15 + $0x3d4] ss:$8 sps:$4 sm:$0xff]  }
 0xdc2   : >> { %4526 = vmatprep.subr.bf16.mxu0 %v6087_v41  ;;  %v6124_v41 = vld [vmem:[%s6905_s15 + $0x300] ss:$8 sps:$4 sm:$0xff]  }
 0xdc3   : >> { %6294 = vrcp.f32 %v3548_v51  ;;  %v6163_v51 = vld [vmem:[%s6905_s15 + $0x3d0] ss:$8 sps:$4 sm:$0xff]  }
 0xdc5   : >> { %4527 = vmatpush1.bf16.msra.mxu0 %v6085_v40  ;;  %v6129_v40 = vld [vmem:[%s6905_s15 + $0x314] ss:$8 sps:$4 sm:$0xff]  }
 0xdc6   : >> { %4528 = vmatprep.subr.bf16.mxu0 %v6090_v43 }
 0xdc9   : >> { %4529 = vmatpush1.bf16.msra.mxu0 %v6088_v42 }
 0xdca   : >> { %4530 = vmatprep.subr.bf16.mxu0 %v6093_v17  ;;  %v6293_v9 = vpop.eup %6292  ;;  %v6127_v17 = vld [vmem:[%s6905_s15 + $0x310] ss:$8 sps:$4 sm:$0xff]  }
 0xdcb   : >> { %v3621_v7 = vmul.f32 %v6293_v9, %v3377_v54  ;;  %v6132_v54 = vld [vmem:[%s6905_s15 + $0x324] ss:$8 sps:$4 sm:$0xff]   ;;  %v6169_v9 = vld [vmem:[%s6905_s15 + $0x3f0] ss:$8 sps:$4 sm:$0xff]  }
 0xdcd   : >> { %4531 = vmatpush1.bf16.msra.mxu0 %v6091_v23  ;;  %v6295_v43 = vpop.eup %6294  ;;  %v3637_v42 = vpack.c.bf16 %v3621_v7, %v3621_v7 }
 0xdce   : >> { %4532 = vmatprep.subr.bf16.mxu0 %v6096_v2  ;;  %v3620_v23 = vmul.f32 %v6295_v43, %v3375_v28  ;;  %v6130_v2 = vld [vmem:[%s6905_s15 + $0x320] ss:$8 sps:$4 sm:$0xff]   ;;  %v3428_v28 = vadd.f32 %v7601_v22, %v7555_v35  ;;  %v6150_v35 = vld [vmem:[%s6905_s15 + $0x384] ss:$8 sps:$4 sm:$0xff]  }
 0xdd0   : >> { %v3636_v59 = vpack.c.bf16 %v3620_v23, %v3620_v23  ;;  %v5400_v15 = vmul.f32 -1.702, %v3428_v28 }
 0xdd1   : >> { %4533 = vmatpush1.bf16.msra.mxu0 %v6094_v18  ;;  %v6135_v18 = vld [vmem:[%s6905_s15 + $0x334] ss:$8 sps:$4 sm:$0xff]  }
 0xdd2   : >> { %4534 = vmatprep.subr.bf16.mxu0 %v6099_v26  ;;  %v6141_v26 = vld [vmem:[%s6905_s15 + $0x354] ss:$8 sps:$4 sm:$0xff]   ;;  %v3526_v55 = vmul.f32 1.442695, %v5400_v15 }
 0xdd4   : >> { %6296 = vpow2.f32 %v3526_v55 }
 0xdd5   : >> { %4535 = vmatpush1.bf16.msra.mxu0 %v6097_v39  ;;  %v6147_v39 = vld [vmem:[%s6905_s15 + $0x374] ss:$8 sps:$4 sm:$0xff]  }
 0xdd6   : >> { %4536 = vmatprep.subr.bf16.mxu0 %v6102_v8  ;;  %v3426_v8 = vadd.f32 %v7596_v53, %v7547_v61  ;;  %v6151_v61 = vld [vmem:[%s6905_s15 + $0x390] ss:$8 sps:$4 sm:$0xff]   ;;  %v6156_v53 = vld [vmem:[%s6905_s15 + $0x3a4] ss:$8 sps:$4 sm:$0xff]  }
 0xdd8   : >> { %v5399_v22 = vmul.f32 -1.702, %v3426_v8 }
 0xdd9   : >> { %4537 = vmatpush1.bf16.msra.mxu0 %v6100_v47  ;;  %v6145_v47 = vld [vmem:[%s6905_s15 + $0x370] ss:$8 sps:$4 sm:$0xff]  }
 0xdda   : >> { %4538 = vmatprep.subr.bf16.mxu0 %v6105_v48  ;;  %v6148_v48 = vld [vmem:[%s6905_s15 + $0x380] ss:$8 sps:$4 sm:$0xff]  }
 0xddd   : >> { %4539 = vmatpush1.bf16.msra.mxu0 %v6103_v33  ;;  %v3524_v33 = vmul.f32 1.442695, %v5399_v22 }
 0xdde   : >> { %4540 = vmatprep.subr.bf16.mxu0 %v6108_v14  ;;  %v6154_v14 = vld [vmem:[%s6905_s15 + $0x3a0] ss:$8 sps:$4 sm:$0xff]  }
 0xddf   : >> { %6298 = vpow2.f32 %v3524_v33 }
 0xde1   : >> { %4541 = vmatpush1.bf16.msra.mxu0 %v6106_v3  ;;  %v6159_v3 = vld [vmem:[%s6905_s15 + $0x3b4] ss:$8 sps:$4 sm:$0xff]  }
 0xde2   : >> { %4542 = vmatprep.subr.bf16.mxu0 %v6111_v12  ;;  %v6297_v12 = vpop.eup %6296 }
 0xde5   : >> { %4543 = vmatpush1.bf16.msra.mxu0 %v6109_v6  ;;  %v3551_v6 = vadd.f32 1.0, %v6297_v12 }
 0xde6   : >> { %4544 = vmatprep.subr.bf16.mxu0 %v6114_v27  ;;  %v6160_v27 = vld [vmem:[%s6905_s15 + $0x3c0] ss:$8 sps:$4 sm:$0xff]  }
 0xde7   : >> { %6300 = vrcp.f32 %v3551_v6 }
 0xde9   : >> { %4545 = vmatpush1.bf16.msra.mxu0 %v6112_v57  ;;  %v6299_v57 = vpop.eup %6298 }
 0xdea   : >> { %4546 = vmatprep.subr.bf16.mxu0 %v6117_v29  ;;  %v3550_v29 = vadd.f32 1.0, %v6299_v57 }
 0xdec   : >> { %6302 = vrcp.f32 %v3550_v29 }
 0xded   : >> { %4547 = vmatpush1.bf16.msra.mxu0 %v6115_v34  ;;  %v6168_v34 = vld [vmem:[%s6905_s15 + $0x3e4] ss:$8 sps:$4 sm:$0xff]  }
 0xdee   : >> { %4548 = vmatprep.subr.bf16.mxu0 %v6120_v37  ;;  %v6166_v37 = vld [vmem:[%s6905_s15 + $0x3e0] ss:$8 sps:$4 sm:$0xff]  }
 0xdf1   : >> { %4549 = vmatpush1.bf16.msra.mxu0 %v6118_v36  ;;  %v6171_v36 = vld [vmem:[%s6905_s15 + $0x3f4] ss:$8 sps:$4 sm:$0xff]  }
 0xdf2   : >> { %4550 = vmatprep.subr.bf16.mxu0 %v6123_v49  ;;  %v6301_v49 = vpop.eup %6300 }
 0xdf5   : >> { %4551 = vmatpush1.bf16.msra.mxu0 %v6121_v31  ;;  %v3623_v31 = vmul.f32 %v6301_v49, %v3428_v28 }
 0xdf6   : >> { %4571 = vmatprep.subr.bf16.mxu0 %v6126_v13  ;;  %v6303_v13 = vpop.eup %6302 }
 0xdf7   : >> { %v3639_v7 = vpack.c.bf16 %v3623_v31, %v3623_v31 }
 0xdf8   : >> { %4553 = vmatmul.mubr.bf16.vlgmr.msra.gmra.mrb[24].mxu0 %v3628_v50  ;;  %v6136_v50 = vld [vmem:[%s6905_s15 + $0x340] ss:$8 sps:$4 sm:$0xff]  }
 0xdf9   : >> { %4562 = vmatprep.mubr.bf16.mxu0 %v3637_v42  ;;  %4572 = vmatpush1.bf16.msra.mxu0 %v6124_v41  ;;  %v3622_v41 = vmul.f32 %v6303_v13, %v3426_v8 }
 0xdfa   : >> { %4573 = vmatprep.subr.bf16.mxu0 %v6129_v40 }
 0xdfb   : >> { %v3638_v40 = vpack.c.bf16 %v3622_v41, %v3622_v41 }
 0xdfd   : >> { %4574 = vmatpush1.bf16.msra.mxu0 %v6127_v17 }
 0xdfe   : >> { %4575 = vmatprep.subr.bf16.mxu0 %v6132_v54  ;;  %v6312_v54 = vld [vmem:[%s6972_s28] sm:$0x3f] }
 0xe00   : >> { %4563 = vmatmul.mubr.bf16.gmra.mrb[36].mxu0 %v3636_v59  ;;  %v6313_v59 = vld [vmem:[%s6972_s28 + $0x8] sm:$0x3f]  ;;  %s7935_s28 = sld [smem:[#allocation18_spill]] (%p898_p10) }
 0xe01   : >> { %4576 = vmatpush1.bf16.msra.mxu0 %v6130_v2  ;;  %4603 = vmatprep.mubr.bf16.mxu0 %v3631_v52  ;;  %v6142_v52 = vld [vmem:[%s6905_s15 + $0x360] ss:$8 sps:$4 sm:$0xff]   ;;  %v3773_v2 = vrot.slane %v6312_v54, %v7111_v60 }
 0xe02   : >> { %4577 = vmatprep.subr.bf16.mxu0 %v6135_v18  ;;  %v3777_v18 = vrot.slane %v6313_v59, %v7111_v60 }
 0xe05   : >> { %4578 = vmatpush1.bf16.msra.mxu0 %v6133_v10 }
 0xe06   : >> { %4579 = vmatprep.subr.bf16.mxu0 %v6138_v38  ;;  %p7937_p2 = scmp.ne.s32.totalorder (%p898_p10), %s7935_s28, 0 }
 0xe08   : > { %p6422_p3 = pnand (%p898_p10), %p6421_p1, %p7937_p2 }
 0xe09   : >> { %4580 = vmatpush1.bf16.msra.mxu0 %v6136_v50 }
 0xe0a   : >> { %4581 = vmatprep.subr.bf16.mxu0 %v6141_v26  ;;  %p6423_p4 = pneg (%p898_p10), %p6422_p3 }
 0xe0c   : > { %p6430_p13 = pnand (%p898_p10), %p6429_p11, %p6423_p4 }
 0xe0d   : >> { %4582 = vmatpush1.bf16.msra.mxu0 %v6139_v32 }
 0xe0e   : >> { %4583 = vmatprep.subr.bf16.mxu0 %v6144_v25 }
 0xe11   : >> { %4584 = vmatpush1.bf16.msra.mxu0 %v6142_v52 }
 0xe12   : >> { %4585 = vmatprep.subr.bf16.mxu0 %v6147_v39 }
 0xe15   : >> { %4586 = vmatpush1.bf16.msra.mxu0 %v6145_v47 }
 0xe16   : >> { %4587 = vmatprep.subr.bf16.mxu0 %v6150_v35 }
 0xe19   : >> { %4588 = vmatpush1.bf16.msra.mxu0 %v6148_v48 }
 0xe1a   : >> { %4589 = vmatprep.subr.bf16.mxu0 %v6153_v24 }
 0xe1d   : >> { %4590 = vmatpush1.bf16.msra.mxu0 %v6151_v61 }
 0xe1e   : >> { %4591 = vmatprep.subr.bf16.mxu0 %v6156_v53 }
 0xe21   : >> { %4592 = vmatpush1.bf16.msra.mxu0 %v6154_v14 }
 0xe22   : >> { %4593 = vmatprep.subr.bf16.mxu0 %v6159_v3 }
 0xe25   : >> { %4594 = vmatpush1.bf16.msra.mxu0 %v6157_v58 }
 0xe26   : >> { %4595 = vmatprep.subr.bf16.mxu0 %v6162_v19 }
 0xe29   : >> { %4596 = vmatpush1.bf16.msra.mxu0 %v6160_v27 }
 0xe2a   : >> { %4597 = vmatprep.subr.bf16.mxu0 %v6165_v20 }
 0xe2d   : >> { %4598 = vmatpush1.bf16.msra.mxu0 %v6163_v51 }
 0xe2e   : >> { %4599 = vmatprep.subr.bf16.mxu0 %v6168_v34 }
 0xe31   : >> { %4600 = vmatpush1.bf16.msra.mxu0 %v6166_v37 }
 0xe32   : >> { %4601 = vmatprep.subr.bf16.mxu0 %v6171_v36 }
 0xe35   : >> { %4602 = vmatpush1.bf16.msra.mxu0 %v6169_v9 }
 0xe38   : >> { %4604 = vmatmul.mubr.bf16.vlgmr.msra.gmra.mrb[24].mxu0 %v3630_v11 }
 0xe39   : >> { %4613 = vmatprep.mubr.bf16.mxu0 %v3639_v7 }
 0xe40   : >> { %4614 = vmatmul.mubr.bf16.gmra.mrb[40].mxu0 %v3638_v40 }
 0xe53   : >> { %v4462_v43 = vpop.f32.mrb[28].mxu0 }
 0xe54   : >> { %v4464_v42 = vpop.f32.mrb[29].mxu0  ;;  %v4463_v10 = vadd.f32 %v4462_v43, %v3773_v2 }
 0xe55   : >> { %v4466_v17 = vpop.f32.mrb[30].mxu0  ;;  %v4465_v38 = vadd.f32 %v4464_v42, %v3777_v18 }
 0xe56   : >> { %v4467_v23 = vpop.f32.mrb[31].mxu0 }
 0xe93   : >> { %v4513_v50 = vpop.f32.mrb[32].mxu0 }
 0xe94   : >> { %v4514_v26 = vadd.f32 %v4513_v50, %v4463_v10  ;;  %v4515_v63 = vpop.f32.mrb[33].mxu0 }
 0xe95   : >> { %v4516_v30 = vadd.f32 %v4515_v63, %v4465_v38  ;;  %v4517_v11 = vpop.f32.mrb[34].mxu0 }
 0xe96   : >> { %v4518_v28 = vpop.f32.mrb[35].mxu0 }
 0xed3   : >> { %v4564_v32 = vpop.f32.mrb[36].mxu0 }
 0xed4   : >> { %v4565_v25 = vadd.f32 %v4564_v32, %v4514_v26  ;;  %v4566_v15 = vpop.f32.mrb[37].mxu0 }
 0xed5   : >> { %v4567_v52 = vadd.f32 %v4566_v15, %v4516_v30  ;;  %v4568_v39 = vpop.f32.mrb[38].mxu0 }
 0xed6   : >> { %v4569_v8 = vpop.f32.mrb[39].mxu0  ;;  %v6314_v39 = vld [vmem:[%s7901_s12 + $0x40] sm:$0xff] (%p898_p10)  }
 0xed7   : > { %v6315_v8 = vld [vmem:[%s7901_s12] sm:$0xff] (%p898_p10)   ;;  %5574 = vmatprep.subr.bf16.mxu0 (%p898_p10), %v6314_v39 }
 0xed8   : > { %5575 = vmatpush3.bf16.msra.mxu0 (%p898_p10), %v6315_v8 }
 0xf0b   : >> { %v4605_v55 = vpop.f32.mrb[24].mxu0 }
 0xf0c   : >> { %v5628_v47 = vadd.f32 %v4605_v55, %v3773_v2  ;;  %v4607_v35 = vpop.f32.mrb[25].mxu0  ;;  %v6316_v55 = vld [vmem:[%s7901_s12 + $0x48] sm:$0xff] (%p898_p10)  }
 0xf0d   : >> { %v5629_v22 = vadd.f32 %v4607_v35, %v3777_v18  ;;  %v4609_v48 = vpop.f32.mrb[26].mxu0  ;;  %5576 = vmatprep.subr.bf16.mxu0 (%p898_p10), %v6316_v55  ;;  %v6318_v35 = vld [vmem:[%s7901_s12 + $0x50] sm:$0xff] (%p898_p10)  }
 0xf0e   : >> { %v4622_v60 = vadd.f32 %v5628_v47, %v7196_v62  ;;  %v5630_v24 = vadd.f32 %v4609_v48, %v3773_v2  ;;  %v4611_v33 = vpop.f32.mrb[27].mxu0  ;;  %v6317_v47 = vld [vmem:[%s7901_s12 + $0x8] sm:$0xff] (%p898_p10)   ;;  %v6320_v48 = vld [vmem:[%s7901_s12 + $0x58] sm:$0xff] (%p898_p10)  }
 0xf0f   : >> { %v4623_v61 = vadd.f32 %v5629_v22, %v7198_v4  ;;  %v5631_v53 = vadd.f32 %v4611_v33, %v3777_v18  ;;  %5577 = vmatpush3.bf16.msra.mxu0 (%p898_p10), %v6317_v47  ;;  %v6319_v22 = vld [vmem:[%s7901_s12 + $0x10] sm:$0xff] (%p898_p10)   ;;  %v6323_v33 = vld [vmem:[%s7901_s12 + $0x20] sm:$0xff] (%p898_p10)  }
 0xf10   : >> { %4628 = vst [vmem:[#allocation2] sm:$0xff] %v4622_v60  ;;  %v4624_v14 = vadd.f32 %v5630_v24, %v7200_v5  ;;  %5578 = vmatprep.subr.bf16.mxu0 (%p898_p10), %v6318_v35  ;;  %v6321_v60 = vld [vmem:[%s7901_s12 + $0x18] sm:$0xff] (%p898_p10)   ;;  %v6322_v24 = vld [vmem:[%s7901_s12 + $0x60] sm:$0xff] (%p898_p10)  }
 0xf11   : >> { %4629 = vst [vmem:[#allocation2 + $0x8] sm:$0xff] %v4623_v61  ;;  %v4625_v3 = vadd.f32 %v5631_v53, %v7202_v56  ;;  %v6324_v61 = vld [vmem:[%s7901_s12 + $0x68] sm:$0xff] (%p898_p10)  }
 0xf12   : >> { %4630 = vst [vmem:[#allocation2 + $0x10] sm:$0xff] %v4624_v14  ;;  %v6325_v53 = vld [vmem:[%s7901_s12 + $0x28] sm:$0xff] (%p898_p10)   ;;  %v6326_v14 = vld [vmem:[%s7901_s12 + $0x70] sm:$0xff] (%p898_p10)  }
 0xf13   : >> { %4631 = vst [vmem:[#allocation2 + $0x18] sm:$0xff] %v4625_v3  ;;  %v4615_v12 = vpop.f32.mrb[40].mxu0  ;;  %5579 = vmatpush3.bf16.msra.mxu0 (%p898_p10), %v6319_v22  ;;  %v6327_v3 = vld [vmem:[%s7901_s12 + $0x30] sm:$0xff] (%p898_p10)  }
 0xf14   : >> { %v4616_v58 = vadd.f32 %v4615_v12, %v4565_v25  ;;  %v4617_v6 = vpop.f32.mrb[41].mxu0  ;;  %5580 = vmatprep.subr.bf16.mxu0 (%p898_p10), %v6320_v48  ;;  %v6328_v12 = vld [vmem:[%s7901_s12 + $0x78] sm:$0xff] (%p898_p10)  }
 0xf15   : >> { %v4618_v19 = vadd.f32 %v4617_v6, %v4567_v52  ;;  %v4619_v27 = vpop.f32.mrb[42].mxu0 }
 0xf16   : >> { %v4626_v62 = vadd.f32 %v4616_v58, %v7208_v16  ;;  %v4620_v57 = vpop.f32.mrb[43].mxu0  ;;  %v6329_v58 = vld [vmem:[%s7901_s12 + $0x38] sm:$0xff] (%p898_p10)  }
 0xf17   : >> { %v4627_v20 = vadd.f32 %v4618_v19, %v7210_v21  ;;  %v4634_v4 = vld [vmem:[#allocation2] sm:$0xfe] (%p898_p10)  ;;  %5581 = vmatpush3.bf16.msra.mxu0 (%p898_p10), %v6321_v60 }
 0xf18   : >> { %4632 = vst [vmem:[#allocation2 + $0x20] sm:$0x1] %v4626_v62  ;;  %900 = sbr.rel (!%p898_p10) target bundleno = 731 (0x2db), region = 137  ;;  %v4635_v5 = vld [vmem:[#allocation2 + $0x8] sm:$0xfe] (%p898_p10)  ;;  %v4641_v29 = vsel (%p898_p10), %vm4640_vm5, %v4634_v4, 0.0  ;;  %5582 = vmatprep.subr.bf16.mxu0 (%p898_p10), %v6322_v24 }
 0xf19   : >> { %4633 = vst [vmem:[#allocation2 + $0x28] sm:$0x1] %v4627_v20  ;;  %v4636_v56 = vld [vmem:[#allocation2 + $0x10] sm:$0xff] (%p898_p10)  ;;  %v4642_v51 = vsel (%p898_p10), %vm4640_vm5, %v4635_v5, 0.0 }
 0xf1a   : > { %v4643_v37 = vadd.f32 (%p898_p10), %v4642_v51, %v4641_v29  ;;  %v4637_v49 = vld [vmem:[#allocation2 + $0x18] sm:$0xff] (%p898_p10)  ;;  %v4701_v51 = vrot.slane (%p898_p10), %v6729_v0, %v6876_v45 }
 0xf1b   : > { %v4646_v31 = vadd.f32 (%p898_p10), %v4637_v49, %v4636_v56  ;;  %5583 = vmatpush3.bf16.msra.mxu0 (%p898_p10), %v6323_v33 }
 0xf1c   : > { %4644 = vadd.xlane.f32.xlu0 (%p898_p10), %v4643_v37  ;;  %5584 = vmatprep.subr.bf16.mxu0 (%p898_p10), %v6324_v61 }
 0xf1f   : > { %v4638_v16 = vld [vmem:[#allocation2 + $0x20] sm:$0x1]  ;;  %5585 = vmatpush3.bf16.msra.mxu0 %v6325_v53 }
 0xf20   : > { %v4639_v34 = vld [vmem:[#allocation2 + $0x28] sm:$0x1]  ;;  %v4649_v21 = vsel %vm778_vm2, %v4638_v16, 0.0  ;;  %4647 = vadd.xlane.f32.xlu0 %v4646_v31  ;;  %5586 = vmatprep.subr.bf16.mxu0 %v6326_v14 }
 0xf21   : > { %v4650_v36 = vsel %vm778_vm2, %v4639_v34, 0.0 }
 0xf22   : > { %v4651_v9 = vadd.f32 %v4650_v36, %v4649_v21  ;;  %v4722_v36 = vrot.slane %v6734_v1, %v6879_v46 }
 0xf23   : > { %5587 = vmatpush3.bf16.msra.mxu0 %v6327_v3 }
 0xf24   : > { %4652 = vadd.xlane.f32.xlu1 %v4651_v9  ;;  %5588 = vmatprep.subr.bf16.mxu0 %v6328_v12 }
 0xf27   : > { %5589 = vmatpush3.bf16.msra.mxu0 %v6329_v58 }
 0xfa9   : > { %v4645_v44 = vpop.xlane.xlu0 %4644 }
 0xfaa   : > { %v4654_v13 = vmul.f32 0.00390625, %v4645_v44 }
 0xfac   : > { %v7745_v40 = vsub.f32 %v4634_v4, %v4654_v13  ;;  %v7747_v43 = vsub.f32 %v4635_v5, %v4654_v13 }
 0xfad   : > { %v4648_v23 = vpop.xlane.xlu0 %4647 }
 0xfae   : > { %v4655_v54 = vmul.f32 0.00390625, %v4648_v23  ;;  %v4663_v2 = vmul.f32 %v7745_v40, %v7745_v40  ;;  %v4664_v59 = vmul.f32 %v7747_v43, %v7747_v43 }
 0xfb0   : > { %v7761_v38 = vsub.f32 %v4636_v56, %v4655_v54  ;;  %v7763_v50 = vsub.f32 %v4637_v49, %v4655_v54  ;;  %v4669_v26 = vsel %vm4640_vm5, %v4663_v2, 0.0  ;;  %v4670_v63 = vsel %vm4640_vm5, %v4664_v59, 0.0 }
 0xfb1   : > { %v4653_v7 = vpop.xlane.xlu1 %4652  ;;  %v4671_v30 = vadd.f32 %v4670_v63, %v4669_v26  ;;  %v4718_v49 = vrot.slane %v6734_v1, %v6876_v45 }
 0xfb2   : > { %v4656_v41 = vmul.f32 0.00390625, %v4653_v7  ;;  %v4665_v32 = vmul.f32 %v7761_v38, %v7761_v38  ;;  %v4666_v25 = vmul.f32 %v7763_v50, %v7763_v50 }
 0xfb3   : > { %4672 = vadd.xlane.f32.xlu1 %v4671_v30 }
 0xfb4   : > { %v7749_v42 = vsub.f32 %v4638_v16, %v4656_v41  ;;  %v7751_v17 = vsub.f32 %v4639_v34, %v4656_v41  ;;  %v4674_v52 = vadd.f32 %v4666_v25, %v4665_v32  ;;  %v4705_v16 = vrot.slane %v6729_v0, %v6879_v46 }
 0xfb6   : > { %v4667_v18 = vmul.f32 %v7749_v42, %v7749_v42  ;;  %v4668_v10 = vmul.f32 %v7751_v17, %v7751_v17  ;;  %4675 = vadd.xlane.f32.xlu0 %v4674_v52 }
 0xfb8   : > { %v4677_v11 = vsel %vm778_vm2, %v4667_v18, 0.0  ;;  %v4678_v28 = vsel %vm778_vm2, %v4668_v10, 0.0 }
 0xfb9   : > { %v4679_v15 = vadd.f32 %v4678_v28, %v4677_v11 }
 0xfbb   : > { %4680 = vadd.xlane.f32.xlu1 %v4679_v15 }
0x1040   : > { %v4673_v6 = vpop.xlane.xlu1 %4672 }
0x1041   : > { %v4682_v19 = vmul.f32 0.00390625, %v4673_v6 }
0x1043   : > { %v4685_v27 = vadd.f32 1e-05, %v4682_v19  ;;  %v4676_v62 = vpop.xlane.xlu0 %4675 }
0x1044   : > { %v4683_v57 = vmul.f32 0.00390625, %v4676_v62 }
0x1045   : > { %6330 = vrsqrt.f32 %v4685_v27 }
0x1046   : > { %v4686_v5 = vadd.f32 1e-05, %v4683_v57 }
0x1048   : > { %v4681_v20 = vpop.xlane.xlu1 %4680  ;;  %6332 = vrsqrt.f32 %v4686_v5 }
0x1049   : > { %v4684_v4 = vmul.f32 0.00390625, %v4681_v20 }
0x104b   : > { %v4687_v56 = vadd.f32 1e-05, %v4684_v4 }
0x104d   : > { %6334 = vrsqrt.f32 %v4687_v56 }
0x104f   : > { %v6331_v29 = vpop.eup %6330 }
0x1050   : > { %v4691_v34 = vmul.f32 %v6331_v29, %v7745_v40  ;;  %v4692_v37 = vmul.f32 %v6331_v29, %v7747_v43 }
0x1052   : > { %v6333_v21 = vpop.eup %6332  ;;  %v4709_v13 = vmul.f32 %v4705_v16, %v4692_v37  ;;  %v4708_v7 = vmul.f32 %v4701_v51, %v4691_v34 }
0x1053   : > { %v4693_v31 = vmul.f32 %v6333_v21, %v7761_v38  ;;  %v4694_v44 = vmul.f32 %v6333_v21, %v7763_v50 }
0x1054   : > { %v4726_v2 = vadd.f32 %v4722_v36, %v4709_v13  ;;  %v4725_v59 = vadd.f32 %v4718_v49, %v4708_v7 }
0x1055   : > { %v4710_v40 = vmul.f32 %v4701_v51, %v4693_v31  ;;  %v4711_v43 = vmul.f32 %v4705_v16, %v4694_v44 }
0x1057   : > { %v6335_v9 = vpop.eup %6334  ;;  %v4728_v46 = vadd.f32 %v4722_v36, %v4711_v43  ;;  %v4727_v18 = vadd.f32 %v4718_v49, %v4710_v40 }
0x1058   : > { %v4696_v0 = vmul.f32 %v6335_v9, %v7751_v17  ;;  %v4695_v41 = vmul.f32 %v6335_v9, %v7749_v42 }
0x1059   : > { %v4732_v10 = vpack.c.bf16 %v4728_v46, %v4726_v2  ;;  %v4731_v38 = vpack.c.bf16 %v4727_v18, %v4725_v59 }
0x105a   : > { %v4713_v23 = vmul.f32 %v4705_v16, %v4696_v0  ;;  %v4712_v54 = vmul.f32 %v4701_v51, %v4695_v41 }
0x105b   : > { %v4783_v63 = vshll.u32 %v4732_v10, 16  ;;  %v4771_v30 = vshll.u32 %v4731_v38, 16  ;;  %v4781_v42 = vshrl.u32 %v4732_v10, 16  ;;  %v4769_v32 = vshrl.u32 %v4731_v38, 16 }
0x105c   : > { %v4730_v1 = vadd.f32 %v4722_v36, %v4713_v23  ;;  %v4729_v45 = vadd.f32 %v4718_v49, %v4712_v54 }
0x105d   : > { %v4785_v28 = vrot.slane %v4783_v63, 1  ;;  %v4773_v25 = vrot.slane %v4771_v30, 1 }
0x105e   : > { %v4734_v26 = vpack.c.bf16 %v4730_v1, %v4730_v1  ;;  %v4733_v50 = vpack.c.bf16 %v4729_v45, %v4729_v45 }
0x105f   : > { %v4786_v39 = vor.u32 %v4785_v28, %v4781_v42  ;;  %v4774_v8 = vor.u32 %v4773_v25, %v4769_v32 }
0x1060   : > { %v4788_v11 = vshll.u32 %v4734_v26, 16  ;;  %v4776_v17 = vshll.u32 %v4733_v50, 16 }
0x1062   : > { %v4790_v15 = vrot.slane %v4788_v11, 1  ;;  %v4778_v52 = vrot.slane %v4776_v17, 1 }
0x1064   : > { %v4791_v55 = vsel %vm4767_vm6, %v4786_v39, %v4790_v15  ;;  %v4779_v47 = vsel %vm4767_vm6, %v4774_v8, %v4778_v52 }
0x1065   : > { %4922 = vmatprep.mubr.bf16.mxu0 %v4791_v55 }
0x1066   : > { %4923 = vmatmul.mubr.bf16.vlgmr.msra.gmra.mrb[0].mxu0 %v4779_v47 }
0x1139   : > { %v5590_v35 = vpop.f32.mrb[0].mxu0 }
0x113a   : > { %v5591_v22 = vpop.f32.mrb[1].mxu0 }
0x113b   : > { %v5592_v48 = vadd.f32 %v5591_v22, %v5590_v35  ;;  %v5593_v60 = vpop.f32.mrb[2].mxu0 }
0x113c   : > { %v5594_v24 = vpop.f32.mrb[3].mxu0 }
0x113d   : > { %4931 = vst [vmem:[%s6892_s16] sm:$0xff] %v5592_v48  ;;  %v5595_v33 = vadd.f32 %v5594_v24, %v5593_v60 }
0x113f   : > { %4932 = vst [vmem:[%s6892_s16 + $0x8] sm:$0xff] %v5595_v33 }
0x1140   : > { %6433 = shalt.err (!%p6430_p13)
}
0x1141   : > { %s6434_s23 = scalar_lea.hbm %s7840_s21, 256  ;;  %s6438_s7 = scalar_lea.hbm %s7936_s17, 512 }
0x1142   : > { %p6435_p5 = scmp.ne.s32.totalorder %s7840_s21, %s6434_s23  ;;  %p6439_p9 = scmp.lt.u32.totalorder %s7840_s21, %s7936_s17 }
0x1143   : > { %p6440_p12 = scmp.lt.u32.totalorder %s6438_s7, %s6434_s23  ;;  %p6442_p1 = scmp.lt.u32.totalorder %s6434_s23, %s7840_s21 }
0x1144   : > { %p6436_p0 = pnand %p6435_p5, %p7937_p2 }
0x1145   : > { %p6441_p10 = por %p6440_p12, %p6439_p9 }
0x1146   : > { %p6437_p6 = pneg %p6436_p0 }
0x1147   : > { %p6443_p3 = por %p6442_p1, %p6441_p10 }
0x1149   : > { %p6444_p4 = pnand %p6443_p3, %p6437_p6 }
0x114b   : > { %6447 = shalt.err (!%p6444_p4)
}
0x114c   : > { %s6511_s20 = smov 128   ;;  %s6512_s14 = smov 8  }
0x114d   : > { %5656 = dma.vmem_to_hbm [thread:$0]  (%p7937_p2), %s7842_s18, 256, %s7840_s21, %s7848_s29, %s6511_s20, %s6511_s20, %s6512_s14  }
0x114e PF: > { %s7938_s19 = sld [smem:[#allocation15_spill]]  ;;  %s7939_s22 = sld [smem:[#allocation13_spill]] }
0x114f   : > { %s7940_s30 = sld [smem:[#allocation19_spill]] }
0x1154   : > { %p5678_p7 = scmp.ge.s32.totalorder %s7938_s19, 2  ;;  %s4962_s24 = sand.u32 1, %s7939_s22  }
0x1155   : > { %p7941_p8 = scmp.ne.s32.totalorder %s7940_s30, 0  ;;  %s4963_s13 = scalar_lea.sflag [#allocation5], %s4962_s24 }
0x1157   : > { %p5669_p11 = pnand %p5678_p7, %p7941_p8 }
0x1159   : > { %6477 = dma.done.wait (!%p5669_p11), %s4963_s13, 256  }
0x115a   : > { %6479 = vsyncadd (!%p5669_p11), %s4963_s13, 4294967040  ;;  %s7942_s28 = sld [smem:[#allocation16_spill]]  ;;  %s7943_s23 = sld [smem:[#allocation14_spill]] }
0x115b   : > { %s7944_s27 = sld [smem:[#allocation17_spill]]  ;;  %s7945_s25 = smov %s6486_s26 }
0x1160   : > { %p25_p13 = scmp.ge.s32.totalorder %s7942_s28, 4   ;;  %s7946_s26 = smov %s7943_s23 }
0x1162   :  { %27 = sbr.rel (!%p25_p13) target bundleno = 8 (0x8), region = 148 }
0x1169   :  { %4968 = vsyncpa [#allocation4], 1 }
0x116a   :  { %4970 = vsyncpa [#allocation4 + $0x1], 1 }
0x116b   :  { %4971 = vsyncpa [#allocation7], 1 }
0x116c   :  { %4972 = vsyncpa [#allocation5], 1 }
0x116d   :  { %4974 = vsyncpa [#allocation5 + $0x1], 1 }

</bundles_post_ra>
